<compile_context>
chip_gen: v6e
topology: v6e:2x2x1
jax: 0.10.0
libtpu: 0.0.40
codegen_flags: <defaults>
</compile_context>

<pallas_src>
import functools
import math

import jax
import jax.numpy as jnp
from jax.experimental import pallas as pl
from jax.experimental.pallas import tpu as pltpu


# ----------------------------- fused model kernel -----------------------------

def _model_kernel(x_ref, pos_ref, emb_w_ref, emb_b_ref,
                  wqkv_ref, bqkv_ref, wo_ref, bo_ref,
                  ln1g_ref, ln1b_ref, w1_ref, b1_ref, w2_ref, b2_ref,
                  ln2g_ref, ln2b_ref, projw_ref, projb_ref,
                  out_ref, *, num_layers, num_heads, head_dim, batch, seq):
    BL = batch * seq
    E = num_heads * head_dim
    scale = 1.0 / math.sqrt(head_dim)

    def layer_norm(z, g, b):
        mean = jnp.mean(z, axis=-1, keepdims=True)
        zc = z - mean
        var = jnp.mean(zc * zc, axis=-1, keepdims=True)
        return zc * jax.lax.rsqrt(var + 1e-5) * g + b

    # ---- embedding + positional encoding (fused) ----
    h = (jnp.dot(x_ref[...].astype(jnp.bfloat16), emb_w_ref[...],
                 preferred_element_type=jnp.float32)
         + emb_b_ref[...] + pos_ref[...])                       # (B*L, E) f32

    # ---- transformer encoder layers (static unroll, weights resident in VMEM) ----
    for l in range(num_layers):
        # packed QKV projection: one (B*L, E) @ (E, 3E)
        h_b = h.astype(jnp.bfloat16)
        qkv = (jnp.dot(h_b, wqkv_ref[l], preferred_element_type=jnp.float32)
               + bqkv_ref[l])                                   # (B*L, 3E)
        q = qkv[:, 0 * E:1 * E]
        k = qkv[:, 1 * E:2 * E]
        v = qkv[:, 2 * E:3 * E]

        wo_l = wo_ref[l]                                        # (E, E) bf16
        att = jnp.zeros((BL, E), jnp.float32) + bo_ref[l]       # out-proj bias
        for hh in range(num_heads):                             # static, B-batched
            lo = hh * head_dim
            qh = q[:, lo:lo + head_dim].reshape(batch, seq, head_dim)
            kh = k[:, lo:lo + head_dim].reshape(batch, seq, head_dim)
            vh = v[:, lo:lo + head_dim].reshape(batch, seq, head_dim)
            s = jnp.einsum('bqd,bkd->bqk', qh, kh,
                           preferred_element_type=jnp.float32) * scale
            s = s - jnp.max(s, axis=-1, keepdims=True)
            p = jnp.exp(s)
            p = p / jnp.sum(p, axis=-1, keepdims=True)
            oh = jnp.einsum('bqk,bkd->bqd', p, vh,
                            preferred_element_type=jnp.float32)
            oh = oh.reshape(BL, head_dim)
            # fold this head's slice of the output projection (no concat)
            att = att + jnp.dot(oh.astype(jnp.bfloat16),
                                wo_l[lo:lo + head_dim, :],
                                preferred_element_type=jnp.float32)

        # residual + LayerNorm (post-norm)
        h = layer_norm(h + att, ln1g_ref[l], ln1b_ref[l])

        # feed-forward (ReLU)
        f = (jnp.dot(h.astype(jnp.bfloat16), w1_ref[l],
                     preferred_element_type=jnp.float32) + b1_ref[l])
        f = jnp.maximum(f, 0.0)
        f = (jnp.dot(f.astype(jnp.bfloat16), w2_ref[l],
                     preferred_element_type=jnp.float32) + b2_ref[l])
        h = layer_norm(h + f, ln2g_ref[l], ln2b_ref[l])

    # ---- mean pool over sequence, then project the pooled vector ----
    pooled = jnp.mean(h.reshape(batch, seq, E), axis=1)         # (B, E)
    out_ref[...] = (jnp.dot(pooled.astype(jnp.bfloat16), projw_ref[...],
                            preferred_element_type=jnp.float32)
                    + projb_ref[...])                           # (B, P*P)


# ----------------------------- parameters -----------------------------

def init_params(key, input_dim, embed_dim, num_heads, num_layers,
                dim_feedforward, patch_size):
    """Deterministic synthetic parameters (shapes follow the PyTorch __init__).

    Weight matrices are stored bf16 (memory-bound forward); biases / LN / pos
    stay f32. QKV weights are packed (q|k|v) along the output dim, matching
    PyTorch's in_proj ordering.
    """
    def dense(k, fan_in, fan_out):
        k1, k2 = jax.random.split(k)
        bound = 1.0 / math.sqrt(fan_in)
        w = jax.random.uniform(k1, (fan_in, fan_out), jnp.float32, -bound, bound)
        b = jax.random.uniform(k2, (fan_out,), jnp.float32, -bound, bound)
        return w, b

    E, F, nl = embed_dim, dim_feedforward, num_layers
    keys = jax.random.split(key, 3 + num_layers)
    emb_w, emb_b = dense(keys[0], input_dim, E)
    pos = jax.random.normal(keys[1], (1024, E), jnp.float32)
    proj_w, proj_b = dense(keys[2], E, patch_size * patch_size)

    wqkv, bqkv, wo, bo, w1, b1, w2, b2 = ([] for _ in range(8))
    for li in range(num_layers):
        lk = jax.random.split(keys[3 + li], 4)
        a, ab = dense(lk[0], E, 3 * E)      # packed q|k|v
        c, cb = dense(lk[1], E, E)          # attention out-proj
        d, db = dense(lk[2], E, F)          # FFN up
        e, eb = dense(lk[3], F, E)          # FFN down
        wqkv.append(a); bqkv.append(ab); wo.append(c); bo.append(cb)
        w1.append(d); b1.append(db); w2.append(e); b2.append(eb)

    return dict(
        emb_w=emb_w.astype(jnp.bfloat16),
        emb_b=emb_b.reshape(1, E),
        pos=pos,
        wqkv=jnp.stack(wqkv).astype(jnp.bfloat16),          # (nl, E, 3E)
        bqkv=jnp.stack(bqkv).reshape(nl, 1, 3 * E),
        wo=jnp.stack(wo).astype(jnp.bfloat16),              # (nl, E, E)
        bo=jnp.stack(bo).reshape(nl, 1, E),
        ln1_g=jnp.ones((nl, 1, E), jnp.float32),
        ln1_b=jnp.zeros((nl, 1, E), jnp.float32),
        w1=jnp.stack(w1).astype(jnp.bfloat16),              # (nl, E, F)
        b1=jnp.stack(b1).reshape(nl, 1, F),
        w2=jnp.stack(w2).astype(jnp.bfloat16),              # (nl, F, E)
        b2=jnp.stack(b2).reshape(nl, 1, E),
        ln2_g=jnp.ones((nl, 1, E), jnp.float32),
        ln2_b=jnp.zeros((nl, 1, E), jnp.float32),
        proj_w=proj_w.astype(jnp.bfloat16),                 # (E, P*P)
        proj_b=proj_b.reshape(1, patch_size * patch_size),
    )


# ----------------------------- forward wrapper -----------------------------

def variable_length_vector_to_image(params, x, *, image_height, image_width,
                                    patch_size, num_heads):
    B, L, Din = x.shape
    E = params["emb_b"].shape[-1]
    nl = params["wqkv"].shape[0]
    P = patch_size
    PP = P * P
    Hp, Wp = image_height // P, image_width // P
    num_patches = Hp * Wp
    head_dim = E // num_heads

    # fold batch into the M dimension; positional encoding tiled per batch row
    x2 = x.reshape(B * L, Din)
    pos_t = jnp.tile(params["pos"][:L], (B, 1))                 # (B*L, E)

    kern = functools.partial(
        _model_kernel, num_layers=nl, num_heads=num_heads,
        head_dim=head_dim, batch=B, seq=L)

    def fullspec(a):
        nd = a.ndim
        return pl.BlockSpec(a.shape, lambda i: (0,) * nd)

    args = (x2, pos_t, params["emb_w"], params["emb_b"],
            params["wqkv"], params["bqkv"], params["wo"], params["bo"],
            params["ln1_g"], params["ln1_b"],
            params["w1"], params["b1"], params["w2"], params["b2"],
            params["ln2_g"], params["ln2_b"],
            params["proj_w"], params["proj_b"])

    proj = pl.pallas_call(
        kern,
        out_shape=jax.ShapeDtypeStruct((B, PP), jnp.float32),
        grid=(1,),
        in_specs=[fullspec(a) for a in args],
        out_specs=pl.BlockSpec((B, PP), lambda i: (0, 0)),
        compiler_params=pltpu.CompilerParams(
            dimension_semantics=("arbitrary",),
            vmem_limit_bytes=32 * 1024 * 1024),
    )(*args)                                                    # (B, P*P)

    # project-before-broadcast (Linear commutes with repeat over patches),
    # then PatchToImage: pure reshape/transpose glue (no compute).
    patches = jnp.broadcast_to(proj[:, None, :], (B, num_patches, PP))
    img = patches.reshape(B, Hp, Wp, 1, P, P)
    img = img.transpose(0, 3, 1, 4, 2, 5)
    img = img.reshape(B, 1, image_height, image_width)          # NCHW
    return img


# --------------------------------- main -----------------------------------

if __name__ == "__main__":
    # small, consistent config
    B, L = 2, 8
    input_dim = 32
    embed_dim, num_heads, num_layers = 128, 4, 2
    dim_feedforward = 2048                       # nn.TransformerEncoderLayer default
    image_height, image_width, patch_size = 32, 64, 8   # num_patches = 4*8 = 32

    key = jax.random.PRNGKey(0)
    pkey, xkey = jax.random.split(key)
    params = init_params(pkey, input_dim, embed_dim, num_heads, num_layers,
                         dim_feedforward, patch_size)
    x = jax.random.normal(xkey, (B, L, input_dim), jnp.float32)

    fwd = jax.jit(functools.partial(
        variable_length_vector_to_image,
        image_height=image_height, image_width=image_width,
        patch_size=patch_size, num_heads=num_heads))

    img = fwd(params, x)
    jax.block_until_ready(img)
    assert img.shape == (B, 1, image_height, image_width), img.shape
    assert img.dtype == jnp.float32
    print("KERNEL_OK")
</pallas_src>

<mosaic_0001>
module attributes {stable_mosaic.version = 11 : i64} {
  func.func @_model_kernel(%arg0: i32, %arg1: memref<16x32xf32, #tpu.memory_space<vmem>>, %arg2: memref<16x128xf32, #tpu.memory_space<vmem>>, %arg3: memref<32x128xbf16, #tpu.memory_space<vmem>>, %arg4: memref<1x128xf32, #tpu.memory_space<vmem>>, %arg5: memref<2x128x384xbf16, #tpu.memory_space<vmem>>, %arg6: memref<2x1x384xf32, #tpu.memory_space<vmem>>, %arg7: memref<2x128x128xbf16, #tpu.memory_space<vmem>>, %arg8: memref<2x1x128xf32, #tpu.memory_space<vmem>>, %arg9: memref<2x1x128xf32, #tpu.memory_space<vmem>>, %arg10: memref<2x1x128xf32, #tpu.memory_space<vmem>>, %arg11: memref<2x128x2048xbf16, #tpu.memory_space<vmem>>, %arg12: memref<2x1x2048xf32, #tpu.memory_space<vmem>>, %arg13: memref<2x2048x128xbf16, #tpu.memory_space<vmem>>, %arg14: memref<2x1x128xf32, #tpu.memory_space<vmem>>, %arg15: memref<2x1x128xf32, #tpu.memory_space<vmem>>, %arg16: memref<2x1x128xf32, #tpu.memory_space<vmem>>, %arg17: memref<128x64xbf16, #tpu.memory_space<vmem>>, %arg18: memref<1x64xf32, #tpu.memory_space<vmem>>, %arg19: memref<2x64xf32, #tpu.memory_space<vmem>>) attributes {dimension_semantics = [#tpu.dimension_semantics<arbitrary>], iteration_bounds = array<i64: 1>, scalar_prefetch = 0 : i64, scratch_operands = 0 : i64, tpu.core_type = #tpu.core_type<tc>, window_params = [{pipeline_mode = #tpu.pipeline_mode<synchronous>, transform_indices = @transform_0, window_bounds = array<i64: 16, 32>}, {pipeline_mode = #tpu.pipeline_mode<synchronous>, transform_indices = @transform_1, window_bounds = array<i64: 16, 128>}, {pipeline_mode = #tpu.pipeline_mode<synchronous>, transform_indices = @transform_2, window_bounds = array<i64: 32, 128>}, {pipeline_mode = #tpu.pipeline_mode<synchronous>, transform_indices = @transform_3, window_bounds = array<i64: 1, 128>}, {pipeline_mode = #tpu.pipeline_mode<synchronous>, transform_indices = @transform_4, window_bounds = array<i64: 2, 128, 384>}, {pipeline_mode = #tpu.pipeline_mode<synchronous>, transform_indices = @transform_5, window_bounds = array<i64: 2, 1, 384>}, {pipeline_mode = #tpu.pipeline_mode<synchronous>, transform_indices = @transform_6, window_bounds = array<i64: 2, 128, 128>}, {pipeline_mode = #tpu.pipeline_mode<synchronous>, transform_indices = @transform_7, window_bounds = array<i64: 2, 1, 128>}, {pipeline_mode = #tpu.pipeline_mode<synchronous>, transform_indices = @transform_8, window_bounds = array<i64: 2, 1, 128>}, {pipeline_mode = #tpu.pipeline_mode<synchronous>, transform_indices = @transform_9, window_bounds = array<i64: 2, 1, 128>}, {pipeline_mode = #tpu.pipeline_mode<synchronous>, transform_indices = @transform_10, window_bounds = array<i64: 2, 128, 2048>}, {pipeline_mode = #tpu.pipeline_mode<synchronous>, transform_indices = @transform_11, window_bounds = array<i64: 2, 1, 2048>}, {pipeline_mode = #tpu.pipeline_mode<synchronous>, transform_indices = @transform_12, window_bounds = array<i64: 2, 2048, 128>}, {pipeline_mode = #tpu.pipeline_mode<synchronous>, transform_indices = @transform_13, window_bounds = array<i64: 2, 1, 128>}, {pipeline_mode = #tpu.pipeline_mode<synchronous>, transform_indices = @transform_14, window_bounds = array<i64: 2, 1, 128>}, {pipeline_mode = #tpu.pipeline_mode<synchronous>, transform_indices = @transform_15, window_bounds = array<i64: 2, 1, 128>}, {pipeline_mode = #tpu.pipeline_mode<synchronous>, transform_indices = @transform_16, window_bounds = array<i64: 128, 64>}, {pipeline_mode = #tpu.pipeline_mode<synchronous>, transform_indices = @transform_17, window_bounds = array<i64: 1, 64>}, {pipeline_mode = #tpu.pipeline_mode<synchronous>, transform_indices = @transform_18, window_bounds = array<i64: 2, 64>}]} {
    %c0 = arith.constant 0 : index
    %c0_0 = arith.constant 0 : index
    %0 = vector.load %arg1[%c0, %c0_0] : memref<16x32xf32, #tpu.memory_space<vmem>>, vector<16x32xf32>
    %1 = arith.truncf %0 : vector<16x32xf32> to vector<16x32xbf16>
    %c0_1 = arith.constant 0 : index
    %c0_2 = arith.constant 0 : index
    %2 = vector.load %arg3[%c0_1, %c0_2] : memref<32x128xbf16, #tpu.memory_space<vmem>>, vector<32x128xbf16>
    %cst = arith.constant dense<0.000000e+00> : vector<16x128xf32>
    %3 = tpu.matmul %1, %2, %cst {dimension_numbers = #tpu.dot_dimension_numbers<[1], [0], [0], [1], [0, 0, 1, 1], [], []>} : vector<16x32xbf16>, vector<32x128xbf16>, vector<16x128xf32> -> vector<16x128xf32>
    %c0_3 = arith.constant 0 : index
    %c0_4 = arith.constant 0 : index
    %4 = vector.load %arg4[%c0_3, %c0_4] : memref<1x128xf32, #tpu.memory_space<vmem>>, vector<1x128xf32>
    %5 = vector.broadcast %4 : vector<1x128xf32> to vector<16x128xf32>
    %6 = arith.addf %3, %5 : vector<16x128xf32>
    %c0_5 = arith.constant 0 : index
    %c0_6 = arith.constant 0 : index
    %7 = vector.load %arg2[%c0_5, %c0_6] : memref<16x128xf32, #tpu.memory_space<vmem>>, vector<16x128xf32>
    %8 = arith.addf %6, %7 : vector<16x128xf32>
    %9 = arith.truncf %8 : vector<16x128xf32> to vector<16x128xbf16>
    %c0_7 = arith.constant 0 : index
    %c0_8 = arith.constant 0 : index
    %c0_9 = arith.constant 0 : index
    %10 = vector.load %arg5[%c0_7, %c0_8, %c0_9] : memref<2x128x384xbf16, #tpu.memory_space<vmem>>, vector<1x128x384xbf16>
    %11 = vector.shape_cast %10 : vector<1x128x384xbf16> to vector<128x384xbf16>
    %cst_10 = arith.constant dense<0.000000e+00> : vector<16x384xf32>
    %12 = tpu.matmul %9, %11, %cst_10 {dimension_numbers = #tpu.dot_dimension_numbers<[1], [0], [0], [1], [0, 0, 1, 1], [], []>} : vector<16x128xbf16>, vector<128x384xbf16>, vector<16x384xf32> -> vector<16x384xf32>
    %c0_11 = arith.constant 0 : index
    %c0_12 = arith.constant 0 : index
    %c0_13 = arith.constant 0 : index
    %13 = vector.load %arg6[%c0_11, %c0_12, %c0_13] : memref<2x1x384xf32, #tpu.memory_space<vmem>>, vector<1x1x384xf32>
    %14 = vector.shape_cast %13 : vector<1x1x384xf32> to vector<1x384xf32>
    %15 = vector.broadcast %14 : vector<1x384xf32> to vector<16x384xf32>
    %16 = arith.addf %12, %15 : vector<16x384xf32>
    %17 = vector.extract_strided_slice %16 {offsets = [0, 0], sizes = [16, 128], strides = [1, 1]} : vector<16x384xf32> to vector<16x128xf32>
    %18 = vector.extract_strided_slice %16 {offsets = [0, 128], sizes = [16, 128], strides = [1, 1]} : vector<16x384xf32> to vector<16x128xf32>
    %19 = vector.extract_strided_slice %16 {offsets = [0, 256], sizes = [16, 128], strides = [1, 1]} : vector<16x384xf32> to vector<16x128xf32>
    %c0_14 = arith.constant 0 : index
    %c0_15 = arith.constant 0 : index
    %c0_16 = arith.constant 0 : index
    %20 = vector.load %arg7[%c0_14, %c0_15, %c0_16] : memref<2x128x128xbf16, #tpu.memory_space<vmem>>, vector<1x128x128xbf16>
    %21 = vector.shape_cast %20 : vector<1x128x128xbf16> to vector<128x128xbf16>
    %cst_17 = arith.constant 0.000000e+00 : f32
    %22 = vector.broadcast %cst_17 : f32 to vector<16x128xf32>
    %c0_18 = arith.constant 0 : index
    %c0_19 = arith.constant 0 : index
    %c0_20 = arith.constant 0 : index
    %23 = vector.load %arg8[%c0_18, %c0_19, %c0_20] : memref<2x1x128xf32, #tpu.memory_space<vmem>>, vector<1x1x128xf32>
    %24 = vector.shape_cast %23 : vector<1x1x128xf32> to vector<1x128xf32>
    %25 = vector.broadcast %24 : vector<1x128xf32> to vector<16x128xf32>
    %26 = arith.addf %22, %25 : vector<16x128xf32>
    %27 = vector.extract_strided_slice %17 {offsets = [0, 0], sizes = [16, 32], strides = [1, 1]} : vector<16x128xf32> to vector<16x32xf32>
    %28 = vector.shape_cast %27 : vector<16x32xf32> to vector<2x8x32xf32>
    %29 = vector.extract_strided_slice %18 {offsets = [0, 0], sizes = [16, 32], strides = [1, 1]} : vector<16x128xf32> to vector<16x32xf32>
    %30 = vector.shape_cast %29 : vector<16x32xf32> to vector<2x8x32xf32>
    %31 = vector.extract_strided_slice %19 {offsets = [0, 0], sizes = [16, 32], strides = [1, 1]} : vector<16x128xf32> to vector<16x32xf32>
    %32 = vector.shape_cast %31 : vector<16x32xf32> to vector<2x8x32xf32>
    "tpu.trace_start"() <{level = 10 : i32, message = "bqd,bkd->bqk"}> : () -> ()
    %cst_21 = arith.constant dense<0.000000e+00> : vector<2x8x8xf32>
    %33 = tpu.matmul %28, %30, %cst_21 {dimension_numbers = #tpu.dot_dimension_numbers<[2], [2], [1], [1], [0, 0, 0, 1, 1, 1], [0], [0]>} : vector<2x8x32xf32>, vector<2x8x32xf32>, vector<2x8x8xf32> -> vector<2x8x8xf32>
    "tpu.trace_stop"() : () -> ()
    %cst_22 = arith.constant 0.176776692 : f32
    %34 = vector.broadcast %cst_22 : f32 to vector<2x8x8xf32>
    %35 = arith.mulf %33, %34 : vector<2x8x8xf32>
    %cst_23 = arith.constant dense<0xFF800000> : vector<2x8xf32>
    %36 = vector.multi_reduction <maximumf>, %35, %cst_23 [2] : vector<2x8x8xf32> to vector<2x8xf32>
    %37 = vector.shape_cast %36 : vector<2x8xf32> to vector<2x8x1xf32>
    %38 = vector.broadcast %37 : vector<2x8x1xf32> to vector<2x8x8xf32>
    %39 = arith.subf %35, %38 : vector<2x8x8xf32>
    %40 = math.exp %39 : vector<2x8x8xf32>
    %cst_24 = arith.constant dense<0.000000e+00> : vector<2x8xf32>
    %41 = vector.multi_reduction <add>, %40, %cst_24 [2] : vector<2x8x8xf32> to vector<2x8xf32>
    %42 = vector.shape_cast %41 : vector<2x8xf32> to vector<2x8x1xf32>
    %43 = vector.broadcast %42 : vector<2x8x1xf32> to vector<2x8x8xf32>
    %44 = arith.divf %40, %43 : vector<2x8x8xf32>
    "tpu.trace_start"() <{level = 10 : i32, message = "bqk,bkd->bqd"}> : () -> ()
    %cst_25 = arith.constant dense<0.000000e+00> : vector<2x8x32xf32>
    %45 = tpu.matmul %44, %32, %cst_25 {dimension_numbers = #tpu.dot_dimension_numbers<[2], [1], [1], [2], [0, 0, 0, 1, 1, 2], [0], [0]>} : vector<2x8x8xf32>, vector<2x8x32xf32>, vector<2x8x32xf32> -> vector<2x8x32xf32>
    "tpu.trace_stop"() : () -> ()
    %46 = vector.shape_cast %45 : vector<2x8x32xf32> to vector<16x32xf32>
    %47 = arith.truncf %46 : vector<16x32xf32> to vector<16x32xbf16>
    %48 = vector.extract_strided_slice %21 {offsets = [0, 0], sizes = [32, 128], strides = [1, 1]} : vector<128x128xbf16> to vector<32x128xbf16>
    %cst_26 = arith.constant dense<0.000000e+00> : vector<16x128xf32>
    %49 = tpu.matmul %47, %48, %cst_26 {dimension_numbers = #tpu.dot_dimension_numbers<[1], [0], [0], [1], [0, 0, 1, 1], [], []>} : vector<16x32xbf16>, vector<32x128xbf16>, vector<16x128xf32> -> vector<16x128xf32>
    %50 = arith.addf %26, %49 : vector<16x128xf32>
    %51 = vector.extract_strided_slice %17 {offsets = [0, 32], sizes = [16, 32], strides = [1, 1]} : vector<16x128xf32> to vector<16x32xf32>
    %52 = vector.shape_cast %51 : vector<16x32xf32> to vector<2x8x32xf32>
    %53 = vector.extract_strided_slice %18 {offsets = [0, 32], sizes = [16, 32], strides = [1, 1]} : vector<16x128xf32> to vector<16x32xf32>
    %54 = vector.shape_cast %53 : vector<16x32xf32> to vector<2x8x32xf32>
    %55 = vector.extract_strided_slice %19 {offsets = [0, 32], sizes = [16, 32], strides = [1, 1]} : vector<16x128xf32> to vector<16x32xf32>
    %56 = vector.shape_cast %55 : vector<16x32xf32> to vector<2x8x32xf32>
    "tpu.trace_start"() <{level = 10 : i32, message = "bqd,bkd->bqk"}> : () -> ()
    %cst_27 = arith.constant dense<0.000000e+00> : vector<2x8x8xf32>
    %57 = tpu.matmul %52, %54, %cst_27 {dimension_numbers = #tpu.dot_dimension_numbers<[2], [2], [1], [1], [0, 0, 0, 1, 1, 1], [0], [0]>} : vector<2x8x32xf32>, vector<2x8x32xf32>, vector<2x8x8xf32> -> vector<2x8x8xf32>
    "tpu.trace_stop"() : () -> ()
    %cst_28 = arith.constant 0.176776692 : f32
    %58 = vector.broadcast %cst_28 : f32 to vector<2x8x8xf32>
    %59 = arith.mulf %57, %58 : vector<2x8x8xf32>
    %cst_29 = arith.constant dense<0xFF800000> : vector<2x8xf32>
    %60 = vector.multi_reduction <maximumf>, %59, %cst_29 [2] : vector<2x8x8xf32> to vector<2x8xf32>
    %61 = vector.shape_cast %60 : vector<2x8xf32> to vector<2x8x1xf32>
    %62 = vector.broadcast %61 : vector<2x8x1xf32> to vector<2x8x8xf32>
    %63 = arith.subf %59, %62 : vector<2x8x8xf32>
    %64 = math.exp %63 : vector<2x8x8xf32>
    %cst_30 = arith.constant dense<0.000000e+00> : vector<2x8xf32>
    %65 = vector.multi_reduction <add>, %64, %cst_30 [2] : vector<2x8x8xf32> to vector<2x8xf32>
    %66 = vector.shape_cast %65 : vector<2x8xf32> to vector<2x8x1xf32>
    %67 = vector.broadcast %66 : vector<2x8x1xf32> to vector<2x8x8xf32>
    %68 = arith.divf %64, %67 : vector<2x8x8xf32>
    "tpu.trace_start"() <{level = 10 : i32, message = "bqk,bkd->bqd"}> : () -> ()
    %cst_31 = arith.constant dense<0.000000e+00> : vector<2x8x32xf32>
    %69 = tpu.matmul %68, %56, %cst_31 {dimension_numbers = #tpu.dot_dimension_numbers<[2], [1], [1], [2], [0, 0, 0, 1, 1, 2], [0], [0]>} : vector<2x8x8xf32>, vector<2x8x32xf32>, vector<2x8x32xf32> -> vector<2x8x32xf32>
    "tpu.trace_stop"() : () -> ()
    %70 = vector.shape_cast %69 : vector<2x8x32xf32> to vector<16x32xf32>
    %71 = arith.truncf %70 : vector<16x32xf32> to vector<16x32xbf16>
    %72 = vector.extract_strided_slice %21 {offsets = [32, 0], sizes = [32, 128], strides = [1, 1]} : vector<128x128xbf16> to vector<32x128xbf16>
    %cst_32 = arith.constant dense<0.000000e+00> : vector<16x128xf32>
    %73 = tpu.matmul %71, %72, %cst_32 {dimension_numbers = #tpu.dot_dimension_numbers<[1], [0], [0], [1], [0, 0, 1, 1], [], []>} : vector<16x32xbf16>, vector<32x128xbf16>, vector<16x128xf32> -> vector<16x128xf32>
    %74 = arith.addf %50, %73 : vector<16x128xf32>
    %75 = vector.extract_strided_slice %17 {offsets = [0, 64], sizes = [16, 32], strides = [1, 1]} : vector<16x128xf32> to vector<16x32xf32>
    %76 = vector.shape_cast %75 : vector<16x32xf32> to vector<2x8x32xf32>
    %77 = vector.extract_strided_slice %18 {offsets = [0, 64], sizes = [16, 32], strides = [1, 1]} : vector<16x128xf32> to vector<16x32xf32>
    %78 = vector.shape_cast %77 : vector<16x32xf32> to vector<2x8x32xf32>
    %79 = vector.extract_strided_slice %19 {offsets = [0, 64], sizes = [16, 32], strides = [1, 1]} : vector<16x128xf32> to vector<16x32xf32>
    %80 = vector.shape_cast %79 : vector<16x32xf32> to vector<2x8x32xf32>
    "tpu.trace_start"() <{level = 10 : i32, message = "bqd,bkd->bqk"}> : () -> ()
    %cst_33 = arith.constant dense<0.000000e+00> : vector<2x8x8xf32>
    %81 = tpu.matmul %76, %78, %cst_33 {dimension_numbers = #tpu.dot_dimension_numbers<[2], [2], [1], [1], [0, 0, 0, 1, 1, 1], [0], [0]>} : vector<2x8x32xf32>, vector<2x8x32xf32>, vector<2x8x8xf32> -> vector<2x8x8xf32>
    "tpu.trace_stop"() : () -> ()
    %cst_34 = arith.constant 0.176776692 : f32
    %82 = vector.broadcast %cst_34 : f32 to vector<2x8x8xf32>
    %83 = arith.mulf %81, %82 : vector<2x8x8xf32>
    %cst_35 = arith.constant dense<0xFF800000> : vector<2x8xf32>
    %84 = vector.multi_reduction <maximumf>, %83, %cst_35 [2] : vector<2x8x8xf32> to vector<2x8xf32>
    %85 = vector.shape_cast %84 : vector<2x8xf32> to vector<2x8x1xf32>
    %86 = vector.broadcast %85 : vector<2x8x1xf32> to vector<2x8x8xf32>
    %87 = arith.subf %83, %86 : vector<2x8x8xf32>
    %88 = math.exp %87 : vector<2x8x8xf32>
    %cst_36 = arith.constant dense<0.000000e+00> : vector<2x8xf32>
    %89 = vector.multi_reduction <add>, %88, %cst_36 [2] : vector<2x8x8xf32> to vector<2x8xf32>
    %90 = vector.shape_cast %89 : vector<2x8xf32> to vector<2x8x1xf32>
    %91 = vector.broadcast %90 : vector<2x8x1xf32> to vector<2x8x8xf32>
    %92 = arith.divf %88, %91 : vector<2x8x8xf32>
    "tpu.trace_start"() <{level = 10 : i32, message = "bqk,bkd->bqd"}> : () -> ()
    %cst_37 = arith.constant dense<0.000000e+00> : vector<2x8x32xf32>
    %93 = tpu.matmul %92, %80, %cst_37 {dimension_numbers = #tpu.dot_dimension_numbers<[2], [1], [1], [2], [0, 0, 0, 1, 1, 2], [0], [0]>} : vector<2x8x8xf32>, vector<2x8x32xf32>, vector<2x8x32xf32> -> vector<2x8x32xf32>
    "tpu.trace_stop"() : () -> ()
    %94 = vector.shape_cast %93 : vector<2x8x32xf32> to vector<16x32xf32>
    %95 = arith.truncf %94 : vector<16x32xf32> to vector<16x32xbf16>
    %96 = vector.extract_strided_slice %21 {offsets = [64, 0], sizes = [32, 128], strides = [1, 1]} : vector<128x128xbf16> to vector<32x128xbf16>
    %cst_38 = arith.constant dense<0.000000e+00> : vector<16x128xf32>
    %97 = tpu.matmul %95, %96, %cst_38 {dimension_numbers = #tpu.dot_dimension_numbers<[1], [0], [0], [1], [0, 0, 1, 1], [], []>} : vector<16x32xbf16>, vector<32x128xbf16>, vector<16x128xf32> -> vector<16x128xf32>
    %98 = arith.addf %74, %97 : vector<16x128xf32>
    %99 = vector.extract_strided_slice %17 {offsets = [0, 96], sizes = [16, 32], strides = [1, 1]} : vector<16x128xf32> to vector<16x32xf32>
    %100 = vector.shape_cast %99 : vector<16x32xf32> to vector<2x8x32xf32>
    %101 = vector.extract_strided_slice %18 {offsets = [0, 96], sizes = [16, 32], strides = [1, 1]} : vector<16x128xf32> to vector<16x32xf32>
    %102 = vector.shape_cast %101 : vector<16x32xf32> to vector<2x8x32xf32>
    %103 = vector.extract_strided_slice %19 {offsets = [0, 96], sizes = [16, 32], strides = [1, 1]} : vector<16x128xf32> to vector<16x32xf32>
    %104 = vector.shape_cast %103 : vector<16x32xf32> to vector<2x8x32xf32>
    "tpu.trace_start"() <{level = 10 : i32, message = "bqd,bkd->bqk"}> : () -> ()
    %cst_39 = arith.constant dense<0.000000e+00> : vector<2x8x8xf32>
    %105 = tpu.matmul %100, %102, %cst_39 {dimension_numbers = #tpu.dot_dimension_numbers<[2], [2], [1], [1], [0, 0, 0, 1, 1, 1], [0], [0]>} : vector<2x8x32xf32>, vector<2x8x32xf32>, vector<2x8x8xf32> -> vector<2x8x8xf32>
    "tpu.trace_stop"() : () -> ()
    %cst_40 = arith.constant 0.176776692 : f32
    %106 = vector.broadcast %cst_40 : f32 to vector<2x8x8xf32>
    %107 = arith.mulf %105, %106 : vector<2x8x8xf32>
    %cst_41 = arith.constant dense<0xFF800000> : vector<2x8xf32>
    %108 = vector.multi_reduction <maximumf>, %107, %cst_41 [2] : vector<2x8x8xf32> to vector<2x8xf32>
    %109 = vector.shape_cast %108 : vector<2x8xf32> to vector<2x8x1xf32>
    %110 = vector.broadcast %109 : vector<2x8x1xf32> to vector<2x8x8xf32>
    %111 = arith.subf %107, %110 : vector<2x8x8xf32>
    %112 = math.exp %111 : vector<2x8x8xf32>
    %cst_42 = arith.constant dense<0.000000e+00> : vector<2x8xf32>
    %113 = vector.multi_reduction <add>, %112, %cst_42 [2] : vector<2x8x8xf32> to vector<2x8xf32>
    %114 = vector.shape_cast %113 : vector<2x8xf32> to vector<2x8x1xf32>
    %115 = vector.broadcast %114 : vector<2x8x1xf32> to vector<2x8x8xf32>
    %116 = arith.divf %112, %115 : vector<2x8x8xf32>
    "tpu.trace_start"() <{level = 10 : i32, message = "bqk,bkd->bqd"}> : () -> ()
    %cst_43 = arith.constant dense<0.000000e+00> : vector<2x8x32xf32>
    %117 = tpu.matmul %116, %104, %cst_43 {dimension_numbers = #tpu.dot_dimension_numbers<[2], [1], [1], [2], [0, 0, 0, 1, 1, 2], [0], [0]>} : vector<2x8x8xf32>, vector<2x8x32xf32>, vector<2x8x32xf32> -> vector<2x8x32xf32>
    "tpu.trace_stop"() : () -> ()
    %118 = vector.shape_cast %117 : vector<2x8x32xf32> to vector<16x32xf32>
    %119 = arith.truncf %118 : vector<16x32xf32> to vector<16x32xbf16>
    %120 = vector.extract_strided_slice %21 {offsets = [96, 0], sizes = [32, 128], strides = [1, 1]} : vector<128x128xbf16> to vector<32x128xbf16>
    %cst_44 = arith.constant dense<0.000000e+00> : vector<16x128xf32>
    %121 = tpu.matmul %119, %120, %cst_44 {dimension_numbers = #tpu.dot_dimension_numbers<[1], [0], [0], [1], [0, 0, 1, 1], [], []>} : vector<16x32xbf16>, vector<32x128xbf16>, vector<16x128xf32> -> vector<16x128xf32>
    %122 = arith.addf %98, %121 : vector<16x128xf32>
    %123 = arith.addf %8, %122 : vector<16x128xf32>
    %c0_45 = arith.constant 0 : index
    %c0_46 = arith.constant 0 : index
    %c0_47 = arith.constant 0 : index
    %124 = vector.load %arg9[%c0_45, %c0_46, %c0_47] : memref<2x1x128xf32, #tpu.memory_space<vmem>>, vector<1x1x128xf32>
    %125 = vector.shape_cast %124 : vector<1x1x128xf32> to vector<1x128xf32>
    %c0_48 = arith.constant 0 : index
    %c0_49 = arith.constant 0 : index
    %c0_50 = arith.constant 0 : index
    %126 = vector.load %arg10[%c0_48, %c0_49, %c0_50] : memref<2x1x128xf32, #tpu.memory_space<vmem>>, vector<1x1x128xf32>
    %127 = vector.shape_cast %126 : vector<1x1x128xf32> to vector<1x128xf32>
    %cst_51 = arith.constant dense<0.000000e+00> : vector<16xf32>
    %128 = vector.multi_reduction <add>, %123, %cst_51 [1] : vector<16x128xf32> to vector<16xf32>
    %129 = vector.shape_cast %128 : vector<16xf32> to vector<16x1xf32>
    %cst_52 = arith.constant 1.280000e+02 : f32
    %130 = vector.broadcast %cst_52 : f32 to vector<16x1xf32>
    %131 = arith.divf %129, %130 : vector<16x1xf32>
    %132 = vector.broadcast %131 : vector<16x1xf32> to vector<16x128xf32>
    %133 = arith.subf %123, %132 : vector<16x128xf32>
    %134 = arith.mulf %133, %133 : vector<16x128xf32>
    %cst_53 = arith.constant dense<0.000000e+00> : vector<16xf32>
    %135 = vector.multi_reduction <add>, %134, %cst_53 [1] : vector<16x128xf32> to vector<16xf32>
    %136 = vector.shape_cast %135 : vector<16xf32> to vector<16x1xf32>
    %cst_54 = arith.constant 1.280000e+02 : f32
    %137 = vector.broadcast %cst_54 : f32 to vector<16x1xf32>
    %138 = arith.divf %136, %137 : vector<16x1xf32>
    %cst_55 = arith.constant 9.99999974E-6 : f32
    %139 = vector.broadcast %cst_55 : f32 to vector<16x1xf32>
    %140 = arith.addf %138, %139 : vector<16x1xf32>
    %141 = math.rsqrt %140 : vector<16x1xf32>
    %142 = vector.broadcast %141 : vector<16x1xf32> to vector<16x128xf32>
    %143 = arith.mulf %133, %142 : vector<16x128xf32>
    %144 = vector.broadcast %125 : vector<1x128xf32> to vector<16x128xf32>
    %145 = arith.mulf %143, %144 : vector<16x128xf32>
    %146 = vector.broadcast %127 : vector<1x128xf32> to vector<16x128xf32>
    %147 = arith.addf %145, %146 : vector<16x128xf32>
    %148 = arith.truncf %147 : vector<16x128xf32> to vector<16x128xbf16>
    %c0_56 = arith.constant 0 : index
    %c0_57 = arith.constant 0 : index
    %c0_58 = arith.constant 0 : index
    %149 = vector.load %arg11[%c0_56, %c0_57, %c0_58] : memref<2x128x2048xbf16, #tpu.memory_space<vmem>>, vector<1x128x2048xbf16>
    %150 = vector.shape_cast %149 : vector<1x128x2048xbf16> to vector<128x2048xbf16>
    %cst_59 = arith.constant dense<0.000000e+00> : vector<16x2048xf32>
    %151 = tpu.matmul %148, %150, %cst_59 {dimension_numbers = #tpu.dot_dimension_numbers<[1], [0], [0], [1], [0, 0, 1, 1], [], []>} : vector<16x128xbf16>, vector<128x2048xbf16>, vector<16x2048xf32> -> vector<16x2048xf32>
    %c0_60 = arith.constant 0 : index
    %c0_61 = arith.constant 0 : index
    %c0_62 = arith.constant 0 : index
    %152 = vector.load %arg12[%c0_60, %c0_61, %c0_62] : memref<2x1x2048xf32, #tpu.memory_space<vmem>>, vector<1x1x2048xf32>
    %153 = vector.shape_cast %152 : vector<1x1x2048xf32> to vector<1x2048xf32>
    %154 = vector.broadcast %153 : vector<1x2048xf32> to vector<16x2048xf32>
    %155 = arith.addf %151, %154 : vector<16x2048xf32>
    %cst_63 = arith.constant 0.000000e+00 : f32
    %156 = vector.broadcast %cst_63 : f32 to vector<16x2048xf32>
    %157 = arith.maximumf %155, %156 : vector<16x2048xf32>
    %158 = arith.truncf %157 : vector<16x2048xf32> to vector<16x2048xbf16>
    %c0_64 = arith.constant 0 : index
    %c0_65 = arith.constant 0 : index
    %c0_66 = arith.constant 0 : index
    %159 = vector.load %arg13[%c0_64, %c0_65, %c0_66] : memref<2x2048x128xbf16, #tpu.memory_space<vmem>>, vector<1x2048x128xbf16>
    %160 = vector.shape_cast %159 : vector<1x2048x128xbf16> to vector<2048x128xbf16>
    %cst_67 = arith.constant dense<0.000000e+00> : vector<16x128xf32>
    %161 = tpu.matmul %158, %160, %cst_67 {dimension_numbers = #tpu.dot_dimension_numbers<[1], [0], [0], [1], [0, 0, 1, 1], [], []>} : vector<16x2048xbf16>, vector<2048x128xbf16>, vector<16x128xf32> -> vector<16x128xf32>
    %c0_68 = arith.constant 0 : index
    %c0_69 = arith.constant 0 : index
    %c0_70 = arith.constant 0 : index
    %162 = vector.load %arg14[%c0_68, %c0_69, %c0_70] : memref<2x1x128xf32, #tpu.memory_space<vmem>>, vector<1x1x128xf32>
    %163 = vector.shape_cast %162 : vector<1x1x128xf32> to vector<1x128xf32>
    %164 = vector.broadcast %163 : vector<1x128xf32> to vector<16x128xf32>
    %165 = arith.addf %161, %164 : vector<16x128xf32>
    %166 = arith.addf %147, %165 : vector<16x128xf32>
    %c0_71 = arith.constant 0 : index
    %c0_72 = arith.constant 0 : index
    %c0_73 = arith.constant 0 : index
    %167 = vector.load %arg15[%c0_71, %c0_72, %c0_73] : memref<2x1x128xf32, #tpu.memory_space<vmem>>, vector<1x1x128xf32>
    %168 = vector.shape_cast %167 : vector<1x1x128xf32> to vector<1x128xf32>
    %c0_74 = arith.constant 0 : index
    %c0_75 = arith.constant 0 : index
    %c0_76 = arith.constant 0 : index
    %169 = vector.load %arg16[%c0_74, %c0_75, %c0_76] : memref<2x1x128xf32, #tpu.memory_space<vmem>>, vector<1x1x128xf32>
    %170 = vector.shape_cast %169 : vector<1x1x128xf32> to vector<1x128xf32>
    %cst_77 = arith.constant dense<0.000000e+00> : vector<16xf32>
    %171 = vector.multi_reduction <add>, %166, %cst_77 [1] : vector<16x128xf32> to vector<16xf32>
    %172 = vector.shape_cast %171 : vector<16xf32> to vector<16x1xf32>
    %cst_78 = arith.constant 1.280000e+02 : f32
    %173 = vector.broadcast %cst_78 : f32 to vector<16x1xf32>
    %174 = arith.divf %172, %173 : vector<16x1xf32>
    %175 = vector.broadcast %174 : vector<16x1xf32> to vector<16x128xf32>
    %176 = arith.subf %166, %175 : vector<16x128xf32>
    %177 = arith.mulf %176, %176 : vector<16x128xf32>
    %cst_79 = arith.constant dense<0.000000e+00> : vector<16xf32>
    %178 = vector.multi_reduction <add>, %177, %cst_79 [1] : vector<16x128xf32> to vector<16xf32>
    %179 = vector.shape_cast %178 : vector<16xf32> to vector<16x1xf32>
    %cst_80 = arith.constant 1.280000e+02 : f32
    %180 = vector.broadcast %cst_80 : f32 to vector<16x1xf32>
    %181 = arith.divf %179, %180 : vector<16x1xf32>
    %cst_81 = arith.constant 9.99999974E-6 : f32
    %182 = vector.broadcast %cst_81 : f32 to vector<16x1xf32>
    %183 = arith.addf %181, %182 : vector<16x1xf32>
    %184 = math.rsqrt %183 : vector<16x1xf32>
    %185 = vector.broadcast %184 : vector<16x1xf32> to vector<16x128xf32>
    %186 = arith.mulf %176, %185 : vector<16x128xf32>
    %187 = vector.broadcast %168 : vector<1x128xf32> to vector<16x128xf32>
    %188 = arith.mulf %186, %187 : vector<16x128xf32>
    %189 = vector.broadcast %170 : vector<1x128xf32> to vector<16x128xf32>
    %190 = arith.addf %188, %189 : vector<16x128xf32>
    %191 = arith.truncf %190 : vector<16x128xf32> to vector<16x128xbf16>
    %c1 = arith.constant 1 : index
    %c0_82 = arith.constant 0 : index
    %c0_83 = arith.constant 0 : index
    %192 = vector.load %arg5[%c1, %c0_82, %c0_83] : memref<2x128x384xbf16, #tpu.memory_space<vmem>>, vector<1x128x384xbf16>
    %193 = vector.shape_cast %192 : vector<1x128x384xbf16> to vector<128x384xbf16>
    %cst_84 = arith.constant dense<0.000000e+00> : vector<16x384xf32>
    %194 = tpu.matmul %191, %193, %cst_84 {dimension_numbers = #tpu.dot_dimension_numbers<[1], [0], [0], [1], [0, 0, 1, 1], [], []>} : vector<16x128xbf16>, vector<128x384xbf16>, vector<16x384xf32> -> vector<16x384xf32>
    %c1_85 = arith.constant 1 : index
    %c0_86 = arith.constant 0 : index
    %c0_87 = arith.constant 0 : index
    %195 = vector.load %arg6[%c1_85, %c0_86, %c0_87] : memref<2x1x384xf32, #tpu.memory_space<vmem>>, vector<1x1x384xf32>
    %196 = vector.shape_cast %195 : vector<1x1x384xf32> to vector<1x384xf32>
    %197 = vector.broadcast %196 : vector<1x384xf32> to vector<16x384xf32>
    %198 = arith.addf %194, %197 : vector<16x384xf32>
    %199 = vector.extract_strided_slice %198 {offsets = [0, 0], sizes = [16, 128], strides = [1, 1]} : vector<16x384xf32> to vector<16x128xf32>
    %200 = vector.extract_strided_slice %198 {offsets = [0, 128], sizes = [16, 128], strides = [1, 1]} : vector<16x384xf32> to vector<16x128xf32>
    %201 = vector.extract_strided_slice %198 {offsets = [0, 256], sizes = [16, 128], strides = [1, 1]} : vector<16x384xf32> to vector<16x128xf32>
    %c1_88 = arith.constant 1 : index
    %c0_89 = arith.constant 0 : index
    %c0_90 = arith.constant 0 : index
    %202 = vector.load %arg7[%c1_88, %c0_89, %c0_90] : memref<2x128x128xbf16, #tpu.memory_space<vmem>>, vector<1x128x128xbf16>
    %203 = vector.shape_cast %202 : vector<1x128x128xbf16> to vector<128x128xbf16>
    %cst_91 = arith.constant 0.000000e+00 : f32
    %204 = vector.broadcast %cst_91 : f32 to vector<16x128xf32>
    %c1_92 = arith.constant 1 : index
    %c0_93 = arith.constant 0 : index
    %c0_94 = arith.constant 0 : index
    %205 = vector.load %arg8[%c1_92, %c0_93, %c0_94] : memref<2x1x128xf32, #tpu.memory_space<vmem>>, vector<1x1x128xf32>
    %206 = vector.shape_cast %205 : vector<1x1x128xf32> to vector<1x128xf32>
    %207 = vector.broadcast %206 : vector<1x128xf32> to vector<16x128xf32>
    %208 = arith.addf %204, %207 : vector<16x128xf32>
    %209 = vector.extract_strided_slice %199 {offsets = [0, 0], sizes = [16, 32], strides = [1, 1]} : vector<16x128xf32> to vector<16x32xf32>
    %210 = vector.shape_cast %209 : vector<16x32xf32> to vector<2x8x32xf32>
    %211 = vector.extract_strided_slice %200 {offsets = [0, 0], sizes = [16, 32], strides = [1, 1]} : vector<16x128xf32> to vector<16x32xf32>
    %212 = vector.shape_cast %211 : vector<16x32xf32> to vector<2x8x32xf32>
    %213 = vector.extract_strided_slice %201 {offsets = [0, 0], sizes = [16, 32], strides = [1, 1]} : vector<16x128xf32> to vector<16x32xf32>
    %214 = vector.shape_cast %213 : vector<16x32xf32> to vector<2x8x32xf32>
    "tpu.trace_start"() <{level = 10 : i32, message = "bqd,bkd->bqk"}> : () -> ()
    %cst_95 = arith.constant dense<0.000000e+00> : vector<2x8x8xf32>
    %215 = tpu.matmul %210, %212, %cst_95 {dimension_numbers = #tpu.dot_dimension_numbers<[2], [2], [1], [1], [0, 0, 0, 1, 1, 1], [0], [0]>} : vector<2x8x32xf32>, vector<2x8x32xf32>, vector<2x8x8xf32> -> vector<2x8x8xf32>
    "tpu.trace_stop"() : () -> ()
    %cst_96 = arith.constant 0.176776692 : f32
    %216 = vector.broadcast %cst_96 : f32 to vector<2x8x8xf32>
    %217 = arith.mulf %215, %216 : vector<2x8x8xf32>
    %cst_97 = arith.constant dense<0xFF800000> : vector<2x8xf32>
    %218 = vector.multi_reduction <maximumf>, %217, %cst_97 [2] : vector<2x8x8xf32> to vector<2x8xf32>
    %219 = vector.shape_cast %218 : vector<2x8xf32> to vector<2x8x1xf32>
    %220 = vector.broadcast %219 : vector<2x8x1xf32> to vector<2x8x8xf32>
    %221 = arith.subf %217, %220 : vector<2x8x8xf32>
    %222 = math.exp %221 : vector<2x8x8xf32>
    %cst_98 = arith.constant dense<0.000000e+00> : vector<2x8xf32>
    %223 = vector.multi_reduction <add>, %222, %cst_98 [2] : vector<2x8x8xf32> to vector<2x8xf32>
    %224 = vector.shape_cast %223 : vector<2x8xf32> to vector<2x8x1xf32>
    %225 = vector.broadcast %224 : vector<2x8x1xf32> to vector<2x8x8xf32>
    %226 = arith.divf %222, %225 : vector<2x8x8xf32>
    "tpu.trace_start"() <{level = 10 : i32, message = "bqk,bkd->bqd"}> : () -> ()
    %cst_99 = arith.constant dense<0.000000e+00> : vector<2x8x32xf32>
    %227 = tpu.matmul %226, %214, %cst_99 {dimension_numbers = #tpu.dot_dimension_numbers<[2], [1], [1], [2], [0, 0, 0, 1, 1, 2], [0], [0]>} : vector<2x8x8xf32>, vector<2x8x32xf32>, vector<2x8x32xf32> -> vector<2x8x32xf32>
    "tpu.trace_stop"() : () -> ()
    %228 = vector.shape_cast %227 : vector<2x8x32xf32> to vector<16x32xf32>
    %229 = arith.truncf %228 : vector<16x32xf32> to vector<16x32xbf16>
    %230 = vector.extract_strided_slice %203 {offsets = [0, 0], sizes = [32, 128], strides = [1, 1]} : vector<128x128xbf16> to vector<32x128xbf16>
    %cst_100 = arith.constant dense<0.000000e+00> : vector<16x128xf32>
    %231 = tpu.matmul %229, %230, %cst_100 {dimension_numbers = #tpu.dot_dimension_numbers<[1], [0], [0], [1], [0, 0, 1, 1], [], []>} : vector<16x32xbf16>, vector<32x128xbf16>, vector<16x128xf32> -> vector<16x128xf32>
    %232 = arith.addf %208, %231 : vector<16x128xf32>
    %233 = vector.extract_strided_slice %199 {offsets = [0, 32], sizes = [16, 32], strides = [1, 1]} : vector<16x128xf32> to vector<16x32xf32>
    %234 = vector.shape_cast %233 : vector<16x32xf32> to vector<2x8x32xf32>
    %235 = vector.extract_strided_slice %200 {offsets = [0, 32], sizes = [16, 32], strides = [1, 1]} : vector<16x128xf32> to vector<16x32xf32>
    %236 = vector.shape_cast %235 : vector<16x32xf32> to vector<2x8x32xf32>
    %237 = vector.extract_strided_slice %201 {offsets = [0, 32], sizes = [16, 32], strides = [1, 1]} : vector<16x128xf32> to vector<16x32xf32>
    %238 = vector.shape_cast %237 : vector<16x32xf32> to vector<2x8x32xf32>
    "tpu.trace_start"() <{level = 10 : i32, message = "bqd,bkd->bqk"}> : () -> ()
    %cst_101 = arith.constant dense<0.000000e+00> : vector<2x8x8xf32>
    %239 = tpu.matmul %234, %236, %cst_101 {dimension_numbers = #tpu.dot_dimension_numbers<[2], [2], [1], [1], [0, 0, 0, 1, 1, 1], [0], [0]>} : vector<2x8x32xf32>, vector<2x8x32xf32>, vector<2x8x8xf32> -> vector<2x8x8xf32>
    "tpu.trace_stop"() : () -> ()
    %cst_102 = arith.constant 0.176776692 : f32
    %240 = vector.broadcast %cst_102 : f32 to vector<2x8x8xf32>
    %241 = arith.mulf %239, %240 : vector<2x8x8xf32>
    %cst_103 = arith.constant dense<0xFF800000> : vector<2x8xf32>
    %242 = vector.multi_reduction <maximumf>, %241, %cst_103 [2] : vector<2x8x8xf32> to vector<2x8xf32>
    %243 = vector.shape_cast %242 : vector<2x8xf32> to vector<2x8x1xf32>
    %244 = vector.broadcast %243 : vector<2x8x1xf32> to vector<2x8x8xf32>
    %245 = arith.subf %241, %244 : vector<2x8x8xf32>
    %246 = math.exp %245 : vector<2x8x8xf32>
    %cst_104 = arith.constant dense<0.000000e+00> : vector<2x8xf32>
    %247 = vector.multi_reduction <add>, %246, %cst_104 [2] : vector<2x8x8xf32> to vector<2x8xf32>
    %248 = vector.shape_cast %247 : vector<2x8xf32> to vector<2x8x1xf32>
    %249 = vector.broadcast %248 : vector<2x8x1xf32> to vector<2x8x8xf32>
    %250 = arith.divf %246, %249 : vector<2x8x8xf32>
    "tpu.trace_start"() <{level = 10 : i32, message = "bqk,bkd->bqd"}> : () -> ()
    %cst_105 = arith.constant dense<0.000000e+00> : vector<2x8x32xf32>
    %251 = tpu.matmul %250, %238, %cst_105 {dimension_numbers = #tpu.dot_dimension_numbers<[2], [1], [1], [2], [0, 0, 0, 1, 1, 2], [0], [0]>} : vector<2x8x8xf32>, vector<2x8x32xf32>, vector<2x8x32xf32> -> vector<2x8x32xf32>
    "tpu.trace_stop"() : () -> ()
    %252 = vector.shape_cast %251 : vector<2x8x32xf32> to vector<16x32xf32>
    %253 = arith.truncf %252 : vector<16x32xf32> to vector<16x32xbf16>
    %254 = vector.extract_strided_slice %203 {offsets = [32, 0], sizes = [32, 128], strides = [1, 1]} : vector<128x128xbf16> to vector<32x128xbf16>
    %cst_106 = arith.constant dense<0.000000e+00> : vector<16x128xf32>
    %255 = tpu.matmul %253, %254, %cst_106 {dimension_numbers = #tpu.dot_dimension_numbers<[1], [0], [0], [1], [0, 0, 1, 1], [], []>} : vector<16x32xbf16>, vector<32x128xbf16>, vector<16x128xf32> -> vector<16x128xf32>
    %256 = arith.addf %232, %255 : vector<16x128xf32>
    %257 = vector.extract_strided_slice %199 {offsets = [0, 64], sizes = [16, 32], strides = [1, 1]} : vector<16x128xf32> to vector<16x32xf32>
    %258 = vector.shape_cast %257 : vector<16x32xf32> to vector<2x8x32xf32>
    %259 = vector.extract_strided_slice %200 {offsets = [0, 64], sizes = [16, 32], strides = [1, 1]} : vector<16x128xf32> to vector<16x32xf32>
    %260 = vector.shape_cast %259 : vector<16x32xf32> to vector<2x8x32xf32>
    %261 = vector.extract_strided_slice %201 {offsets = [0, 64], sizes = [16, 32], strides = [1, 1]} : vector<16x128xf32> to vector<16x32xf32>
    %262 = vector.shape_cast %261 : vector<16x32xf32> to vector<2x8x32xf32>
    "tpu.trace_start"() <{level = 10 : i32, message = "bqd,bkd->bqk"}> : () -> ()
    %cst_107 = arith.constant dense<0.000000e+00> : vector<2x8x8xf32>
    %263 = tpu.matmul %258, %260, %cst_107 {dimension_numbers = #tpu.dot_dimension_numbers<[2], [2], [1], [1], [0, 0, 0, 1, 1, 1], [0], [0]>} : vector<2x8x32xf32>, vector<2x8x32xf32>, vector<2x8x8xf32> -> vector<2x8x8xf32>
    "tpu.trace_stop"() : () -> ()
    %cst_108 = arith.constant 0.176776692 : f32
    %264 = vector.broadcast %cst_108 : f32 to vector<2x8x8xf32>
    %265 = arith.mulf %263, %264 : vector<2x8x8xf32>
    %cst_109 = arith.constant dense<0xFF800000> : vector<2x8xf32>
    %266 = vector.multi_reduction <maximumf>, %265, %cst_109 [2] : vector<2x8x8xf32> to vector<2x8xf32>
    %267 = vector.shape_cast %266 : vector<2x8xf32> to vector<2x8x1xf32>
    %268 = vector.broadcast %267 : vector<2x8x1xf32> to vector<2x8x8xf32>
    %269 = arith.subf %265, %268 : vector<2x8x8xf32>
    %270 = math.exp %269 : vector<2x8x8xf32>
    %cst_110 = arith.constant dense<0.000000e+00> : vector<2x8xf32>
    %271 = vector.multi_reduction <add>, %270, %cst_110 [2] : vector<2x8x8xf32> to vector<2x8xf32>
    %272 = vector.shape_cast %271 : vector<2x8xf32> to vector<2x8x1xf32>
    %273 = vector.broadcast %272 : vector<2x8x1xf32> to vector<2x8x8xf32>
    %274 = arith.divf %270, %273 : vector<2x8x8xf32>
    "tpu.trace_start"() <{level = 10 : i32, message = "bqk,bkd->bqd"}> : () -> ()
    %cst_111 = arith.constant dense<0.000000e+00> : vector<2x8x32xf32>
    %275 = tpu.matmul %274, %262, %cst_111 {dimension_numbers = #tpu.dot_dimension_numbers<[2], [1], [1], [2], [0, 0, 0, 1, 1, 2], [0], [0]>} : vector<2x8x8xf32>, vector<2x8x32xf32>, vector<2x8x32xf32> -> vector<2x8x32xf32>
    "tpu.trace_stop"() : () -> ()
    %276 = vector.shape_cast %275 : vector<2x8x32xf32> to vector<16x32xf32>
    %277 = arith.truncf %276 : vector<16x32xf32> to vector<16x32xbf16>
    %278 = vector.extract_strided_slice %203 {offsets = [64, 0], sizes = [32, 128], strides = [1, 1]} : vector<128x128xbf16> to vector<32x128xbf16>
    %cst_112 = arith.constant dense<0.000000e+00> : vector<16x128xf32>
    %279 = tpu.matmul %277, %278, %cst_112 {dimension_numbers = #tpu.dot_dimension_numbers<[1], [0], [0], [1], [0, 0, 1, 1], [], []>} : vector<16x32xbf16>, vector<32x128xbf16>, vector<16x128xf32> -> vector<16x128xf32>
    %280 = arith.addf %256, %279 : vector<16x128xf32>
    %281 = vector.extract_strided_slice %199 {offsets = [0, 96], sizes = [16, 32], strides = [1, 1]} : vector<16x128xf32> to vector<16x32xf32>
    %282 = vector.shape_cast %281 : vector<16x32xf32> to vector<2x8x32xf32>
    %283 = vector.extract_strided_slice %200 {offsets = [0, 96], sizes = [16, 32], strides = [1, 1]} : vector<16x128xf32> to vector<16x32xf32>
    %284 = vector.shape_cast %283 : vector<16x32xf32> to vector<2x8x32xf32>
    %285 = vector.extract_strided_slice %201 {offsets = [0, 96], sizes = [16, 32], strides = [1, 1]} : vector<16x128xf32> to vector<16x32xf32>
    %286 = vector.shape_cast %285 : vector<16x32xf32> to vector<2x8x32xf32>
    "tpu.trace_start"() <{level = 10 : i32, message = "bqd,bkd->bqk"}> : () -> ()
    %cst_113 = arith.constant dense<0.000000e+00> : vector<2x8x8xf32>
    %287 = tpu.matmul %282, %284, %cst_113 {dimension_numbers = #tpu.dot_dimension_numbers<[2], [2], [1], [1], [0, 0, 0, 1, 1, 1], [0], [0]>} : vector<2x8x32xf32>, vector<2x8x32xf32>, vector<2x8x8xf32> -> vector<2x8x8xf32>
    "tpu.trace_stop"() : () -> ()
    %cst_114 = arith.constant 0.176776692 : f32
    %288 = vector.broadcast %cst_114 : f32 to vector<2x8x8xf32>
    %289 = arith.mulf %287, %288 : vector<2x8x8xf32>
    %cst_115 = arith.constant dense<0xFF800000> : vector<2x8xf32>
    %290 = vector.multi_reduction <maximumf>, %289, %cst_115 [2] : vector<2x8x8xf32> to vector<2x8xf32>
    %291 = vector.shape_cast %290 : vector<2x8xf32> to vector<2x8x1xf32>
    %292 = vector.broadcast %291 : vector<2x8x1xf32> to vector<2x8x8xf32>
    %293 = arith.subf %289, %292 : vector<2x8x8xf32>
    %294 = math.exp %293 : vector<2x8x8xf32>
    %cst_116 = arith.constant dense<0.000000e+00> : vector<2x8xf32>
    %295 = vector.multi_reduction <add>, %294, %cst_116 [2] : vector<2x8x8xf32> to vector<2x8xf32>
    %296 = vector.shape_cast %295 : vector<2x8xf32> to vector<2x8x1xf32>
    %297 = vector.broadcast %296 : vector<2x8x1xf32> to vector<2x8x8xf32>
    %298 = arith.divf %294, %297 : vector<2x8x8xf32>
    "tpu.trace_start"() <{level = 10 : i32, message = "bqk,bkd->bqd"}> : () -> ()
    %cst_117 = arith.constant dense<0.000000e+00> : vector<2x8x32xf32>
    %299 = tpu.matmul %298, %286, %cst_117 {dimension_numbers = #tpu.dot_dimension_numbers<[2], [1], [1], [2], [0, 0, 0, 1, 1, 2], [0], [0]>} : vector<2x8x8xf32>, vector<2x8x32xf32>, vector<2x8x32xf32> -> vector<2x8x32xf32>
    "tpu.trace_stop"() : () -> ()
    %300 = vector.shape_cast %299 : vector<2x8x32xf32> to vector<16x32xf32>
    %301 = arith.truncf %300 : vector<16x32xf32> to vector<16x32xbf16>
    %302 = vector.extract_strided_slice %203 {offsets = [96, 0], sizes = [32, 128], strides = [1, 1]} : vector<128x128xbf16> to vector<32x128xbf16>
    %cst_118 = arith.constant dense<0.000000e+00> : vector<16x128xf32>
    %303 = tpu.matmul %301, %302, %cst_118 {dimension_numbers = #tpu.dot_dimension_numbers<[1], [0], [0], [1], [0, 0, 1, 1], [], []>} : vector<16x32xbf16>, vector<32x128xbf16>, vector<16x128xf32> -> vector<16x128xf32>
    %304 = arith.addf %280, %303 : vector<16x128xf32>
    %305 = arith.addf %190, %304 : vector<16x128xf32>
    %c1_119 = arith.constant 1 : index
    %c0_120 = arith.constant 0 : index
    %c0_121 = arith.constant 0 : index
    %306 = vector.load %arg9[%c1_119, %c0_120, %c0_121] : memref<2x1x128xf32, #tpu.memory_space<vmem>>, vector<1x1x128xf32>
    %307 = vector.shape_cast %306 : vector<1x1x128xf32> to vector<1x128xf32>
    %c1_122 = arith.constant 1 : index
    %c0_123 = arith.constant 0 : index
    %c0_124 = arith.constant 0 : index
    %308 = vector.load %arg10[%c1_122, %c0_123, %c0_124] : memref<2x1x128xf32, #tpu.memory_space<vmem>>, vector<1x1x128xf32>
    %309 = vector.shape_cast %308 : vector<1x1x128xf32> to vector<1x128xf32>
    %cst_125 = arith.constant dense<0.000000e+00> : vector<16xf32>
    %310 = vector.multi_reduction <add>, %305, %cst_125 [1] : vector<16x128xf32> to vector<16xf32>
    %311 = vector.shape_cast %310 : vector<16xf32> to vector<16x1xf32>
    %cst_126 = arith.constant 1.280000e+02 : f32
    %312 = vector.broadcast %cst_126 : f32 to vector<16x1xf32>
    %313 = arith.divf %311, %312 : vector<16x1xf32>
    %314 = vector.broadcast %313 : vector<16x1xf32> to vector<16x128xf32>
    %315 = arith.subf %305, %314 : vector<16x128xf32>
    %316 = arith.mulf %315, %315 : vector<16x128xf32>
    %cst_127 = arith.constant dense<0.000000e+00> : vector<16xf32>
    %317 = vector.multi_reduction <add>, %316, %cst_127 [1] : vector<16x128xf32> to vector<16xf32>
    %318 = vector.shape_cast %317 : vector<16xf32> to vector<16x1xf32>
    %cst_128 = arith.constant 1.280000e+02 : f32
    %319 = vector.broadcast %cst_128 : f32 to vector<16x1xf32>
    %320 = arith.divf %318, %319 : vector<16x1xf32>
    %cst_129 = arith.constant 9.99999974E-6 : f32
    %321 = vector.broadcast %cst_129 : f32 to vector<16x1xf32>
    %322 = arith.addf %320, %321 : vector<16x1xf32>
    %323 = math.rsqrt %322 : vector<16x1xf32>
    %324 = vector.broadcast %323 : vector<16x1xf32> to vector<16x128xf32>
    %325 = arith.mulf %315, %324 : vector<16x128xf32>
    %326 = vector.broadcast %307 : vector<1x128xf32> to vector<16x128xf32>
    %327 = arith.mulf %325, %326 : vector<16x128xf32>
    %328 = vector.broadcast %309 : vector<1x128xf32> to vector<16x128xf32>
    %329 = arith.addf %327, %328 : vector<16x128xf32>
    %330 = arith.truncf %329 : vector<16x128xf32> to vector<16x128xbf16>
    %c1_130 = arith.constant 1 : index
    %c0_131 = arith.constant 0 : index
    %c0_132 = arith.constant 0 : index
    %331 = vector.load %arg11[%c1_130, %c0_131, %c0_132] : memref<2x128x2048xbf16, #tpu.memory_space<vmem>>, vector<1x128x2048xbf16>
    %332 = vector.shape_cast %331 : vector<1x128x2048xbf16> to vector<128x2048xbf16>
    %cst_133 = arith.constant dense<0.000000e+00> : vector<16x2048xf32>
    %333 = tpu.matmul %330, %332, %cst_133 {dimension_numbers = #tpu.dot_dimension_numbers<[1], [0], [0], [1], [0, 0, 1, 1], [], []>} : vector<16x128xbf16>, vector<128x2048xbf16>, vector<16x2048xf32> -> vector<16x2048xf32>
    %c1_134 = arith.constant 1 : index
    %c0_135 = arith.constant 0 : index
    %c0_136 = arith.constant 0 : index
    %334 = vector.load %arg12[%c1_134, %c0_135, %c0_136] : memref<2x1x2048xf32, #tpu.memory_space<vmem>>, vector<1x1x2048xf32>
    %335 = vector.shape_cast %334 : vector<1x1x2048xf32> to vector<1x2048xf32>
    %336 = vector.broadcast %335 : vector<1x2048xf32> to vector<16x2048xf32>
    %337 = arith.addf %333, %336 : vector<16x2048xf32>
    %cst_137 = arith.constant 0.000000e+00 : f32
    %338 = vector.broadcast %cst_137 : f32 to vector<16x2048xf32>
    %339 = arith.maximumf %337, %338 : vector<16x2048xf32>
    %340 = arith.truncf %339 : vector<16x2048xf32> to vector<16x2048xbf16>
    %c1_138 = arith.constant 1 : index
    %c0_139 = arith.constant 0 : index
    %c0_140 = arith.constant 0 : index
    %341 = vector.load %arg13[%c1_138, %c0_139, %c0_140] : memref<2x2048x128xbf16, #tpu.memory_space<vmem>>, vector<1x2048x128xbf16>
    %342 = vector.shape_cast %341 : vector<1x2048x128xbf16> to vector<2048x128xbf16>
    %cst_141 = arith.constant dense<0.000000e+00> : vector<16x128xf32>
    %343 = tpu.matmul %340, %342, %cst_141 {dimension_numbers = #tpu.dot_dimension_numbers<[1], [0], [0], [1], [0, 0, 1, 1], [], []>} : vector<16x2048xbf16>, vector<2048x128xbf16>, vector<16x128xf32> -> vector<16x128xf32>
    %c1_142 = arith.constant 1 : index
    %c0_143 = arith.constant 0 : index
    %c0_144 = arith.constant 0 : index
    %344 = vector.load %arg14[%c1_142, %c0_143, %c0_144] : memref<2x1x128xf32, #tpu.memory_space<vmem>>, vector<1x1x128xf32>
    %345 = vector.shape_cast %344 : vector<1x1x128xf32> to vector<1x128xf32>
    %346 = vector.broadcast %345 : vector<1x128xf32> to vector<16x128xf32>
    %347 = arith.addf %343, %346 : vector<16x128xf32>
    %348 = arith.addf %329, %347 : vector<16x128xf32>
    %c1_145 = arith.constant 1 : index
    %c0_146 = arith.constant 0 : index
    %c0_147 = arith.constant 0 : index
    %349 = vector.load %arg15[%c1_145, %c0_146, %c0_147] : memref<2x1x128xf32, #tpu.memory_space<vmem>>, vector<1x1x128xf32>
    %350 = vector.shape_cast %349 : vector<1x1x128xf32> to vector<1x128xf32>
    %c1_148 = arith.constant 1 : index
    %c0_149 = arith.constant 0 : index
    %c0_150 = arith.constant 0 : index
    %351 = vector.load %arg16[%c1_148, %c0_149, %c0_150] : memref<2x1x128xf32, #tpu.memory_space<vmem>>, vector<1x1x128xf32>
    %352 = vector.shape_cast %351 : vector<1x1x128xf32> to vector<1x128xf32>
    %cst_151 = arith.constant dense<0.000000e+00> : vector<16xf32>
    %353 = vector.multi_reduction <add>, %348, %cst_151 [1] : vector<16x128xf32> to vector<16xf32>
    %354 = vector.shape_cast %353 : vector<16xf32> to vector<16x1xf32>
    %cst_152 = arith.constant 1.280000e+02 : f32
    %355 = vector.broadcast %cst_152 : f32 to vector<16x1xf32>
    %356 = arith.divf %354, %355 : vector<16x1xf32>
    %357 = vector.broadcast %356 : vector<16x1xf32> to vector<16x128xf32>
    %358 = arith.subf %348, %357 : vector<16x128xf32>
    %359 = arith.mulf %358, %358 : vector<16x128xf32>
    %cst_153 = arith.constant dense<0.000000e+00> : vector<16xf32>
    %360 = vector.multi_reduction <add>, %359, %cst_153 [1] : vector<16x128xf32> to vector<16xf32>
    %361 = vector.shape_cast %360 : vector<16xf32> to vector<16x1xf32>
    %cst_154 = arith.constant 1.280000e+02 : f32
    %362 = vector.broadcast %cst_154 : f32 to vector<16x1xf32>
    %363 = arith.divf %361, %362 : vector<16x1xf32>
    %cst_155 = arith.constant 9.99999974E-6 : f32
    %364 = vector.broadcast %cst_155 : f32 to vector<16x1xf32>
    %365 = arith.addf %363, %364 : vector<16x1xf32>
    %366 = math.rsqrt %365 : vector<16x1xf32>
    %367 = vector.broadcast %366 : vector<16x1xf32> to vector<16x128xf32>
    %368 = arith.mulf %358, %367 : vector<16x128xf32>
    %369 = vector.broadcast %350 : vector<1x128xf32> to vector<16x128xf32>
    %370 = arith.mulf %368, %369 : vector<16x128xf32>
    %371 = vector.broadcast %352 : vector<1x128xf32> to vector<16x128xf32>
    %372 = arith.addf %370, %371 : vector<16x128xf32>
    %373 = vector.shape_cast %372 : vector<16x128xf32> to vector<2x8x128xf32>
    %cst_156 = arith.constant dense<0.000000e+00> : vector<2x128xf32>
    %374 = vector.multi_reduction <add>, %373, %cst_156 [1] : vector<2x8x128xf32> to vector<2x128xf32>
    %cst_157 = arith.constant 8.000000e+00 : f32
    %375 = vector.broadcast %cst_157 : f32 to vector<2x128xf32>
    %376 = arith.divf %374, %375 : vector<2x128xf32>
    %377 = arith.truncf %376 : vector<2x128xf32> to vector<2x128xbf16>
    %c0_158 = arith.constant 0 : index
    %c0_159 = arith.constant 0 : index
    %378 = vector.load %arg17[%c0_158, %c0_159] : memref<128x64xbf16, #tpu.memory_space<vmem>>, vector<128x64xbf16>
    %cst_160 = arith.constant dense<0.000000e+00> : vector<2x64xf32>
    %379 = tpu.matmul %377, %378, %cst_160 {dimension_numbers = #tpu.dot_dimension_numbers<[1], [0], [0], [1], [0, 0, 1, 1], [], []>} : vector<2x128xbf16>, vector<128x64xbf16>, vector<2x64xf32> -> vector<2x64xf32>
    %c0_161 = arith.constant 0 : index
    %c0_162 = arith.constant 0 : index
    %380 = vector.load %arg18[%c0_161, %c0_162] : memref<1x64xf32, #tpu.memory_space<vmem>>, vector<1x64xf32>
    %381 = vector.broadcast %380 : vector<1x64xf32> to vector<2x64xf32>
    %382 = arith.addf %379, %381 : vector<2x64xf32>
    %c0_163 = arith.constant 0 : index
    %c0_164 = arith.constant 0 : index
    %383 = vector.load %arg19[%c0_163, %c0_164] : memref<2x64xf32, #tpu.memory_space<vmem>>, vector<2x64xf32>
    tpu.vector_store %arg19[%c0_163, %c0_164], %382 {strides = array<i32>} : memref<2x64xf32, #tpu.memory_space<vmem>>, vector<2x64xf32>,
    return
  }
  func.func @transform_0(%arg0: i32) -> (i32, i32) {
    %c0_i32 = arith.constant 0 : i32
    %c0_i32_0 = arith.constant 0 : i32
    %c0_i32_1 = arith.constant 0 : i32
    return %c0_i32, %c0_i32_0 : i32, i32
  }
  func.func @transform_1(%arg0: i32) -> (i32, i32) {
    %c0_i32 = arith.constant 0 : i32
    %c0_i32_0 = arith.constant 0 : i32
    %c0_i32_1 = arith.constant 0 : i32
    return %c0_i32, %c0_i32_0 : i32, i32
  }
  func.func @transform_2(%arg0: i32) -> (i32, i32) {
    %c0_i32 = arith.constant 0 : i32
    %c0_i32_0 = arith.constant 0 : i32
    %c0_i32_1 = arith.constant 0 : i32
    return %c0_i32, %c0_i32_0 : i32, i32
  }
  func.func @transform_3(%arg0: i32) -> (i32, i32) {
    %c0_i32 = arith.constant 0 : i32
    %c0_i32_0 = arith.constant 0 : i32
    %c0_i32_1 = arith.constant 0 : i32
    return %c0_i32, %c0_i32_0 : i32, i32
  }
  func.func @transform_4(%arg0: i32) -> (i32, i32, i32) {
    %c0_i32 = arith.constant 0 : i32
    %c0_i32_0 = arith.constant 0 : i32
    %c0_i32_1 = arith.constant 0 : i32
    %c0_i32_2 = arith.constant 0 : i32
    return %c0_i32, %c0_i32_0, %c0_i32_1 : i32, i32, i32
  }
  func.func @transform_5(%arg0: i32) -> (i32, i32, i32) {
    %c0_i32 = arith.constant 0 : i32
    %c0_i32_0 = arith.constant 0 : i32
    %c0_i32_1 = arith.constant 0 : i32
    %c0_i32_2 = arith.constant 0 : i32
    return %c0_i32, %c0_i32_0, %c0_i32_1 : i32, i32, i32
  }
  func.func @transform_6(%arg0: i32) -> (i32, i32, i32) {
    %c0_i32 = arith.constant 0 : i32
    %c0_i32_0 = arith.constant 0 : i32
    %c0_i32_1 = arith.constant 0 : i32
    %c0_i32_2 = arith.constant 0 : i32
    return %c0_i32, %c0_i32_0, %c0_i32_1 : i32, i32, i32
  }
  func.func @transform_7(%arg0: i32) -> (i32, i32, i32) {
    %c0_i32 = arith.constant 0 : i32
    %c0_i32_0 = arith.constant 0 : i32
    %c0_i32_1 = arith.constant 0 : i32
    %c0_i32_2 = arith.constant 0 : i32
    return %c0_i32, %c0_i32_0, %c0_i32_1 : i32, i32, i32
  }
  func.func @transform_8(%arg0: i32) -> (i32, i32, i32) {
    %c0_i32 = arith.constant 0 : i32
    %c0_i32_0 = arith.constant 0 : i32
    %c0_i32_1 = arith.constant 0 : i32
    %c0_i32_2 = arith.constant 0 : i32
    return %c0_i32, %c0_i32_0, %c0_i32_1 : i32, i32, i32
  }
  func.func @transform_9(%arg0: i32) -> (i32, i32, i32) {
    %c0_i32 = arith.constant 0 : i32
    %c0_i32_0 = arith.constant 0 : i32
    %c0_i32_1 = arith.constant 0 : i32
    %c0_i32_2 = arith.constant 0 : i32
    return %c0_i32, %c0_i32_0, %c0_i32_1 : i32, i32, i32
  }
  func.func @transform_10(%arg0: i32) -> (i32, i32, i32) {
    %c0_i32 = arith.constant 0 : i32
    %c0_i32_0 = arith.constant 0 : i32
    %c0_i32_1 = arith.constant 0 : i32
    %c0_i32_2 = arith.constant 0 : i32
    return %c0_i32, %c0_i32_0, %c0_i32_1 : i32, i32, i32
  }
  func.func @transform_11(%arg0: i32) -> (i32, i32, i32) {
    %c0_i32 = arith.constant 0 : i32
    %c0_i32_0 = arith.constant 0 : i32
    %c0_i32_1 = arith.constant 0 : i32
    %c0_i32_2 = arith.constant 0 : i32
    return %c0_i32, %c0_i32_0, %c0_i32_1 : i32, i32, i32
  }
  func.func @transform_12(%arg0: i32) -> (i32, i32, i32) {
    %c0_i32 = arith.constant 0 : i32
    %c0_i32_0 = arith.constant 0 : i32
    %c0_i32_1 = arith.constant 0 : i32
    %c0_i32_2 = arith.constant 0 : i32
    return %c0_i32, %c0_i32_0, %c0_i32_1 : i32, i32, i32
  }
  func.func @transform_13(%arg0: i32) -> (i32, i32, i32) {
    %c0_i32 = arith.constant 0 : i32
    %c0_i32_0 = arith.constant 0 : i32
    %c0_i32_1 = arith.constant 0 : i32
    %c0_i32_2 = arith.constant 0 : i32
    return %c0_i32, %c0_i32_0, %c0_i32_1 : i32, i32, i32
  }
  func.func @transform_14(%arg0: i32) -> (i32, i32, i32) {
    %c0_i32 = arith.constant 0 : i32
    %c0_i32_0 = arith.constant 0 : i32
    %c0_i32_1 = arith.constant 0 : i32
    %c0_i32_2 = arith.constant 0 : i32
    return %c0_i32, %c0_i32_0, %c0_i32_1 : i32, i32, i32
  }
  func.func @transform_15(%arg0: i32) -> (i32, i32, i32) {
    %c0_i32 = arith.constant 0 : i32
    %c0_i32_0 = arith.constant 0 : i32
    %c0_i32_1 = arith.constant 0 : i32
    %c0_i32_2 = arith.constant 0 : i32
    return %c0_i32, %c0_i32_0, %c0_i32_1 : i32, i32, i32
  }
  func.func @transform_16(%arg0: i32) -> (i32, i32) {
    %c0_i32 = arith.constant 0 : i32
    %c0_i32_0 = arith.constant 0 : i32
    %c0_i32_1 = arith.constant 0 : i32
    return %c0_i32, %c0_i32_0 : i32, i32
  }
  func.func @transform_17(%arg0: i32) -> (i32, i32) {
    %c0_i32 = arith.constant 0 : i32
    %c0_i32_0 = arith.constant 0 : i32
    %c0_i32_1 = arith.constant 0 : i32
    return %c0_i32, %c0_i32_0 : i32, i32
  }
  func.func @transform_18(%arg0: i32) -> (i32, i32) {
    %c0_i32 = arith.constant 0 : i32
    %c0_i32_0 = arith.constant 0 : i32
    %c0_i32_1 = arith.constant 0 : i32
    return %c0_i32, %c0_i32_0 : i32, i32
  }
}

</mosaic_0001>

<bundles_post_ra>
// kernel: variable_length_vector_to_image.1
= control target key start
LH: loop header
LB: loop body
LE: loop exit
PB: predicated region body
PF: predicated region fallthrough
CT: control target
= control target key end

     0   :  { %s12485_s0 = inlined_call_operand.hbm [shape: f32[16,32], index: 0, kind: input, shape index: {}]   ;;  %s12486_s1 = inlined_call_operand.vmem [shape: f32[16,128], index: 1, kind: input, shape index: {}]   ;;  %s12487_s2 = inlined_call_operand.hbm [shape: bf16[32,128], index: 2, kind: input, shape index: {}]   ;;  %s12488_s3 = inlined_call_operand.vmem [shape: f32[1,128], index: 3, kind: input, shape index: {}]   ;;  %s12489_s4 = inlined_call_operand.hbm [shape: bf16[2,128,384], index: 4, kind: input, shape index: {}]   ;;  %s12490_s5 = inlined_call_operand.hbm [shape: f32[2,1,384], index: 5, kind: input, shape index: {}]   ;;  %s12491_s6 = inlined_call_operand.vmem [shape: bf16[2,128,128], index: 6, kind: input, shape index: {}]   ;;  %s12492_s7 = inlined_call_operand.vmem [shape: f32[2,1,128], index: 7, kind: input, shape index: {}]   ;;  %s12493_s8 = inlined_call_operand.vmem [shape: f32[2,1,128], index: 8, kind: input, shape index: {}]   ;;  %s12494_s9 = inlined_call_operand.hbm [shape: f32[2,1,128], index: 9, kind: input, shape index: {}]   ;;  %s12495_s10 = inlined_call_operand.hbm [shape: bf16[2,128,2048], index: 10, kind: input, shape index: {}]   ;;  %s12496_s11 = inlined_call_operand.vmem [shape: f32[2,1,2048], index: 11, kind: input, shape index: {}]   ;;  %s12497_s12 = inlined_call_operand.hbm [shape: bf16[2,2048,128], index: 12, kind: input, shape index: {}]   ;;  %s12498_s13 = inlined_call_operand.hbm [shape: f32[2,1,128], index: 13, kind: input, shape index: {}]   ;;  %s12499_s14 = inlined_call_operand.hbm [shape: f32[2,1,128], index: 14, kind: input, shape index: {}]   ;;  %s12500_s15 = inlined_call_operand.hbm [shape: f32[2,1,128], index: 15, kind: input, shape index: {}]   ;;  %s12501_s16 = inlined_call_operand.vmem [shape: bf16[128,64], index: 16, kind: input, shape index: {}]   ;;  %s12502_s17 = inlined_call_operand.hbm [shape: f32[1,64], index: 17, kind: input, shape index: {}]   ;;  %s12503_s18 = inlined_call_operand.vmem [shape: f32[2,64], index: 18, kind: output, shape index: {}]  }
   0x1   :  { %12505 = sst [smem:[#allocation25_spill]] %s12485_s0 }
   0x2   :  { %12506 = sst [smem:[#allocation26_spill]] %s12486_s1 }
   0x3   :  { %12507 = sst [smem:[#allocation27_spill]] %s12487_s2 }
   0x4   :  { %23 = vsyncpa [#allocation3], 0 }
   0x5   :  { %24 = vsyncpa [#allocation5], 0 }
   0x6   :  { %25 = vsyncpa [#allocation8], 0 }
   0x7   :  { %26 = vsyncpa [#allocation11], 0 }
   0x8   :  { %27 = vsyncpa [#allocation14], 0 }
   0x9   :  { %28 = vsyncpa [#allocation17], 0  ;;  %s11628_s27 = smov [#allocation4]  }
   0xa   :  { %s48_s28 = sshll.u32 %s11628_s27, 4  ;;  %s49_s28 = int_to_ptr.vmem [resolvable:$true] %s48_s28 }
   0xb   :  { %s11404_s29 = scalar_lea.vmem %s49_s28, 256  ;;  %p11409_p1 = scmp.lt.s32.totalorder %s49_s28, %s49_s28 }
   0xc   :  { %p11405_p0 = scmp.ne.s32.totalorder %s49_s28, %s11404_s29  ;;  %p11410_p2 = scmp.lt.s32.totalorder %s11404_s29, %s11404_s29 }
   0xe   :  { %p11411_p3 = por %p11410_p2, %p11409_p1 }
  0x10   :  { %p11412_p4 = pnand %p11411_p3, %p11405_p0 }
  0x12   :  { %11415 = shalt.err (!%p11412_p4)
}
  0x13   :  { %s11629_s30 = smov 64   ;;  %s11630_s0 = smov 4  }
  0x14   :  { %s12508_s20 = sld [smem:[#allocation27_spill]]  ;;  %s11631_s21 = smov [#allocation7]  }
  0x15   :  { %s74_s22 = sshll.u32 %s11631_s21, 4  ;;  %s75_s22 = int_to_ptr.vmem [resolvable:$true] %s74_s22 }
  0x16   :  { %s11424_s2 = scalar_lea.vmem %s75_s22, 96  ;;  %p11429_p6 = scmp.lt.s32.totalorder %s75_s22, %s75_s22 }
  0x17   :  { %p11425_p5 = scmp.ne.s32.totalorder %s75_s22, %s11424_s2  ;;  %p11430_p7 = scmp.lt.s32.totalorder %s11424_s2, %s11424_s2 }
  0x19   :  { %p11431_p8 = por %p11430_p7, %p11429_p6 }
  0x1a   :  { %54 = dma.hbm_to_vmem [thread:$0]  %s12508_s20, 256, %s49_s28, [#allocation5], %s11629_s30, %s11629_s30, %s11630_s0  }
  0x1b   :  { %p11432_p9 = pnand %p11431_p8, %p11425_p5 }
  0x1d   :  { %11435 = shalt.err (!%p11432_p9)
}
  0x1e   :  { %s11632_s23 = smov 48   ;;  %s11633_s24 = smov 3  }
  0x1f   :  { %80 = dma.hbm_to_vmem [thread:$0]  %s12490_s5, 96, %s75_s22, [#allocation8], %s11632_s23, %s11632_s23, %s11633_s24  }
  0x20   :  { %s11634_s27 = smov [#allocation10]  }
  0x21   :  { %s104_s29 = sshll.u32 %s11634_s27, 4  ;;  %s105_s29 = int_to_ptr.vmem [resolvable:$true] %s104_s29 }
  0x22   :  { %s11444_s28 = scalar_lea.vmem %s105_s29, 32768  ;;  %p11449_p11 = scmp.lt.s32.totalorder %s105_s29, %s105_s29 }
  0x23   :  { %p11445_p10 = scmp.ne.s32.totalorder %s105_s29, %s11444_s28  ;;  %p11450_p12 = scmp.lt.s32.totalorder %s11444_s28, %s11444_s28 }
  0x25   :  { %p11451_p13 = por %p11450_p12, %p11449_p11 }
  0x27   :  { %p11452_p0 = pnand %p11451_p13, %p11445_p10 }
  0x29   :  { %11455 = shalt.err (!%p11452_p0)
}
  0x2a   :  { %s11635_s19 = smov 1024   ;;  %s11636_s21 = smov [#allocation13]  }
  0x2b   :  { %110 = dma.hbm_to_vmem [thread:$0]  %s12495_s10, 32768, %s105_s29, [#allocation11], %s11635_s19, %s11635_s19, %s11629_s30  }
  0x2c   :  { %s130_s2 = sshll.u32 %s11636_s21, 4  ;;  %s11637_s25 = smov [#allocation16]   ;;  %s131_s2 = int_to_ptr.vmem [resolvable:$true] %s130_s2 }
  0x2d   :  { %s154_s5 = sshll.u32 %s11637_s25, 4  ;;  %s11464_s22 = scalar_lea.vmem %s131_s2, 32  ;;  %s155_s5 = int_to_ptr.vmem [resolvable:$true] %s154_s5 }
  0x2e   :  { %p11465_p1 = scmp.ne.s32.totalorder %s131_s2, %s11464_s22  ;;  %p11469_p2 = scmp.lt.s32.totalorder %s131_s2, %s131_s2 }
  0x2f   :  { %p11470_p3 = scmp.lt.s32.totalorder %s11464_s22, %s11464_s22 }
  0x31   :  { %p11471_p4 = por %p11470_p3, %p11469_p2 }
  0x33   :  { %p11472_p5 = pnand %p11471_p4, %p11465_p1 }
  0x35   :  { %11475 = shalt.err (!%p11472_p5)
}
  0x36   :  { %s11638_s23 = smov 16   ;;  %s11639_s24 = smov 1  }
  0x37   :  { %136 = dma.hbm_to_vmem [thread:$0]  %s12498_s13, 32, %s131_s2, [#allocation14], %s11638_s23, %s11638_s23, %s11639_s24  }
  0x38   :  { %s11484_s27 = scalar_lea.vmem %s155_s5, 32  ;;  %p11489_p7 = scmp.lt.s32.totalorder %s155_s5, %s155_s5 }
  0x39   :  { %p11485_p6 = scmp.ne.s32.totalorder %s155_s5, %s11484_s27  ;;  %p11490_p8 = scmp.lt.s32.totalorder %s11484_s27, %s11484_s27 }
  0x3b   :  { %p11491_p9 = por %p11490_p8, %p11489_p7 }
  0x3d   :  { %p11492_p10 = pnand %p11491_p9, %p11485_p6 }
  0x3f   :  { %11495 = shalt.err (!%p11492_p10)
}
  0x40   :  { %160 = dma.hbm_to_vmem [thread:$0]  %s12500_s15, 32, %s155_s5, [#allocation17], %s11638_s23, %s11638_s23, %s11639_s24  }
  0x41   :  { %s11640_s19 = smov [#allocation2]  }
  0x42   :  { %s34_s1 = sshll.u32 %s11640_s19, 4  ;;  %s35_s1 = int_to_ptr.vmem [resolvable:$true] %s34_s1 }
  0x43   :  { %s11504_s20 = scalar_lea.vmem %s35_s1, 256  ;;  %p11509_p12 = scmp.lt.s32.totalorder %s35_s1, %s35_s1 }
  0x44   :  { %p11505_p11 = scmp.ne.s32.totalorder %s35_s1, %s11504_s20  ;;  %p11510_p13 = scmp.lt.s32.totalorder %s11504_s20, %s11504_s20 }
  0x46   :  { %p11511_p0 = por %p11510_p13, %p11509_p12 }
  0x48   :  { %p11512_p1 = pnand %p11511_p0, %p11505_p11 }
  0x4a   :  { %11515 = shalt.err (!%p11512_p1)
}
  0x4b   :  { %s11641_s13 = smov 128   ;;  %s11642_s21 = smov 8  }
  0x4c   :  { %s12509_s22 = sld [smem:[#allocation25_spill]]  ;;  %s11643_s26 = smov [#allocation6]  }
  0x4d   :  { %s62_s10 = sshll.u32 %s11643_s26, 4  ;;  %s63_s10 = int_to_ptr.vmem [resolvable:$true] %s62_s10 }
  0x4e   :  { %s11524_s15 = scalar_lea.vmem %s63_s10, 6144  ;;  %p11529_p3 = scmp.lt.s32.totalorder %s63_s10, %s63_s10 }
  0x4f   :  { %p11525_p2 = scmp.ne.s32.totalorder %s63_s10, %s11524_s15  ;;  %p11530_p4 = scmp.lt.s32.totalorder %s11524_s15, %s11524_s15 }
  0x51   :  { %p11531_p5 = por %p11530_p4, %p11529_p3 }
  0x52   :  { %40 = dma.hbm_to_vmem [thread:$0]  %s12509_s22, 256, %s35_s1, [#allocation3], %s11641_s13, %s11641_s13, %s11642_s21  }
  0x53   :  { %p11532_p6 = pnand %p11531_p5, %p11525_p2 }
  0x55   :  { %11535 = shalt.err (!%p11532_p6)
}
  0x56   :  { %s11644_s5 = smov 192   ;;  %s11645_s27 = smov 12  }
  0x57   :  { %68 = dma.hbm_to_vmem [thread:$0]  %s12489_s4, 6144, %s63_s10, [#allocation5], %s11644_s5, %s11644_s5, %s11645_s27  }
  0x58   :  { %s11646_s19 = smov [#allocation9]   ;;  %s11647_s2 = smov [#allocation12]  }
  0x59   :  { %s92_s20 = sshll.u32 %s11646_s19, 4  ;;  %s118_s1 = sshll.u32 %s11647_s2, 4  ;;  %s93_s20 = int_to_ptr.vmem [resolvable:$true] %s92_s20  ;;  %s119_s1 = int_to_ptr.vmem [resolvable:$true] %s118_s1 }
  0x5a   :  { %s11544_s13 = scalar_lea.vmem %s93_s20, 32  ;;  %p11549_p8 = scmp.lt.s32.totalorder %s93_s20, %s93_s20 }
  0x5b   :  { %p11545_p7 = scmp.ne.s32.totalorder %s93_s20, %s11544_s13  ;;  %p11550_p9 = scmp.lt.s32.totalorder %s11544_s13, %s11544_s13 }
  0x5d   :  { %p11551_p10 = por %p11550_p9, %p11549_p8 }
  0x5f   :  { %p11552_p11 = pnand %p11551_p10, %p11545_p7 }
  0x61   :  { %11555 = shalt.err (!%p11552_p11)
}
  0x62   :  { %98 = dma.hbm_to_vmem [thread:$0]  %s12494_s9, 32, %s93_s20, [#allocation8], %s11638_s23, %s11638_s23, %s11639_s24  }
  0x63   :  { %s11564_s4 = scalar_lea.vmem %s119_s1, 32768  ;;  %p11569_p13 = scmp.lt.s32.totalorder %s119_s1, %s119_s1 }
  0x64   :  { %p11565_p12 = scmp.ne.s32.totalorder %s119_s1, %s11564_s4  ;;  %p11570_p0 = scmp.lt.s32.totalorder %s11564_s4, %s11564_s4 }
  0x66   :  { %p11571_p1 = por %p11570_p0, %p11569_p13 }
  0x68   :  { %p11572_p2 = pnand %p11571_p1, %p11565_p12 }
  0x6a   :  { %11575 = shalt.err (!%p11572_p2)
}
  0x6b   :  { %124 = dma.hbm_to_vmem [thread:$0]  %s12497_s12, 32768, %s119_s1, [#allocation11], %s11629_s30, %s11629_s30, %s11630_s0  }
  0x6c   :  { %s11648_s10 = smov [#allocation15]   ;;  %s11649_s5 = smov [#allocation18]  }
  0x6d   :  { %s142_s15 = sshll.u32 %s11648_s10, 4  ;;  %s169_s27 = sshll.u32 %s11649_s5, 4  ;;  %s143_s15 = int_to_ptr.vmem [resolvable:$true] %s142_s15  ;;  %s170_s27 = int_to_ptr.vmem [resolvable:$true] %s169_s27 }
  0x6e   :  { %s11584_s9 = scalar_lea.vmem %s143_s15, 32  ;;  %p11589_p4 = scmp.lt.s32.totalorder %s143_s15, %s143_s15 }
  0x6f   :  { %p11585_p3 = scmp.ne.s32.totalorder %s143_s15, %s11584_s9  ;;  %p11590_p5 = scmp.lt.s32.totalorder %s11584_s9, %s11584_s9 }
  0x71   :  { %p11591_p6 = por %p11590_p5, %p11589_p4 }
  0x73   :  { %p11592_p7 = pnand %p11591_p6, %p11585_p3 }
  0x75   :  { %11595 = shalt.err (!%p11592_p7)
}
  0x76   :  { %148 = dma.hbm_to_vmem [thread:$0]  %s12499_s14, 32, %s143_s15, [#allocation14], %s11638_s23, %s11638_s23, %s11639_s24  }
  0x77   :  { %s11604_s12 = scalar_lea.vmem %s170_s27, 16  ;;  %s11608_s0 = scalar_lea.vmem %s170_s27, 32 }
  0x78   :  { %p11605_p8 = scmp.ne.s32.totalorder %s170_s27, %s11604_s12  ;;  %p11609_p9 = scmp.lt.s32.totalorder %s170_s27, %s170_s27 }
  0x79   :  { %p11610_p10 = scmp.lt.s32.totalorder %s11608_s0, %s11604_s12 }
  0x7b   :  { %p11611_p11 = por %p11610_p10, %p11609_p9 }
  0x7d   :  { %p11612_p12 = pnand %p11611_p11, %p11605_p8 }
  0x7f   :  { %11615 = shalt.err (!%p11612_p12)
}
  0x80   :  { %172 = dma.hbm_to_vmem [thread:$0]  %s12502_s17, 16, %s170_s27, [#allocation17]  }
  0x81   :  { %11616 = dma.done.wait [#allocation3], 256  }
  0x82   :  { %11617 = vsyncadd [#allocation3], 4294967040 }
  0x83   :  { %11618 = dma.done.wait [#allocation5], 6400  }
  0x84   :  { %11619 = vsyncadd [#allocation5], 4294960896 }
  0x85   :  { %11620 = dma.done.wait [#allocation8], 128  }
  0x86   :  { %11621 = vsyncadd [#allocation8], 4294967168 }
  0x87   :  { %11622 = dma.done.wait [#allocation11], 65536  }
  0x88   :  { %11623 = vsyncadd [#allocation11], 4294901760 }
  0x89   :  { %11624 = dma.done.wait [#allocation14], 64  }
  0x8a   :  { %11625 = vsyncadd [#allocation14], 4294967232 }
  0x8b   :  { %11626 = dma.done.wait [#allocation17], 48  }
  0x8c   :  { %11627 = vsyncadd [#allocation17], 4294967248  ;;  %v11650_v0 = vmov 0.0   ;;  %vm11651_vm0 = vmmov 0   ;;  %v10970_v1 = vld [vmem:[#allocation4 + $0x8] sm:$0xff]   ;;  %v10971_v2 = vld [vmem:[#allocation4] sm:$0xff]   ;;  %v317_v43 = vlaneseq }
  0x8d   :  { %10651 = vmatprep.subr.bf16.mxu0 %v11650_v0  ;;  %10655 = vmatprep.mubr.msk.bf16.mxu0 %vm11651_vm0, %v11650_v0  ;;  %v207_v3 = vld [vmem:[#allocation2] sm:$0xff]  ;;  %v208_v4 = vld [vmem:[#allocation2 + $0x8] sm:$0xff]  ;;  %v10975_v7 = vld [vmem:[#allocation6 + $0xb0] ss:$12 sps:$4 sm:$0xff]   ;;  %vm233_vm1 = vcmask 261120   ;;  %v11652_v30 = vmov 0  }
  0x8e   :  { %10652 = vmatpush3.bf16.msra.mxu0 %v10970_v1  ;;  %v10972_v5 = vld [vmem:[#allocation6 + $0xac] ss:$12 sps:$4 sm:$0xff]   ;;  %v10974_v6 = vld [vmem:[#allocation6 + $0xa8] ss:$12 sps:$4 sm:$0xff]   ;;  %v209_v8 = vpack.c.bf16 %v208_v4, %v207_v3  ;;  %v10978_v10 = vld [vmem:[#allocation6 + $0x90] ss:$12 sps:$4 sm:$0xff]   ;;  %492 = vmatprep.mubr.bf16.mxu1 %v11652_v30 }
  0x8f   :  { %10653 = vmatprep.subr.bf16.mxu0 %v11650_v0  ;;  %460 = vmatprep.subr.bf16.mxu1 %v10972_v5  ;;  %v10976_v9 = vld [vmem:[#allocation6 + $0x94] ss:$12 sps:$4 sm:$0xff]   ;;  %v10980_v11 = vld [vmem:[#allocation6 + $0x7c] ss:$12 sps:$4 sm:$0xff]   ;;  %v10979_v12 = vld [vmem:[#allocation6 + $0x98] ss:$12 sps:$4 sm:$0xff]  }
  0x90   :  { %461 = vmatpush1.bf16.msra.mxu1 %v10974_v6  ;;  %v10982_v13 = vld [vmem:[#allocation6 + $0x78] ss:$12 sps:$4 sm:$0xff]   ;;  %v10983_v15 = vld [vmem:[#allocation6 + $0x80] ss:$12 sps:$4 sm:$0xff]   ;;  %v10987_v18 = vld [vmem:[#allocation6 + $0x68] ss:$12 sps:$4 sm:$0xff]  }
  0x91   :  { %462 = vmatprep.subr.bf16.mxu1 %v10976_v9  ;;  %v10984_v14 = vld [vmem:[#allocation6 + $0x64] ss:$12 sps:$4 sm:$0xff]   ;;  %v10986_v16 = vld [vmem:[#allocation6 + $0x60] ss:$12 sps:$4 sm:$0xff]   ;;  %v10990_v19 = vld [vmem:[#allocation6 + $0x48] ss:$12 sps:$4 sm:$0xff]  }
  0x92   :  { %10654 = vmatpush3.bf16.msra.mxu0 %v10971_v2  ;;  %v10988_v17 = vld [vmem:[#allocation6 + $0x4c] ss:$12 sps:$4 sm:$0xff]   ;;  %v10992_v20 = vld [vmem:[#allocation6 + $0x34] ss:$12 sps:$4 sm:$0xff]   ;;  %v10991_v21 = vld [vmem:[#allocation6 + $0x50] ss:$12 sps:$4 sm:$0xff]  }
  0x93   :  { %10659 = vmatprep.subr.bf16.mxu0 %v11650_v0  ;;  %v10994_v22 = vld [vmem:[#allocation6 + $0x30] ss:$12 sps:$4 sm:$0xff]   ;;  %v10995_v23 = vld [vmem:[#allocation6 + $0x38] ss:$12 sps:$4 sm:$0xff]   ;;  %v10999_v26 = vld [vmem:[#allocation6 + $0x20] ss:$12 sps:$4 sm:$0xff]  }
  0x94   :  { %463 = vmatpush1.bf16.msra.mxu1 %v10978_v10  ;;  %v10996_v24 = vld [vmem:[#allocation6 + $0x1c] ss:$12 sps:$4 sm:$0xff]   ;;  %v10998_v25 = vld [vmem:[#allocation6 + $0x18] ss:$12 sps:$4 sm:$0xff]   ;;  %v11002_v28 = vld [vmem:[#allocation6] ss:$12 sps:$4 sm:$0xff]  }
  0x95   :  { %10656 = vmatmul.mubr.msk.bf16.vlgmr.msra.gmra.mxu0 %vm233_vm1, %v209_v8  ;;  %464 = vmatprep.subr.bf16.mxu1 %v10980_v11  ;;  %v11000_v27 = vld [vmem:[#allocation6 + $0x4] ss:$12 sps:$4 sm:$0xff]   ;;  %v11003_v29 = vld [vmem:[#allocation6 + $0x8] ss:$12 sps:$4 sm:$0xff]   ;;  %v9504_v31 = vld [vmem:[%s12488_s3] ss:$0 sm:$0xff] }
  0x96   :  { %10660 = vmatpush3.bf16.msra.mxu0 %v10975_v7  ;;  %10675 = vmatprep.mubr.msk.bf16.mxu0 %vm11651_vm0, %v11650_v0  ;;  %s12510_s2 = sld [smem:[#allocation26_spill]]  ;;  %v11839_v44 = vshrl.u32 %v317_v43, 7  ;;  %v315_v46 = vld [vmem:[#allocation7] sm:$0x7]  ;;  %s11653_s3 = smov 96   ;;  %vm722_vm2 = vcmask 64512  }
  0x97   :  { %10661 = vmatprep.subr.bf16.mxu0 %v11650_v0  ;;  %s11654_s29 = smov 32   ;;  %vm9400_vm3 = vcmask 1041409   ;;  %vm9492_vm4 = vcmask 517120  }
  0x98   :  { %465 = vmatpush1.bf16.msra.mxu1 %v10982_v13  ;;  %v11842_v45 = vsub.s32 2, %v11839_v44  ;;  %v11845_v47 = vsub.s32 1, %v11839_v44  ;;  %v11849_v49 = vsub.s32 0, %v11839_v44 }
  0x99   :  { %466 = vmatprep.subr.bf16.mxu1 %v10984_v14 }
  0x9a   :  { %10662 = vmatpush3.bf16.msra.mxu0 %v10979_v12  ;;  %v328_v48 = vrot.slane %v315_v46, %v11842_v45  ;;  %v324_v50 = vrot.slane %v315_v46, %v11845_v47  ;;  %v320_v54 = vrot.slane %v315_v46, %v11849_v49 }
  0x9b   :  { %10663 = vmatprep.subr.bf16.mxu0 %v11650_v0 }
  0x9c   :  { %467 = vmatpush1.bf16.msra.mxu1 %v10986_v16  ;;  %v278_v33 = vld [vmem:[%s12510_s2] sm:$0xff]  ;;  %v279_v35 = vld [vmem:[%s12510_s2 + $0x8] sm:$0xff] }
  0x9d   :  { %468 = vmatprep.subr.bf16.mxu1 %v10988_v17 }
  0x9e   :  { %10664 = vmatpush3.bf16.msra.mxu0 %v10983_v15 }
  0x9f   :  { %10665 = vmatprep.subr.bf16.mxu0 %v11650_v0 }
  0xa0   :  { %469 = vmatpush1.bf16.msra.mxu1 %v10990_v19 }
  0xa1   :  { %470 = vmatprep.subr.bf16.mxu1 %v10992_v20 }
  0xa2   :  { %10666 = vmatpush3.bf16.msra.mxu0 %v10987_v18 }
  0xa3   :  { %10667 = vmatprep.subr.bf16.mxu0 %v11650_v0 }
  0xa4   :  { %471 = vmatpush1.bf16.msra.mxu1 %v10994_v22 }
  0xa5   :  { %472 = vmatprep.subr.bf16.mxu1 %v10996_v24 }
  0xa6   :  { %10668 = vmatpush3.bf16.msra.mxu0 %v10991_v21 }
  0xa7   :  { %10669 = vmatprep.subr.bf16.mxu0 %v11650_v0 }
  0xa8   :  { %473 = vmatpush1.bf16.msra.mxu1 %v10998_v25 }
  0xa9   :  { %474 = vmatprep.subr.bf16.mxu1 %v11000_v27 }
  0xaa   :  { %10670 = vmatpush3.bf16.msra.mxu0 %v10995_v23 }
  0xab   :  { %10671 = vmatprep.subr.bf16.mxu0 %v11650_v0 }
  0xac   :  { %475 = vmatpush1.bf16.msra.mxu1 %v11002_v28 }
  0xad   :  { %10679 = vmatprep.subr.mxu1 %v11650_v0 }
  0xae   :  { %10672 = vmatpush3.bf16.msra.mxu0 %v10999_v26 }
  0xaf   :  { %10673 = vmatprep.subr.bf16.mxu0 %v11650_v0 }
  0xb2   :  { %10674 = vmatpush3.bf16.msra.mxu0 %v11003_v29 }
  0xb3   :  { %10689 = vmatprep.subr.mxu0 %v11650_v0 }
 0x155   :  { %v271_v32 = vpop.f32.mrf.mxu0 }
 0x156   :  { %v272_v36 = vadd.f32 %v9504_v31, %v271_v32 }
 0x157   :  { %v10657_v34 = vpop.f32.mrf.mxu0 }
 0x158   :  { %v11829_v40 = vadd.f32 %v278_v33, %v272_v36  ;;  %v11004_v33 = vld [vmem:[%s12491_s6 + $0x8] sm:$0xff]   ;;  %v11005_v34 = vld [vmem:[%s12491_s6] sm:$0xff]  }
 0x159   :  { %v274_v37 = vpop.f32.mrf.mxu0 }
 0x15a   :  { %v275_v38 = vadd.f32 %v9504_v31, %v274_v37 }
 0x15b   :  { %v10658_v39 = vpop.f32.mrf.mxu0 }
 0x15c   :  { %v11831_v41 = vadd.f32 %v279_v35, %v275_v38 }
 0x15e   :  { %v282_v42 = vpack.c.bf16 %v11831_v41, %v11829_v40 }
 0x160   :  { %493 = vmatmul.mubr.bf16.vlgmr.msra.gmra.mxu1 %v282_v42  ;;  %10676 = vmatmul.mubr.bf16.vlgmr.msra.gmra.mxu0 %v282_v42 }
 0x161   :  { %10681 = vmatprep.mubr.msk.f32.mxu1 %vm11651_vm0, %v11650_v0  ;;  %10691 = vmatprep.mubr.msk.f32.mxu0 %vm11651_vm0, %v11650_v0 }
 0x220   :  { %v494_v51 = vpop.f32.mrf.mxu1  ;;  %v537_v52 = vpop.f32.mrf.mxu0 }
 0x221   :  { %v11852_v53 = vadd.f32 %v537_v52, %v328_v48  ;;  %v11863_v60 = vadd.f32 %v494_v51, %v320_v54 }
 0x222   :  { %v496_v55 = vpop.f32.mrf.mxu1  ;;  %v10677_v56 = vpop.f32.mrf.mxu0 }
 0x223   :  { %v11855_v57 = vadd.f32 %v496_v55, %v324_v50  ;;  %10690 = vmatpush3.msra.mxu0 %v11852_v53 }
 0x224   :  { %v498_v58 = vpop.f32.mrf.mxu1  ;;  %v540_v59 = vpop.f32.mrf.mxu0  ;;  %10699 = vmatprep.subr.bf16.mxu0 %v11650_v0 }
 0x225   :  { %952 = vrot.lane.b32.xlu1 %v11855_v57, %s11653_s3  ;;  %10680 = vmatpush3.xpose.msk.msra.mxu1 %vm233_vm1, %v11855_v57  ;;  %v11874_v1 = vadd.f32 %v498_v58, %v320_v54  ;;  %v11879_v2 = vadd.f32 %v540_v59, %v328_v48 }
 0x226   :  { %v500_v61 = vpop.f32.mrf.mxu1  ;;  %v10678_v62 = vpop.f32.mrf.mxu0  ;;  %10684 = vmatprep.subr.mxu1 %v11650_v0 }
 0x227   :  { %v11866_v63 = vadd.f32 %v500_v61, %v324_v50 }
 0x228   :  { %10682 = vmatmul.mubr.msk.f32.vlgmr.msra.gmra.mxu1 %vm233_vm1, %v11863_v60 }
 0x229   :  { %950 = vrot.lane.b32.xlu1 %v11863_v60, %s11653_s3  ;;  %10685 = vmatpush3.xpose.msk.msra.mxu1 %vm233_vm1, %v11866_v63 }
 0x22a   :  { %10686 = vmatprep.mubr.msk.f32.mxu1 %vm11651_vm0, %v11650_v0  ;;  %10694 = vmatprep.subr.mxu1 %v11650_v0 }
 0x22c   :  { %10687 = vmatmul.mubr.msk.f32.vlgmr.msra.gmra.mxu1 %vm233_vm1, %v11874_v1 }
 0x22d   :  { %1028 = vrot.lane.b32.xlu1 %v11874_v1, %s11653_s3  ;;  %10695 = vmatpush3.msra.mxu1 %v11879_v2 }
 0x22e   :  { %10696 = vmatprep.mubr.msk.f32.mxu1 %vm11651_vm0, %v11650_v0  ;;  %10707 = vmatprep.subr.mxu1 %v11650_v0 }
 0x297   :  { %v953_v16 = vpop.permute.xlu1 %952 }
 0x29b   :  { %v951_v17 = vpop.permute.xlu1 %950 }
 0x29f   :  { %v1029_v18 = vpop.permute.xlu1 %1028 }
 0x2e8   :  { %v640_v3 = vpop.f32.mrf.mxu1 }
 0x2e9   :  { %v720_v4 = vmul.f32 0.17677669, %v640_v3 }
 0x2ea   :  { %v10683_v5 = vpop.f32.mrf.mxu1 }
 0x2eb   :  { %v723_v6 = vsel %vm722_vm2, %v720_v4, -inf }
 0x2ec   :  { %724 = vmax.xlane.f32.xlu1 %v723_v6  ;;  %v716_v7 = vpop.f32.mrf.mxu1 }
 0x2ed   :  { %v721_v8 = vmul.f32 0.17677669, %v716_v7 }
 0x2ee   :  { %v10688_v9 = vpop.f32.mrf.mxu1 }
 0x2ef   :  { %v726_v10 = vsel %vm722_vm2, %v721_v8, -inf }
 0x2f0   :  { %727 = vmax.xlane.f32.xlu0 %v726_v10 }
 0x375   :  { %v725_v19 = vpop.xlane.xlu1 %724 }
 0x376   :  { %v729_v20 = vsub.f32 %v720_v4, %v725_v19  ;;  %v11007_v19 = vld [vmem:[%s12491_s6 + $0x10] sm:$0xff]  }
 0x378   :  { %v731_v21 = vmul.f32 1.442695, %v729_v20 }
 0x379   :  { %v728_v11 = vpop.xlane.xlu0 %727 }
 0x37a   :  { %v730_v12 = vsub.f32 %v721_v8, %v728_v11 }
 0x37c   :  { %v733_v13 = vmul.f32 1.442695, %v730_v12 }
 0x37e   :  { %11316 = vpow2.f32 %v733_v13 }
 0x37f   :  { %11318 = vpow2.f32 %v731_v21 }
 0x38b   :  { %v11317_v14 = vpop.eup %11316 }
 0x38c   :  { %v738_v15 = vsel %vm722_vm2, %v11317_v14, 0.0  ;;  %v11319_v22 = vpop.eup %11318 }
 0x38d   :  { %739 = vadd.xlane.f32.xlu0 %v738_v15  ;;  %v735_v23 = vsel %vm722_vm2, %v11319_v22, 0.0 }
 0x3a3   :  { %1030 = vrot.lane.b32.xlu0 %v11866_v63, %s11653_s3 }
 0x3c2   :  { %736 = vadd.xlane.f32.xlu0 %v735_v23 }
 0x3d8   :  { %1131 = vrot.lane.b32.xlu0 %v11852_v53, %s11653_s3 }
 0x3dc   :  { %1343 = vrot.lane.b32.xlu0 %v11863_v60, %s11629_s30 }
 0x3e0   :  { %1421 = vrot.lane.b32.xlu0 %v11874_v1, %s11629_s30 }
 0x416   :  { %v740_v24 = vpop.xlane.xlu0 %739 }
 0x417   :  { %11320 = vrcp.f32 %v740_v24 }
 0x41a   :  { %v1031_v27 = vpop.permute.xlu0 %1030 }
 0x424   :  { %v11321_v25 = vpop.eup %11320 }
 0x425   :  { %v744_v26 = vmul.f32 %v11321_v25, %v11317_v14 }
 0x427   :  { %10697 = vmatmul.mubr.msk.f32.vlgmr.msra.gmra.mxu1 %vm722_vm2, %v744_v26 }
 0x428   :  { %10708 = vmatpush3.xpose.msk.msra.mxu1 %vm233_vm1, %v953_v16  ;;  %10709 = vmatprep.mubr.msk.f32.mxu1 %vm11651_vm0, %v11650_v0 }
 0x429   :  { %10712 = vmatprep.subr.mxu1 %v11650_v0 }
 0x42b   :  { %10710 = vmatmul.mubr.msk.f32.vlgmr.msra.gmra.mxu1 %vm233_vm1, %v951_v17  ;;  %v11006_v17 = vld [vmem:[%s12491_s6 + $0x18] sm:$0xff]  }
 0x42c   :  { %10713 = vmatpush3.xpose.msk.msra.mxu1 %vm233_vm1, %v1031_v27  ;;  %10714 = vmatprep.mubr.msk.f32.mxu1 %vm11651_vm0, %v11650_v0 }
 0x42d   :  { %10717 = vmatprep.subr.mxu1 %v11650_v0 }
 0x42f   :  { %10715 = vmatmul.mubr.msk.f32.vlgmr.msra.gmra.mxu1 %vm233_vm1, %v1029_v18 }
 0x430   :  { %10719 = vmatprep.mubr.msk.f32.mxu1 %vm11651_vm0, %v11650_v0 }
 0x44b   :  { %v737_v28 = vpop.xlane.xlu0 %736 }
 0x44c   :  { %11322 = vrcp.f32 %v737_v28 }
 0x44f   :  { %v1132_v29 = vpop.permute.xlu0 %1131 }
 0x450   :  { %10718 = vmatpush3.msra.mxu1 %v1132_v29  ;;  %v9532_v29 = vld [vmem:[%s12492_s7] ss:$0 sm:$0xff] }
 0x451   :  { %10750 = vmatprep.subr.mxu1 %v11650_v0 }
 0x453   :  { %v1344_v26 = vpop.permute.xlu0 %1343 }
 0x457   :  { %v1422_v28 = vpop.permute.xlu0 %1421 }
 0x459   :  { %v11323_v31 = vpop.eup %11322 }
 0x45a   :  { %v742_v32 = vmul.f32 %v11323_v31, %v11319_v22 }
 0x45c   :  { %10692 = vmatmul.mubr.msk.f32.vlgmr.msra.gmra.mxu0 %vm722_vm2, %v742_v32 }
 0x45d   :  { %10703 = vmatprep.mubr.msk.bf16.mxu0 %vm11651_vm0, %v11650_v0  ;;  %10700 = vmatpush3.bf16.msra.mxu0 %v11004_v33 }
 0x45e   :  { %10701 = vmatprep.subr.bf16.mxu0 %v11650_v0 }
 0x461   :  { %10702 = vmatpush3.bf16.msra.mxu0 %v11005_v34 }
 0x462   :  { %10722 = vmatprep.subr.mxu0 %v11650_v0 }
 0x4e7   :  { %v887_v35 = vpop.f32.mrf.mxu1 }
 0x4e9   :  { %v10698_v36 = vpop.f32.mrf.mxu1 }
 0x4eb   :  { %v1024_v37 = vpop.f32.mrf.mxu1 }
 0x4ec   :  { %v1106_v38 = vmul.f32 0.17677669, %v1024_v37 }
 0x4ed   :  { %v10711_v39 = vpop.f32.mrf.mxu1 }
 0x4ee   :  { %v1108_v42 = vsel %vm722_vm2, %v1106_v38, -inf }
 0x4ef   :  { %1109 = vmax.xlane.f32.xlu1 %v1108_v42  ;;  %v1102_v43 = vpop.f32.mrf.mxu1 }
 0x4f0   :  { %v1107_v46 = vmul.f32 0.17677669, %v1102_v43 }
 0x4f1   :  { %v10716_v48 = vpop.f32.mrf.mxu1 }
 0x4f2   :  { %v1111_v50 = vsel %vm722_vm2, %v1107_v46, -inf }
 0x4f3   :  { %1112 = vmax.xlane.f32.xlu1 %v1111_v50 }
 0x51c   :  { %v814_v51 = vpop.f32.mrf.mxu0 }
 0x51d   :  { %v891_v52 = vpack.c.bf16 %v887_v35, %v814_v51 }
 0x51e   :  { %v10693_v54 = vpop.f32.mrf.mxu0 }
 0x51f   :  { %10704 = vmatmul.mubr.msk.bf16.vlgmr.msra.gmra.mxu0 %vm233_vm1, %v891_v52 }
 0x520   :  { %10724 = vmatprep.mubr.msk.f32.mxu0 %vm11651_vm0, %v11650_v0 }
 0x578   :  { %v1110_v55 = vpop.xlane.xlu1 %1109 }
 0x579   :  { %v1114_v56 = vsub.f32 %v1106_v38, %v1110_v55 }
 0x57b   :  { %v1116_v58 = vmul.f32 1.442695, %v1114_v56 }
 0x57c   :  { %v1113_v59 = vpop.xlane.xlu1 %1112 }
 0x57d   :  { %11324 = vpow2.f32 %v1116_v58  ;;  %v1115_v61 = vsub.f32 %v1107_v46, %v1113_v59 }
 0x57f   :  { %v1118_v62 = vmul.f32 1.442695, %v1115_v61 }
 0x581   :  { %11326 = vpow2.f32 %v1118_v62 }
 0x58a   :  { %v11325_v3 = vpop.eup %11324 }
 0x58b   :  { %v1120_v4 = vsel %vm722_vm2, %v11325_v3, 0.0 }
 0x58c   :  { %1121 = vadd.xlane.f32.xlu1 %v1120_v4 }
 0x58e   :  { %v11327_v5 = vpop.eup %11326 }
 0x58f   :  { %v1123_v6 = vsel %vm722_vm2, %v11327_v5, 0.0 }
 0x590   :  { %1124 = vadd.xlane.f32.xlu1 %v1123_v6 }
 0x5a1   :  { %1208 = vrot.lane.b32.xlu1 %v11879_v2, %s11653_s3 }
 0x5a5   :  { %1345 = vrot.lane.b32.xlu1 %v11855_v57, %s11629_s30 }
 0x5a9   :  { %1423 = vrot.lane.b32.xlu1 %v11866_v63, %s11629_s30 }
 0x5df   :  { %v941_v7 = vpop.f32.mrf.mxu0 }
 0x5e0   :  { %v948_v31 = vadd.f32 %v9532_v29, %v941_v7 }
 0x5e1   :  { %v10705_v8 = vpop.f32.mrf.mxu0 }
 0x5e3   :  { %v944_v9 = vpop.f32.mrf.mxu0 }
 0x5e4   :  { %v949_v35 = vadd.f32 %v9532_v29, %v944_v9 }
 0x5e5   :  { %v10706_v10 = vpop.f32.mrf.mxu0 }
 0x615   :  { %v1122_v11 = vpop.xlane.xlu1 %1121 }
 0x616   :  { %11328 = vrcp.f32 %v1122_v11 }
 0x619   :  { %v1125_v12 = vpop.xlane.xlu1 %1124 }
 0x61a   :  { %11330 = vrcp.f32 %v1125_v12 }
 0x61d   :  { %v1209_v13 = vpop.permute.xlu1 %1208 }
 0x61e   :  { %10723 = vmatpush3.msra.mxu0 %v1209_v13 }
 0x61f   :  { %10727 = vmatprep.subr.bf16.mxu0 %v11650_v0 }
 0x621   :  { %v1346_v25 = vpop.permute.xlu1 %1345 }
 0x623   :  { %v11329_v14 = vpop.eup %11328 }
 0x624   :  { %v1127_v15 = vmul.f32 %v11329_v14, %v11325_v3 }
 0x625   :  { %v1424_v27 = vpop.permute.xlu1 %1423 }
 0x626   :  { %10720 = vmatmul.mubr.msk.f32.vlgmr.msra.gmra.mxu1 %vm722_vm2, %v1127_v15 }
 0x627   :  { %v11331_v16 = vpop.eup %11330  ;;  %10752 = vmatprep.mubr.msk.f32.mxu1 %vm11651_vm0, %v11650_v0 }
 0x628   :  { %v1129_v18 = vmul.f32 %v11331_v16, %v11327_v5 }
 0x62a   :  { %10725 = vmatmul.mubr.msk.f32.vlgmr.msra.gmra.mxu0 %vm722_vm2, %v1129_v18 }
 0x62b   :  { %10728 = vmatpush3.bf16.msra.mxu0 %v11006_v17  ;;  %10731 = vmatprep.mubr.msk.bf16.mxu0 %vm11651_vm0, %v11650_v0 }
 0x62c   :  { %10729 = vmatprep.subr.bf16.mxu0 %v11650_v0 }
 0x62f   :  { %10730 = vmatpush3.bf16.msra.mxu0 %v11007_v19 }
 0x630   :  { %10735 = vmatprep.subr.mxu0 %v11650_v0 }
 0x6e6   :  { %v1203_v20 = vpop.f32.mrf.mxu1 }
 0x6e8   :  { %v10721_v21 = vpop.f32.mrf.mxu1 }
 0x6ea   :  { %v1280_v22 = vpop.f32.mrf.mxu0 }
 0x6eb   :  { %v1284_v23 = vpack.c.bf16 %v1280_v22, %v1203_v20 }
 0x6ec   :  { %v10726_v24 = vpop.f32.mrf.mxu0 }
 0x6ed   :  { %10732 = vmatmul.mubr.msk.bf16.vlgmr.msra.gmra.mxu0 %vm233_vm1, %v1284_v23  ;;  %v11008_v24 = vld [vmem:[%s12491_s6 + $0x28] sm:$0xff]  }
 0x6ee   :  { %10736 = vmatpush3.xpose.msk.msra.mxu0 %vm233_vm1, %v1346_v25  ;;  %10737 = vmatprep.mubr.msk.f32.mxu0 %vm11651_vm0, %v11650_v0  ;;  %v11009_v25 = vld [vmem:[%s12491_s6 + $0x20] sm:$0xff]  }
 0x6ef   :  { %10740 = vmatprep.subr.mxu0 %v11650_v0 }
 0x6f5   :  { %10738 = vmatmul.mubr.msk.f32.vlgmr.msra.gmra.mxu0 %vm233_vm1, %v1344_v26 }
 0x6f6   :  { %10741 = vmatpush3.xpose.msk.msra.mxu0 %vm233_vm1, %v1424_v27  ;;  %10742 = vmatprep.mubr.msk.f32.mxu0 %vm11651_vm0, %v11650_v0 }
 0x6f7   :  { %10745 = vmatprep.subr.mxu0 %v11650_v0 }
 0x6f9   :  { %10743 = vmatmul.mubr.msk.f32.vlgmr.msra.gmra.mxu0 %vm233_vm1, %v1422_v28 }
 0x6fa   :  { %10747 = vmatprep.mubr.msk.f32.mxu0 %vm11651_vm0, %v11650_v0 }
 0x7ad   :  { %v1334_v32 = vpop.f32.mrf.mxu0 }
 0x7ae   :  { %v11970_v33 = vadd.f32 %v1334_v32, %v948_v31 }
 0x7af   :  { %v10733_v34 = vpop.f32.mrf.mxu0 }
 0x7b1   :  { %v1337_v36 = vpop.f32.mrf.mxu0 }
 0x7b2   :  { %v11972_v37 = vadd.f32 %v1337_v36, %v949_v35 }
 0x7b3   :  { %v10734_v38 = vpop.f32.mrf.mxu0 }
 0x7b5   :  { %v1417_v39 = vpop.f32.mrf.mxu0 }
 0x7b7   :  { %v10739_v42 = vpop.f32.mrf.mxu0 }
 0x7b9   :  { %v1495_v43 = vpop.f32.mrf.mxu0 }
 0x7ba   :  { %v1500_v46 = vmul.f32 0.17677669, %v1495_v43 }
 0x7bb   :  { %v10744_v48 = vpop.f32.mrf.mxu0 }
 0x7bc   :  { %v1504_v50 = vsel %vm722_vm2, %v1500_v46, -inf }
 0x7bd   :  { %1505 = vmax.xlane.f32.xlu1 %v1504_v50 }
 0x7ce   :  { %1736 = vrot.lane.b32.xlu1 %v11855_v57, %s11654_s29  ;;  %v1499_v57 = vmul.f32 0.17677669, %v1417_v39 }
 0x7d2   :  { %1734 = vrot.lane.b32.xlu1 %v11863_v60, %s11654_s29  ;;  %v1501_v60 = vsel %vm722_vm2, %v1499_v57, -inf }
 0x7d6   :  { %1812 = vrot.lane.b32.xlu1 %v11874_v1, %s11654_s29 }
 0x846   :  { %v1506_v51 = vpop.xlane.xlu1 %1505 }
 0x847   :  { %v1508_v52 = vsub.f32 %v1500_v46, %v1506_v51 }
 0x849   :  { %v1511_v54 = vmul.f32 1.442695, %v1508_v52 }
 0x84a   :  { %v1737_v59 = vpop.permute.xlu1 %1736 }
 0x84b   :  { %11332 = vpow2.f32 %v1511_v54 }
 0x858   :  { %v11333_v55 = vpop.eup %11332 }
 0x859   :  { %v1516_v56 = vsel %vm722_vm2, %v11333_v55, 0.0 }
 0x85a   :  { %1517 = vadd.xlane.f32.xlu0 %v1516_v56  ;;  %v11011_v56 = vld [vmem:[%s12491_s6 + $0x30] sm:$0xff]  }
 0x870   :  { %1599 = vrot.lane.b32.xlu0 %v11879_v2, %s11629_s30 }
 0x874   :  { %1814 = vrot.lane.b32.xlu0 %v11866_v63, %s11654_s29  ;;  %v1735_v63 = vpop.permute.xlu1 %1734 }
 0x878   :  { %v1813_v3 = vpop.permute.xlu1 %1812 }
 0x893   :  { %1502 = vmax.xlane.f32.xlu0 %v1501_v60 }
 0x8a9   :  { %1523 = vrot.lane.b32.xlu0 %v11852_v53, %s11629_s30 }
 0x8ad   :  { %1914 = vrot.lane.b32.xlu0 %v11852_v53, %s11654_s29 }
 0x8e3   :  { %v1518_v1 = vpop.xlane.xlu0 %1517 }
 0x8e4   :  { %11334 = vrcp.f32 %v1518_v1 }
 0x8e7   :  { %v1600_v58 = vpop.permute.xlu0 %1599 }
 0x8e8   :  { %10751 = vmatpush3.msra.mxu1 %v1600_v58 }
 0x8e9   :  { %10763 = vmatprep.subr.mxu1 %v11650_v0 }
 0x8eb   :  { %v1815_v53 = vpop.permute.xlu0 %1814 }
 0x8f1   :  { %v11335_v61 = vpop.eup %11334 }
 0x8f2   :  { %v1522_v62 = vmul.f32 %v11335_v61, %v11333_v55  ;;  %v11010_v55 = vld [vmem:[%s12491_s6 + $0x38] sm:$0xff]  }
 0x8f4   :  { %10753 = vmatmul.mubr.msk.f32.vlgmr.msra.gmra.mxu1 %vm722_vm2, %v1522_v62 }
 0x8f5   :  { %10764 = vmatpush3.xpose.msk.msra.mxu1 %vm233_vm1, %v1737_v59  ;;  %10765 = vmatprep.mubr.msk.f32.mxu1 %vm11651_vm0, %v11650_v0 }
 0x8f6   :  { %10768 = vmatprep.subr.mxu1 %v11650_v0 }
 0x8f8   :  { %10766 = vmatmul.mubr.msk.f32.vlgmr.msra.gmra.mxu1 %vm233_vm1, %v1735_v63 }
 0x8f9   :  { %10769 = vmatpush3.xpose.msk.msra.mxu1 %vm233_vm1, %v1815_v53  ;;  %10770 = vmatprep.mubr.msk.f32.mxu1 %vm11651_vm0, %v11650_v0 }
 0x8fa   :  { %10773 = vmatprep.subr.mxu1 %v11650_v0 }
 0x8fc   :  { %10771 = vmatmul.mubr.msk.f32.vlgmr.msra.gmra.mxu1 %vm233_vm1, %v1813_v3 }
 0x8fd   :  { %10775 = vmatprep.mubr.msk.f32.mxu1 %vm11651_vm0, %v11650_v0 }
 0x91c   :  { %v1503_v4 = vpop.xlane.xlu0 %1502 }
 0x91d   :  { %v1507_v5 = vsub.f32 %v1499_v57, %v1503_v4 }
 0x91f   :  { %v1509_v6 = vmul.f32 1.442695, %v1507_v5 }
 0x920   :  { %v1524_v7 = vpop.permute.xlu0 %1523 }
 0x921   :  { %11336 = vpow2.f32 %v1509_v6  ;;  %10746 = vmatpush3.msra.mxu0 %v1524_v7 }
 0x922   :  { %10755 = vmatprep.subr.bf16.mxu0 %v11650_v0 }
 0x924   :  { %v1915_v8 = vpop.permute.xlu0 %1914 }
 0x925   :  { %10774 = vmatpush3.msra.mxu1 %v1915_v8 }
 0x926   :  { %10783 = vmatprep.subr.bf16.mxu1 %v11650_v0 }
 0x92e   :  { %v11337_v9 = vpop.eup %11336 }
 0x92f   :  { %v1513_v10 = vsel %vm722_vm2, %v11337_v9, 0.0 }
 0x930   :  { %1514 = vadd.xlane.f32.xlu1 %v1513_v10 }
 0x9b4   :  { %v1671_v11 = vpop.f32.mrf.mxu1 }
 0x9b6   :  { %v10754_v12 = vpop.f32.mrf.mxu1 }
 0x9b7   :  { %v2289_v12 = vld [vmem:[#allocation10 + $0x3c0] sm:$0xff] }
 0x9b8   :  { %v1808_v13 = vpop.f32.mrf.mxu1 }
 0x9b9   :  { %v1890_v14 = vmul.f32 0.17677669, %v1808_v13  ;;  %v1515_v15 = vpop.xlane.xlu1 %1514  ;;  %v2282_v13 = vld [vmem:[#allocation10 + $0x388] sm:$0xff] }
 0x9ba   :  { %11338 = vrcp.f32 %v1515_v15  ;;  %v10767_v16 = vpop.f32.mrf.mxu1 }
 0x9bb   :  { %v1892_v17 = vsel %vm722_vm2, %v1890_v14, -inf  ;;  %v2290_v16 = vld [vmem:[#allocation10 + $0x3c8] sm:$0xff] }
 0x9bc   :  { %1893 = vmax.xlane.f32.xlu1 %v1892_v17  ;;  %v1886_v18 = vpop.f32.mrf.mxu1  ;;  %v9685_v17 = vcombine.low %v2282_v13, %v2290_v16 }
 0x9bd   :  { %v1891_v19 = vmul.f32 0.17677669, %v1886_v18  ;;  %v9686_v18 = vcombine.high %v2282_v13, %v2290_v16  ;;  %v2194_v13 = vld [vmem:[#allocation10 + $0xc8] sm:$0xff] }
 0x9be   :  { %v10772_v20 = vpop.f32.mrf.mxu1 }
 0x9bf   :  { %v1895_v21 = vsel %vm722_vm2, %v1891_v19, -inf }
 0x9c0   :  { %1896 = vmax.xlane.f32.xlu1 %v1895_v21 }
 0x9c7   :  { %v11339_v22 = vpop.eup %11338 }
 0x9c8   :  { %v1520_v23 = vmul.f32 %v11339_v22, %v11337_v9 }
 0x9ca   :  { %10748 = vmatmul.mubr.msk.f32.vlgmr.msra.gmra.mxu0 %vm722_vm2, %v1520_v23 }
 0x9cb   :  { %10759 = vmatprep.mubr.msk.bf16.mxu0 %vm11651_vm0, %v11650_v0  ;;  %10756 = vmatpush3.bf16.msra.mxu0 %v11008_v24 }
 0x9cc   :  { %10757 = vmatprep.subr.bf16.mxu0 %v11650_v0 }
 0x9cf   :  { %10758 = vmatpush3.bf16.msra.mxu0 %v11009_v25  ;;  %v2265_v25 = vld [vmem:[#allocation10 + $0x300] sm:$0xff] }
 0x9d0   :  { %10778 = vmatprep.subr.mxu0 %v11650_v0 }
 0xa45   :  { %v1894_v26 = vpop.xlane.xlu1 %1893 }
 0xa46   :  { %v1898_v27 = vsub.f32 %v1890_v14, %v1894_v26  ;;  %v2273_v26 = vld [vmem:[#allocation10 + $0x340] sm:$0xff] }
 0xa48   :  { %v1900_v28 = vmul.f32 1.442695, %v1898_v27  ;;  %v2266_v27 = vld [vmem:[#allocation10 + $0x308] sm:$0xff] }
 0xa49   :  { %v1897_v29 = vpop.xlane.xlu1 %1896 }
 0xa4a   :  { %11340 = vpow2.f32 %v1900_v28  ;;  %v1899_v31 = vsub.f32 %v1891_v19, %v1897_v29  ;;  %v9668_v28 = vcombine.high %v2265_v25, %v2273_v26  ;;  %v2274_v29 = vld [vmem:[#allocation10 + $0x348] sm:$0xff] }
 0xa4c   :  { %v1902_v32 = vmul.f32 1.442695, %v1899_v31  ;;  %v9667_v31 = vcombine.low %v2265_v25, %v2273_v26  ;;  %v2283_v25 = vld [vmem:[#allocation10 + $0x390] sm:$0xff] }
 0xa4d   :  { %v2291_v26 = vld [vmem:[#allocation10 + $0x3d0] sm:$0xff] }
 0xa4e   :  { %11342 = vpow2.f32 %v1902_v32  ;;  %v9669_v32 = vcombine.low %v2266_v27, %v2274_v29 }
 0xa57   :  { %v11341_v34 = vpop.eup %11340 }
 0xa58   :  { %v1904_v35 = vsel %vm722_vm2, %v11341_v34, 0.0 }
 0xa59   :  { %1905 = vadd.xlane.f32.xlu1 %v1904_v35  ;;  %v2249_v35 = vld [vmem:[#allocation10 + $0x280] sm:$0xff] }
 0xa5b   :  { %v11343_v36 = vpop.eup %11342 }
 0xa5c   :  { %v1907_v38 = vsel %vm722_vm2, %v11343_v36, 0.0 }
 0xa5d   :  { %1908 = vadd.xlane.f32.xlu1 %v1907_v38  ;;  %v2250_v38 = vld [vmem:[#allocation10 + $0x288] sm:$0xff] }
 0xa6e   :  { %1990 = vrot.lane.b32.xlu1 %v11879_v2, %s11654_s29 }
 0xa8a   :  { %v1595_v39 = vpop.f32.mrf.mxu0 }
 0xa8b   :  { %v1675_v42 = vpack.c.bf16 %v1671_v11, %v1595_v39  ;;  %v2281_v11 = vld [vmem:[#allocation10 + $0x380] sm:$0xff] }
 0xa8c   :  { %v10749_v43 = vpop.f32.mrf.mxu0  ;;  %v9683_v14 = vcombine.low %v2281_v11, %v2289_v12  ;;  %v9684_v15 = vcombine.high %v2281_v11, %v2289_v12  ;;  %v2186_v11 = vld [vmem:[#allocation10 + $0x88] sm:$0xff] }
 0xa8d   :  { %10760 = vmatmul.mubr.msk.bf16.vlgmr.msra.gmra.mxu0 %vm233_vm1, %v1675_v42  ;;  %v2258_v42 = vld [vmem:[#allocation10 + $0x2c8] sm:$0xff]  ;;  %v9590_v16 = vcombine.high %v2186_v11, %v2194_v13 }
 0xa8e   :  { %10780 = vmatprep.mubr.msk.f32.mxu0 %vm11651_vm0, %v11650_v0 }
 0xae2   :  { %v1906_v46 = vpop.xlane.xlu1 %1905 }
 0xae3   :  { %11344 = vrcp.f32 %v1906_v46  ;;  %v9653_v46 = vcombine.low %v2250_v38, %v2258_v42 }
 0xae6   :  { %v1909_v48 = vpop.xlane.xlu1 %1908 }
 0xae7   :  { %11346 = vrcp.f32 %v1909_v48  ;;  %v9654_v48 = vcombine.high %v2250_v38, %v2258_v42 }
 0xaea   :  { %v1991_v50 = vpop.permute.xlu1 %1990 }
 0xaeb   :  { %10779 = vmatpush3.msra.mxu0 %v1991_v50  ;;  %v2233_v50 = vld [vmem:[#allocation10 + $0x200] sm:$0xff] }
 0xaec   :  { %3021 = vmatprep.subr.bf16.mxu0 %v9684_v15  ;;  %v9589_v15 = vcombine.low %v2186_v11, %v2194_v13 }
 0xaf0   :  { %v11345_v51 = vpop.eup %11344 }
 0xaf1   :  { %v1911_v52 = vmul.f32 %v11345_v51, %v11341_v34  ;;  %v9670_v34 = vcombine.high %v2266_v27, %v2274_v29  ;;  %v2241_v51 = vld [vmem:[#allocation10 + $0x240] sm:$0xff]  ;;  %v2284_v27 = vld [vmem:[#allocation10 + $0x398] sm:$0xff]  ;;  %v9688_v29 = vcombine.high %v2283_v25, %v2291_v26 }
 0xaf3   :  { %10776 = vmatmul.mubr.msk.f32.vlgmr.msra.gmra.mxu1 %vm722_vm2, %v1911_v52  ;;  %v2234_v52 = vld [vmem:[#allocation10 + $0x208] sm:$0xff] }
 0xaf4   :  { %v11347_v54 = vpop.eup %11346  ;;  %10787 = vmatprep.mubr.msk.bf16.mxu1 %vm11651_vm0, %v11650_v0  ;;  %10784 = vmatpush3.bf16.msra.mxu1 %v11010_v55  ;;  %v9635_v55 = vcombine.low %v2233_v50, %v2241_v51 }
 0xaf5   :  { %v1913_v2 = vmul.f32 %v11347_v54, %v11343_v36  ;;  %10785 = vmatprep.subr.bf16.mxu1 %v11650_v0  ;;  %v2257_v36 = vld [vmem:[#allocation10 + $0x2c0] sm:$0xff]  ;;  %v9636_v54 = vcombine.high %v2233_v50, %v2241_v51  ;;  %v9569_v50 = vld [vmem:[%s12493_s8] ss:$0 sm:$0xff] }
 0xaf6   :  { %v9652_v39 = vcombine.high %v2249_v35, %v2257_v36  ;;  %v9651_v43 = vcombine.low %v2249_v35, %v2257_v36 }
 0xaf7   :  { %10781 = vmatmul.mubr.msk.f32.vlgmr.msra.gmra.mxu0 %vm722_vm2, %v1913_v2  ;;  %v2242_v2 = vld [vmem:[#allocation10 + $0x248] sm:$0xff] }
 0xaf8   :  { %3053 = vmatprep.mubr.bf16.mxu0 %v11652_v30  ;;  %10786 = vmatpush3.bf16.msra.mxu1 %v11011_v56  ;;  %v9637_v56 = vcombine.low %v2234_v52, %v2242_v2 }
 0xaf9   :  { %3064 = vmatprep.subr.bf16.mxu1 %v9686_v18  ;;  %3022 = vmatpush1.bf16.msra.mxu0 %v9683_v14  ;;  %v2177_v18 = vld [vmem:[#allocation10 + $0x40] sm:$0xff] }
 0xafa   :  { %3023 = vmatprep.subr.bf16.mxu0 %v9668_v28  ;;  %v9687_v28 = vcombine.low %v2283_v25, %v2291_v26  ;;  %v2212_v25 = vld [vmem:[#allocation10 + $0x158] sm:$0xff] }
 0xafd   :  { %3024 = vmatpush1.bf16.msra.mxu0 %v9667_v31  ;;  %v2292_v31 = vld [vmem:[#allocation10 + $0x3d8] sm:$0xff] }
 0xafe   :  { %3025 = vmatprep.subr.bf16.mxu0 %v9652_v39 }
 0xb01   :  { %3026 = vmatpush1.bf16.msra.mxu0 %v9651_v43 }
 0xb02   :  { %3027 = vmatprep.subr.bf16.mxu0 %v9636_v54 }
 0xb05   :  { %3028 = vmatpush1.bf16.msra.mxu0 %v9635_v55 }
 0xb4d   :  { %v1725_v57 = vpop.f32.mrf.mxu0 }
 0xb4e   :  { %v1732_v60 = vadd.f32 %v1725_v57, %v11970_v33  ;;  %v9638_v57 = vcombine.high %v2234_v52, %v2242_v2  ;;  %v9570_v2 = vld [vmem:[#allocation9] ss:$0 sm:$0xff] }
 0xb4f   :  { %v10761_v1 = vpop.f32.mrf.mxu0 }
 0xb50   :  { %v2225_v1 = vld [vmem:[#allocation10 + $0x1c0] sm:$0xff] }
 0xb51   :  { %v1728_v58 = vpop.f32.mrf.mxu0 }
 0xb52   :  { %v1733_v59 = vadd.f32 %v1728_v58, %v11972_v37  ;;  %v2218_v58 = vld [vmem:[#allocation10 + $0x188] sm:$0xff] }
 0xb53   :  { %v10762_v61 = vpop.f32.mrf.mxu0 }
 0xb54   :  { %v2226_v61 = vld [vmem:[#allocation10 + $0x1c8] sm:$0xff] }
 0xbb3   :  { %v1986_v62 = vpop.f32.mrf.mxu1 }
 0xbb5   :  { %v10777_v63 = vpop.f32.mrf.mxu1 }
 0xbb6   :  { %v9621_v63 = vcombine.low %v2218_v58, %v2226_v61 }
 0xbb7   :  { %v2062_v53 = vpop.f32.mrf.mxu0 }
 0xbb8   :  { %v2066_v3 = vpack.c.bf16 %v2062_v53, %v1986_v62  ;;  %v9622_v53 = vcombine.high %v2218_v58, %v2226_v61 }
 0xbb9   :  { %v10782_v4 = vpop.f32.mrf.mxu0 }
 0xbba   :  { %10788 = vmatmul.mubr.msk.bf16.vlgmr.msra.gmra.mxu1 %vm233_vm1, %v2066_v3  ;;  %v2201_v3 = vld [vmem:[#allocation10 + $0x100] sm:$0xff] }
 0xbbb   :  { %3096 = vmatprep.mubr.bf16.mxu1 %v11652_v30  ;;  %3065 = vmatpush1.bf16.msra.mxu1 %v9685_v17  ;;  %v2209_v4 = vld [vmem:[#allocation10 + $0x140] sm:$0xff] }
 0xbbc   :  { %3066 = vmatprep.subr.bf16.mxu1 %v9670_v34  ;;  %v2169_v17 = vld [vmem:[#allocation10] sm:$0xff]  ;;  %v9690_v34 = vcombine.high %v2284_v27, %v2292_v31 }
 0xbbf   :  { %3067 = vmatpush1.bf16.msra.mxu1 %v9669_v32  ;;  %v9689_v32 = vcombine.low %v2284_v27, %v2292_v31  ;;  %v2187_v31 = vld [vmem:[#allocation10 + $0x90] sm:$0xff] }
 0xbc0   :  { %3068 = vmatprep.subr.bf16.mxu1 %v9654_v48 }
 0xbc3   :  { %3069 = vmatpush1.bf16.msra.mxu1 %v9653_v46 }
 0xbc4   :  { %3070 = vmatprep.subr.bf16.mxu1 %v9638_v57  ;;  %v2275_v57 = vld [vmem:[#allocation10 + $0x350] sm:$0xff] }
 0xbc7   :  { %3071 = vmatpush1.bf16.msra.mxu1 %v9637_v56  ;;  %v2267_v56 = vld [vmem:[#allocation10 + $0x310] sm:$0xff] }
 0xbc8   :  { %3072 = vmatprep.subr.bf16.mxu1 %v9622_v53  ;;  %v9672_v61 = vcombine.high %v2267_v56, %v2275_v57  ;;  %v2259_v53 = vld [vmem:[#allocation10 + $0x2d0] sm:$0xff] }
 0xbcb   :  { %3073 = vmatpush1.bf16.msra.mxu1 %v9621_v63  ;;  %v2251_v63 = vld [vmem:[#allocation10 + $0x290] sm:$0xff] }
 0xc7a   :  { %v2116_v5 = vpop.f32.mrf.mxu1 }
 0xc7b   :  { %v2123_v6 = vadd.f32 %v2116_v5, %v1732_v60  ;;  %v2217_v60 = vld [vmem:[#allocation10 + $0x180] sm:$0xff]  ;;  %v2202_v5 = vld [vmem:[#allocation10 + $0x108] sm:$0xff] }
 0xc7c   :  { %v10789_v7 = vpop.f32.mrf.mxu1  ;;  %v9619_v62 = vcombine.low %v2217_v60, %v2225_v1 }
 0xc7d   :  { %v2125_v8 = vadd.f32 %v2123_v6, %v11829_v40  ;;  %v9604_v6 = vcombine.high %v2201_v3, %v2209_v4  ;;  %v2210_v7 = vld [vmem:[#allocation10 + $0x148] sm:$0xff] }
 0xc7e   :  { %v2119_v33 = vpop.f32.mrf.mxu1 }
 0xc7f   :  { %v2124_v9 = vadd.f32 %v2119_v33, %v1733_v59  ;;  %2129 = vadd.xlane.f32.xlu0 %v2125_v8  ;;  %v9620_v59 = vcombine.high %v2217_v60, %v2225_v1  ;;  %v9605_v33 = vcombine.low %v2202_v5, %v2210_v7  ;;  %v2268_v60 = vld [vmem:[#allocation10 + $0x318] sm:$0xff] }
 0xc80   :  { %v10790_v10 = vpop.f32.mrf.mxu1  ;;  %v2276_v1 = vld [vmem:[#allocation10 + $0x358] sm:$0xff] }
 0xc81   :  { %v2126_v37 = vadd.f32 %v2124_v9, %v11831_v41  ;;  %3029 = vmatprep.subr.bf16.mxu0 %v9620_v59  ;;  %v9606_v9 = vcombine.high %v2202_v5, %v2210_v7  ;;  %v2185_v10 = vld [vmem:[#allocation10 + $0x80] sm:$0xff]  ;;  %v9673_v5 = vcombine.low %v2268_v60, %v2276_v1 }
 0xc82   :  { %3030 = vmatpush1.bf16.msra.mxu0 %v9619_v62  ;;  %v9674_v62 = vcombine.high %v2268_v60, %v2276_v1  ;;  %v2294_v60 = vld [vmem:[#allocation10 + $0x3e8] sm:$0xff] }
 0xc83   :  { %2131 = vadd.xlane.f32.xlu1 %v2126_v37  ;;  %3031 = vmatprep.subr.bf16.mxu0 %v9604_v6  ;;  %v9656_v6 = vcombine.high %v2251_v63, %v2259_v53 }
 0xc84   :  { %3074 = vmatprep.subr.bf16.mxu1 %v9606_v9  ;;  %v2236_v9 = vld [vmem:[#allocation10 + $0x218] sm:$0xff] }
 0xc85   :  { %3075 = vmatpush1.bf16.msra.mxu1 %v9605_v33  ;;  %v2243_v33 = vld [vmem:[#allocation10 + $0x250] sm:$0xff] }
 0xc86   :  { %3076 = vmatprep.subr.bf16.mxu1 %v9590_v16  ;;  %v2220_v16 = vld [vmem:[#allocation10 + $0x198] sm:$0xff] }
 0xc89   :  { %3077 = vmatpush1.bf16.msra.mxu1 %v9589_v15  ;;  %v2227_v15 = vld [vmem:[#allocation10 + $0x1d0] sm:$0xff] }
 0xd08   :  { %v2130_v40 = vpop.xlane.xlu0 %2129 }
 0xd09   :  { %v2134_v19 = vmul.f32 0.0078125, %v2130_v40  ;;  %v2170_v40 = vld [vmem:[#allocation10 + $0x8] sm:$0xff] }
 0xd0b   :  { %v12046_v20 = vsub.f32 %v2125_v8, %v2134_v19  ;;  %v9603_v8 = vcombine.low %v2201_v3, %v2209_v4  ;;  %v9572_v19 = vcombine.high %v2169_v17, %v2177_v18  ;;  %v2252_v3 = vld [vmem:[#allocation10 + $0x298] sm:$0xff]  ;;  %v9671_v4 = vcombine.low %v2267_v56, %v2275_v57  ;;  %v2293_v56 = vld [vmem:[#allocation10 + $0x3e0] sm:$0xff]  ;;  %v2286_v57 = vld [vmem:[#allocation10 + $0x3a8] sm:$0xff] }
 0xd0c   :  { %v2132_v21 = vpop.xlane.xlu1 %2131 }
 0xd0d   :  { %v2135_v22 = vmul.f32 0.0078125, %v2132_v21  ;;  %v2138_v41 = vmul.f32 %v12046_v20, %v12046_v20  ;;  %3032 = vmatpush1.bf16.msra.mxu0 %v9603_v8  ;;  %v2178_v21 = vld [vmem:[#allocation10 + $0x48] sm:$0xff]  ;;  %v2235_v8 = vld [vmem:[#allocation10 + $0x210] sm:$0xff] }
 0xd0f   :  { %v12050_v23 = vsub.f32 %v2126_v37, %v2135_v22  ;;  %2140 = vadd.xlane.f32.xlu0 %v2138_v41  ;;  %v2193_v37 = vld [vmem:[#allocation10 + $0xc0] sm:$0xff]  ;;  %v9571_v22 = vcombine.low %v2169_v17, %v2177_v18  ;;  %v9573_v41 = vcombine.low %v2170_v40, %v2178_v21  ;;  %v2228_v17 = vld [vmem:[#allocation10 + $0x1d8] sm:$0xff]  ;;  %v9639_v18 = vcombine.low %v2235_v8, %v2243_v33 }
 0xd10   :  { %v9588_v12 = vcombine.high %v2185_v10, %v2193_v37  ;;  %v9587_v14 = vcombine.low %v2185_v10, %v2193_v37  ;;  %v2244_v10 = vld [vmem:[#allocation10 + $0x258] sm:$0xff]  ;;  %v9655_v37 = vcombine.low %v2251_v63, %v2259_v53  ;;  %v9625_v27 = vcombine.low %v2220_v16, %v2228_v17  ;;  %v2269_v53 = vld [vmem:[#allocation10 + $0x320] sm:$0xff] }
 0xd11   :  { %v2139_v24 = vmul.f32 %v12050_v23, %v12050_v23  ;;  %v9642_v13 = vcombine.high %v2236_v9, %v2244_v10  ;;  %v9694_v63 = vcombine.high %v2286_v57, %v2294_v60 }
 0xd12   :  { %3033 = vmatprep.subr.bf16.mxu0 %v9588_v12  ;;  %v9640_v12 = vcombine.high %v2235_v8, %v2243_v33  ;;  %v2253_v33 = vld [vmem:[#allocation10 + $0x2a0] sm:$0xff] }
 0xd13   :  { %2142 = vadd.xlane.f32.xlu0 %v2139_v24  ;;  %3034 = vmatpush1.bf16.msra.mxu0 %v9587_v14  ;;  %v9574_v24 = vcombine.high %v2170_v40, %v2178_v21  ;;  %v2219_v14 = vld [vmem:[#allocation10 + $0x190] sm:$0xff]  ;;  %v9641_v40 = vcombine.low %v2236_v9, %v2244_v10  ;;  %v9626_v21 = vcombine.high %v2220_v16, %v2228_v17  ;;  %v2261_v9 = vld [vmem:[#allocation10 + $0x2e0] sm:$0xff]  ;;  %v2254_v10 = vld [vmem:[#allocation10 + $0x2a8] sm:$0xff] }
 0xd14   :  { %3035 = vmatprep.subr.bf16.mxu0 %v9572_v19  ;;  %v9624_v19 = vcombine.high %v2219_v14, %v2227_v15  ;;  %v9623_v26 = vcombine.low %v2219_v14, %v2227_v15  ;;  %v2237_v15 = vld [vmem:[#allocation10 + $0x220] sm:$0xff]  ;;  %v2238_v17 = vld [vmem:[#allocation10 + $0x228] sm:$0xff] }
 0xd15   :  { %3078 = vmatprep.subr.bf16.mxu1 %v9574_v24  ;;  %v2204_v24 = vld [vmem:[#allocation10 + $0x118] sm:$0xff]  ;;  %v2245_v16 = vld [vmem:[#allocation10 + $0x260] sm:$0xff] }
 0xd16   :  { %3079 = vmatpush1.bf16.msra.mxu1 %v9573_v41  ;;  %v2211_v41 = vld [vmem:[#allocation10 + $0x150] sm:$0xff] }
 0xd17   :  { %3036 = vmatpush1.bf16.msra.mxu0 %v9571_v22  ;;  %3150 = vmatprep.subr.bf16.mxu1 %v9690_v34  ;;  %v2203_v22 = vld [vmem:[#allocation10 + $0x110] sm:$0xff]  ;;  %v2188_v34 = vld [vmem:[#allocation10 + $0x98] sm:$0xff] }
 0xd18   :  { %3107 = vmatprep.subr.bf16.mxu0 %v9688_v29  ;;  %v9610_v29 = vcombine.high %v2204_v24, %v2212_v25 }
 0xd98   :  { %v2141_v35 = vpop.xlane.xlu0 %2140 }
 0xd99   :  { %v2144_v36 = vmul.f32 0.0078125, %v2141_v35  ;;  %v2196_v35 = vld [vmem:[#allocation10 + $0xd8] sm:$0xff] }
 0xd9b   :  { %v2146_v38 = vadd.f32 1e-05, %v2144_v36  ;;  %v9607_v36 = vcombine.low %v2203_v22, %v2211_v41 }
 0xd9c   :  { %v2143_v39 = vpop.xlane.xlu0 %2142 }
 0xd9d   :  { %11348 = vrsqrt.f32 %v2146_v38  ;;  %v2145_v42 = vmul.f32 0.0078125, %v2143_v39  ;;  %v9609_v38 = vcombine.low %v2204_v24, %v2212_v25  ;;  %v2229_v24 = vld [vmem:[#allocation10 + $0x1e0] sm:$0xff]  ;;  %v2222_v25 = vld [vmem:[#allocation10 + $0x1a8] sm:$0xff] }
 0xd9f   :  { %v2147_v43 = vadd.f32 1e-05, %v2145_v42  ;;  %v9594_v42 = vcombine.high %v2188_v34, %v2196_v35 }
 0xda1   :  { %11350 = vrsqrt.f32 %v2147_v43  ;;  %v2171_v43 = vld [vmem:[#allocation10 + $0x10] sm:$0xff] }
 0xdaa   :  { %v11349_v46 = vpop.eup %11348 }
 0xdab   :  { %v2150_v48 = vmul.f32 %v11349_v46, %v12046_v20  ;;  %v2179_v46 = vld [vmem:[#allocation10 + $0x50] sm:$0xff] }
 0xdac   :  { %v9575_v1 = vcombine.low %v2171_v43, %v2179_v46 }
 0xdad   :  { %v2158_v52 = vmul.f32 %v9569_v50, %v2150_v48  ;;  %v2172_v48 = vld [vmem:[#allocation10 + $0x18] sm:$0xff] }
 0xdae   :  { %v11351_v51 = vpop.eup %11350 }
 0xdaf   :  { %v2151_v54 = vmul.f32 %v11351_v51, %v12050_v23  ;;  %v12059_v58 = vadd.f32 %v9570_v2, %v2158_v52  ;;  %v2260_v23 = vld [vmem:[#allocation10 + $0x2d8] sm:$0xff]  ;;  %v9593_v52 = vcombine.low %v2188_v34, %v2196_v35  ;;  %v2213_v34 = vld [vmem:[#allocation10 + $0x160] sm:$0xff]  ;;  %v2206_v35 = vld [vmem:[#allocation10 + $0x128] sm:$0xff] }
 0xdb0   :  { %v9658_v7 = vcombine.high %v2252_v3, %v2260_v23  ;;  %v9657_v11 = vcombine.low %v2252_v3, %v2260_v23  ;;  %v2277_v3 = vld [vmem:[#allocation10 + $0x360] sm:$0xff]  ;;  %v2270_v23 = vld [vmem:[#allocation10 + $0x328] sm:$0xff] }
 0xdb1   :  { %v2159_v55 = vmul.f32 %v9569_v50, %v2151_v54  ;;  %v2180_v50 = vld [vmem:[#allocation10 + $0x58] sm:$0xff]  ;;  %v9576_v54 = vcombine.high %v2171_v43, %v2179_v46  ;;  %v2189_v46 = vld [vmem:[#allocation10 + $0xa0] sm:$0xff] }
 0xdb3   :  { %v12061_v59 = vadd.f32 %v9570_v2, %v2159_v55  ;;  %v9578_v2 = vcombine.high %v2172_v48, %v2180_v50  ;;  %v2285_v55 = vld [vmem:[#allocation10 + $0x3a0] sm:$0xff] }
 0xdb5   :  { %v12065_v20 = vpack.c.bf16 %v12061_v59, %v12059_v58 }
 0xdb7   :  { %3054 = vmatmul.mubr.bf16.vlgmr.msra.gmra.mxu0 %v12065_v20  ;;  %3097 = vmatmul.mubr.bf16.vlgmr.msra.gmra.mxu1 %v12065_v20 }
 0xdb8   :  { %3108 = vmatpush1.bf16.msra.mxu0 %v9687_v28  ;;  %3151 = vmatpush1.bf16.msra.mxu1 %v9689_v32  ;;  %v9608_v28 = vcombine.high %v2203_v22, %v2211_v41  ;;  %v2195_v32 = vld [vmem:[#allocation10 + $0xd0] sm:$0xff]  ;;  %v2221_v41 = vld [vmem:[#allocation10 + $0x1a0] sm:$0xff] }
 0xdb9   :  { %3109 = vmatprep.subr.bf16.mxu0 %v9672_v61  ;;  %3152 = vmatprep.subr.bf16.mxu1 %v9674_v62  ;;  %v9592_v39 = vcombine.high %v2187_v31, %v2195_v32  ;;  %v9591_v51 = vcombine.low %v2187_v31, %v2195_v32  ;;  %v9577_v61 = vcombine.low %v2172_v48, %v2180_v50  ;;  %v2205_v32 = vld [vmem:[#allocation10 + $0x120] sm:$0xff]  ;;  %v2190_v50 = vld [vmem:[#allocation10 + $0xa8] sm:$0xff] }
 0xdba   :  { %3139 = vmatprep.mubr.bf16.mxu0 %v11652_v30  ;;  %3182 = vmatprep.mubr.bf16.mxu1 %v11652_v30  ;;  %v9692_v62 = vcombine.high %v2285_v55, %v2293_v56  ;;  %v2197_v48 = vld [vmem:[#allocation10 + $0xe0] sm:$0xff] }
 0xdbc   :  { %3110 = vmatpush1.bf16.msra.mxu0 %v9671_v4  ;;  %3153 = vmatpush1.bf16.msra.mxu1 %v9673_v5  ;;  %v2278_v4 = vld [vmem:[#allocation10 + $0x368] sm:$0xff]  ;;  %v9691_v5 = vcombine.low %v2285_v55, %v2293_v56  ;;  %v2173_v56 = vld [vmem:[#allocation10 + $0x20] sm:$0xff] }
 0xdbd   :  { %3111 = vmatprep.subr.bf16.mxu0 %v9656_v6  ;;  %3154 = vmatprep.subr.bf16.mxu1 %v9658_v7  ;;  %v9693_v6 = vcombine.low %v2286_v57, %v2294_v60  ;;  %v9676_v7 = vcombine.high %v2269_v53, %v2277_v3  ;;  %v9678_v8 = vcombine.high %v2270_v23, %v2278_v4  ;;  %v2181_v57 = vld [vmem:[#allocation10 + $0x60] sm:$0xff]  ;;  %v2174_v60 = vld [vmem:[#allocation10 + $0x28] sm:$0xff] }
 0xdc0   :  { %3112 = vmatpush1.bf16.msra.mxu0 %v9655_v37  ;;  %3155 = vmatpush1.bf16.msra.mxu1 %v9657_v11  ;;  %v2262_v37 = vld [vmem:[#allocation10 + $0x2e8] sm:$0xff]  ;;  %v9675_v11 = vcombine.low %v2269_v53, %v2277_v3  ;;  %v2287_v3 = vld [vmem:[#allocation10 + $0x3b0] sm:$0xff] }
 0xdc1   :  { %3113 = vmatprep.subr.bf16.mxu0 %v9640_v12  ;;  %3156 = vmatprep.subr.bf16.mxu1 %v9642_v13  ;;  %v9677_v12 = vcombine.low %v2270_v23, %v2278_v4  ;;  %v9660_v13 = vcombine.high %v2253_v33, %v2261_v9  ;;  %v9662_v14 = vcombine.high %v2254_v10, %v2262_v37  ;;  %v2295_v23 = vld [vmem:[#allocation10 + $0x3f0] sm:$0xff]  ;;  %v2288_v4 = vld [vmem:[#allocation10 + $0x3b8] sm:$0xff] }
 0xdc4   :  { %3114 = vmatpush1.bf16.msra.mxu0 %v9639_v18  ;;  %3157 = vmatpush1.bf16.msra.mxu1 %v9641_v40  ;;  %v2246_v18 = vld [vmem:[#allocation10 + $0x268] sm:$0xff]  ;;  %v9659_v40 = vcombine.low %v2253_v33, %v2261_v9  ;;  %v2271_v9 = vld [vmem:[#allocation10 + $0x330] sm:$0xff] }
 0xdc5   :  { %3115 = vmatprep.subr.bf16.mxu0 %v9624_v19  ;;  %3158 = vmatprep.subr.bf16.mxu1 %v9626_v21  ;;  %v9661_v19 = vcombine.low %v2254_v10, %v2262_v37  ;;  %v9644_v21 = vcombine.high %v2237_v15, %v2245_v16  ;;  %v9646_v22 = vcombine.high %v2238_v17, %v2246_v18  ;;  %v2279_v10 = vld [vmem:[#allocation10 + $0x370] sm:$0xff]  ;;  %v2272_v37 = vld [vmem:[#allocation10 + $0x338] sm:$0xff] }
 0xdc8   :  { %3116 = vmatpush1.bf16.msra.mxu0 %v9623_v26  ;;  %3159 = vmatpush1.bf16.msra.mxu1 %v9625_v27  ;;  %v2230_v26 = vld [vmem:[#allocation10 + $0x1e8] sm:$0xff]  ;;  %v9643_v27 = vcombine.low %v2237_v15, %v2245_v16  ;;  %v2255_v16 = vld [vmem:[#allocation10 + $0x2b0] sm:$0xff] }
 0xdc9   :  { %3117 = vmatprep.subr.bf16.mxu0 %v9608_v28  ;;  %3160 = vmatprep.subr.bf16.mxu1 %v9610_v29  ;;  %v9645_v28 = vcombine.low %v2238_v17, %v2246_v18  ;;  %v9628_v29 = vcombine.high %v2221_v41, %v2229_v24  ;;  %v9630_v31 = vcombine.high %v2222_v25, %v2230_v26  ;;  %v2263_v17 = vld [vmem:[#allocation10 + $0x2f0] sm:$0xff]  ;;  %v2256_v18 = vld [vmem:[#allocation10 + $0x2b8] sm:$0xff] }
 0xdcc   :  { %3118 = vmatpush1.bf16.msra.mxu0 %v9607_v36  ;;  %3161 = vmatpush1.bf16.msra.mxu1 %v9609_v38  ;;  %v2214_v36 = vld [vmem:[#allocation10 + $0x168] sm:$0xff]  ;;  %v9627_v38 = vcombine.low %v2221_v41, %v2229_v24  ;;  %v2239_v24 = vld [vmem:[#allocation10 + $0x230] sm:$0xff] }
 0xdcd   :  { %3119 = vmatprep.subr.bf16.mxu0 %v9592_v39  ;;  %3162 = vmatprep.subr.bf16.mxu1 %v9594_v42  ;;  %v9629_v39 = vcombine.low %v2222_v25, %v2230_v26  ;;  %v9612_v42 = vcombine.high %v2205_v32, %v2213_v34  ;;  %v9614_v43 = vcombine.high %v2206_v35, %v2214_v36  ;;  %v2247_v25 = vld [vmem:[#allocation10 + $0x270] sm:$0xff]  ;;  %v2240_v26 = vld [vmem:[#allocation10 + $0x238] sm:$0xff] }
 0xdd0   :  { %3120 = vmatpush1.bf16.msra.mxu0 %v9591_v51  ;;  %3163 = vmatpush1.bf16.msra.mxu1 %v9593_v52  ;;  %v2198_v51 = vld [vmem:[#allocation10 + $0xe8] sm:$0xff]  ;;  %v9611_v52 = vcombine.low %v2205_v32, %v2213_v34  ;;  %v2223_v34 = vld [vmem:[#allocation10 + $0x1b0] sm:$0xff] }
 0xdd1   :  { %3121 = vmatprep.subr.bf16.mxu0 %v9576_v54  ;;  %3164 = vmatprep.subr.bf16.mxu1 %v9578_v2  ;;  %v9613_v54 = vcombine.low %v2206_v35, %v2214_v36  ;;  %v9596_v2 = vcombine.high %v2189_v46, %v2197_v48  ;;  %v9598_v55 = vcombine.high %v2190_v50, %v2198_v51  ;;  %v2231_v35 = vld [vmem:[#allocation10 + $0x1f0] sm:$0xff]  ;;  %v2224_v36 = vld [vmem:[#allocation10 + $0x1b8] sm:$0xff] }
 0xdd4   :  { %3122 = vmatpush1.bf16.msra.mxu0 %v9575_v1  ;;  %3165 = vmatpush1.bf16.msra.mxu1 %v9577_v61  ;;  %v2182_v1 = vld [vmem:[#allocation10 + $0x68] sm:$0xff]  ;;  %v9595_v61 = vcombine.low %v2189_v46, %v2197_v48  ;;  %v2207_v48 = vld [vmem:[#allocation10 + $0x130] sm:$0xff] }
 0xdd5   :  { %3193 = vmatprep.subr.bf16.mxu0 %v9692_v62  ;;  %3236 = vmatprep.subr.bf16.mxu1 %v9694_v63  ;;  %v9597_v62 = vcombine.low %v2190_v50, %v2198_v51  ;;  %v9580_v63 = vcombine.high %v2173_v56, %v2181_v57  ;;  %v9582_v53 = vcombine.high %v2174_v60, %v2182_v1  ;;  %v2215_v50 = vld [vmem:[#allocation10 + $0x170] sm:$0xff]  ;;  %v2208_v51 = vld [vmem:[#allocation10 + $0x138] sm:$0xff] }
 0xdd7   :  { %3140 = vmatmul.mubr.bf16.vlgmr.msra.gmra.mxu0 %v12065_v20  ;;  %3183 = vmatmul.mubr.bf16.vlgmr.msra.gmra.mxu1 %v12065_v20 }
 0xdd8   :  { %3194 = vmatpush1.bf16.msra.mxu0 %v9691_v5  ;;  %3237 = vmatpush1.bf16.msra.mxu1 %v9693_v6  ;;  %v2296_v5 = vld [vmem:[#allocation10 + $0x3f8] sm:$0xff]  ;;  %v9579_v6 = vcombine.low %v2173_v56, %v2181_v57  ;;  %v2191_v57 = vld [vmem:[#allocation10 + $0xb0] sm:$0xff] }
 0xdd9   :  { %3195 = vmatprep.subr.bf16.mxu0 %v9676_v7  ;;  %3238 = vmatprep.subr.bf16.mxu1 %v9678_v8  ;;  %v9581_v7 = vcombine.low %v2174_v60, %v2182_v1  ;;  %v9696_v8 = vcombine.high %v2287_v3, %v2295_v23  ;;  %v9698_v33 = vcombine.high %v2288_v4, %v2296_v5  ;;  %v2199_v60 = vld [vmem:[#allocation10 + $0xf0] sm:$0xff]  ;;  %v2192_v1 = vld [vmem:[#allocation10 + $0xb8] sm:$0xff] }
 0xdda   :  { %3225 = vmatprep.mubr.bf16.mxu0 %v11652_v30  ;;  %3268 = vmatprep.mubr.bf16.mxu1 %v11652_v30 }
 0xddc   :  { %3196 = vmatpush1.bf16.msra.mxu0 %v9675_v11  ;;  %3239 = vmatpush1.bf16.msra.mxu1 %v9677_v12  ;;  %v2280_v11 = vld [vmem:[#allocation10 + $0x378] sm:$0xff]  ;;  %v9695_v12 = vcombine.low %v2287_v3, %v2295_v23  ;;  %v2175_v23 = vld [vmem:[#allocation10 + $0x30] sm:$0xff] }
 0xddd   :  { %3197 = vmatprep.subr.bf16.mxu0 %v9660_v13  ;;  %3240 = vmatprep.subr.bf16.mxu1 %v9662_v14  ;;  %v9697_v13 = vcombine.low %v2288_v4, %v2296_v5  ;;  %v9680_v14 = vcombine.high %v2271_v9, %v2279_v10  ;;  %v9682_v15 = vcombine.high %v2272_v37, %v2280_v11  ;;  %v2183_v4 = vld [vmem:[#allocation10 + $0x70] sm:$0xff]  ;;  %v2176_v5 = vld [vmem:[#allocation10 + $0x38] sm:$0xff] }
 0xde0   :  { %3198 = vmatpush1.bf16.msra.mxu0 %v9659_v40  ;;  %3241 = vmatpush1.bf16.msra.mxu1 %v9661_v19  ;;  %v2264_v40 = vld [vmem:[#allocation10 + $0x2f8] sm:$0xff]  ;;  %v9679_v19 = vcombine.low %v2271_v9, %v2279_v10  ;;  %v9583_v10 = vcombine.low %v2175_v23, %v2183_v4 }
 0xde1   :  { %3199 = vmatprep.subr.bf16.mxu0 %v9644_v21  ;;  %3242 = vmatprep.subr.bf16.mxu1 %v9646_v22  ;;  %v9681_v21 = vcombine.low %v2272_v37, %v2280_v11  ;;  %v9664_v22 = vcombine.high %v2255_v16, %v2263_v17  ;;  %v9666_v41 = vcombine.high %v2256_v18, %v2264_v40  ;;  %v11012_v11 = vld [vmem:[#allocation12 + $0x78] sm:$0xff]  }
 0xde4   :  { %3200 = vmatpush1.bf16.msra.mxu0 %v9643_v27  ;;  %3243 = vmatpush1.bf16.msra.mxu1 %v9645_v28  ;;  %v2248_v27 = vld [vmem:[#allocation10 + $0x278] sm:$0xff]  ;;  %v9663_v28 = vcombine.low %v2255_v16, %v2263_v17  ;;  %v11017_v16 = vld [vmem:[#allocation12 + $0xf0] sm:$0xff]  }
 0xde5   :  { %3201 = vmatprep.subr.bf16.mxu0 %v9628_v29  ;;  %3244 = vmatprep.subr.bf16.mxu1 %v9630_v31  ;;  %v9665_v29 = vcombine.low %v2256_v18, %v2264_v40  ;;  %v9648_v31 = vcombine.high %v2239_v24, %v2247_v25  ;;  %v9650_v32 = vcombine.high %v2240_v26, %v2248_v27  ;;  %v11018_v17 = vld [vmem:[#allocation12 + $0x30] sm:$0xff]   ;;  %v11020_v40 = vld [vmem:[#allocation12 + $0x68] sm:$0xff]  }
 0xde6   :  { %v11019_v18 = vld [vmem:[#allocation12 + $0xb0] sm:$0xff]  }
 0xde8   :  { %3202 = vmatpush1.bf16.msra.mxu0 %v9627_v38  ;;  %3245 = vmatpush1.bf16.msra.mxu1 %v9629_v39  ;;  %v2232_v38 = vld [vmem:[#allocation10 + $0x1f8] sm:$0xff]  ;;  %v9647_v39 = vcombine.low %v2239_v24, %v2247_v25  ;;  %v11025_v24 = vld [vmem:[#allocation12 + $0xe0] sm:$0xff]  }
 0xde9   :  { %3203 = vmatprep.subr.bf16.mxu0 %v9612_v42  ;;  %3246 = vmatprep.subr.bf16.mxu1 %v9614_v43  ;;  %v9649_v42 = vcombine.low %v2240_v26, %v2248_v27  ;;  %v9632_v43 = vcombine.high %v2223_v34, %v2231_v35  ;;  %v9634_v46 = vcombine.high %v2224_v36, %v2232_v38  ;;  %v11026_v25 = vld [vmem:[#allocation12 + $0x20] sm:$0xff]   ;;  %v11028_v26 = vld [vmem:[#allocation12 + $0x58] sm:$0xff]  }
 0xdea   :  { %v11029_v27 = vld [vmem:[#allocation12 + $0xd8] sm:$0xff]  }
 0xdec   :  { %3204 = vmatpush1.bf16.msra.mxu0 %v9611_v52  ;;  %3247 = vmatpush1.bf16.msra.mxu1 %v9613_v54  ;;  %v2216_v52 = vld [vmem:[#allocation10 + $0x178] sm:$0xff]  ;;  %v9631_v54 = vcombine.low %v2223_v34, %v2231_v35  ;;  %v11034_v34 = vld [vmem:[#allocation12 + $0x10] sm:$0xff]  }
 0xded   :  { %3205 = vmatprep.subr.bf16.mxu0 %v9596_v2  ;;  %3248 = vmatprep.subr.bf16.mxu1 %v9598_v55  ;;  %v9633_v2 = vcombine.low %v2224_v36, %v2232_v38  ;;  %v9616_v55 = vcombine.high %v2207_v48, %v2215_v50  ;;  %v9618_v56 = vcombine.high %v2208_v51, %v2216_v52  ;;  %v11035_v35 = vld [vmem:[#allocation12 + $0x90] sm:$0xff]   ;;  %v11036_v36 = vld [vmem:[#allocation12 + $0x48] sm:$0xff]  }
 0xdee   :  { %v11037_v38 = vld [vmem:[#allocation12 + $0xc8] sm:$0xff]  }
 0xdf0   :  { %3206 = vmatpush1.bf16.msra.mxu0 %v9595_v61  ;;  %3249 = vmatpush1.bf16.msra.mxu1 %v9597_v62  ;;  %v2200_v61 = vld [vmem:[#allocation10 + $0xf8] sm:$0xff]  ;;  %v9615_v62 = vcombine.low %v2207_v48, %v2215_v50  ;;  %v11042_v48 = vld [vmem:[#allocation12] sm:$0xff]  }
 0xdf1   :  { %3207 = vmatprep.subr.bf16.mxu0 %v9580_v63  ;;  %3250 = vmatprep.subr.bf16.mxu1 %v9582_v53  ;;  %v9617_v63 = vcombine.low %v2208_v51, %v2216_v52  ;;  %v9600_v53 = vcombine.high %v2191_v57, %v2199_v60  ;;  %v9602_v3 = vcombine.high %v2192_v1, %v2200_v61  ;;  %v11043_v50 = vld [vmem:[#allocation12 + $0x80] sm:$0xff]   ;;  %v11044_v51 = vld [vmem:[#allocation12 + $0x178] sm:$0xff]  }
 0xdf2   :  { %v11045_v52 = vld [vmem:[#allocation12 + $0x1f8] sm:$0xff]  }
 0xdf4   :  { %3208 = vmatpush1.bf16.msra.mxu0 %v9579_v6  ;;  %3251 = vmatpush1.bf16.msra.mxu1 %v9581_v7  ;;  %v2184_v6 = vld [vmem:[#allocation10 + $0x78] sm:$0xff]  ;;  %v9599_v7 = vcombine.low %v2191_v57, %v2199_v60 }
 0xdf5   :  { %3279 = vmatprep.subr.bf16.mxu0 %v9696_v8  ;;  %3322 = vmatprep.subr.bf16.mxu1 %v9698_v33  ;;  %v9601_v8 = vcombine.low %v2192_v1, %v2200_v61  ;;  %v9584_v33 = vcombine.high %v2175_v23, %v2183_v4  ;;  %v9586_v9 = vcombine.high %v2176_v5, %v2184_v6 }
 0xdf6   :  { %v9585_v37 = vcombine.low %v2176_v5, %v2184_v6 }
 0xdf7   :  { %3226 = vmatmul.mubr.bf16.vlgmr.msra.gmra.mxu0 %v12065_v20  ;;  %3269 = vmatmul.mubr.bf16.vlgmr.msra.gmra.mxu1 %v12065_v20 }
 0xdf8   :  { %3280 = vmatpush1.bf16.msra.mxu0 %v9695_v12  ;;  %3323 = vmatpush1.bf16.msra.mxu1 %v9697_v13  ;;  %v11013_v12 = vld [vmem:[#allocation12 + $0xf8] sm:$0xff]  }
 0xdf9   :  { %3281 = vmatprep.subr.bf16.mxu0 %v9680_v14  ;;  %3324 = vmatprep.subr.bf16.mxu1 %v9682_v15  ;;  %v11014_v13 = vld [vmem:[#allocation12 + $0x38] sm:$0xff]   ;;  %v11016_v15 = vld [vmem:[#allocation12 + $0x70] sm:$0xff]  }
 0xdfa   :  { %3311 = vmatprep.mubr.bf16.mxu0 %v11652_v30  ;;  %3354 = vmatprep.mubr.bf16.mxu1 %v11652_v30  ;;  %v11015_v14 = vld [vmem:[#allocation12 + $0xb8] sm:$0xff]  }
 0xdfc   :  { %3282 = vmatpush1.bf16.msra.mxu0 %v9679_v19  ;;  %3325 = vmatpush1.bf16.msra.mxu1 %v9681_v21  ;;  %v11021_v19 = vld [vmem:[#allocation12 + $0xe8] sm:$0xff]  }
 0xdfd   :  { %3283 = vmatprep.subr.bf16.mxu0 %v9664_v22  ;;  %3326 = vmatprep.subr.bf16.mxu1 %v9666_v41  ;;  %v11022_v21 = vld [vmem:[#allocation12 + $0x28] sm:$0xff]   ;;  %v11024_v41 = vld [vmem:[#allocation12 + $0x60] sm:$0xff]  }
 0xdfe   :  { %v11023_v22 = vld [vmem:[#allocation12 + $0xa8] sm:$0xff]  }
 0xe00   :  { %3284 = vmatpush1.bf16.msra.mxu0 %v9663_v28  ;;  %3327 = vmatpush1.bf16.msra.mxu1 %v9665_v29  ;;  %v11030_v28 = vld [vmem:[#allocation12 + $0x18] sm:$0xff]  }
 0xe01   :  { %3285 = vmatprep.subr.bf16.mxu0 %v9648_v31  ;;  %3328 = vmatprep.subr.bf16.mxu1 %v9650_v32  ;;  %v11031_v29 = vld [vmem:[#allocation12 + $0x98] sm:$0xff]   ;;  %v11032_v31 = vld [vmem:[#allocation12 + $0x50] sm:$0xff]  }
 0xe02   :  { %v11033_v32 = vld [vmem:[#allocation12 + $0xd0] sm:$0xff]  }
 0xe04   :  { %3286 = vmatpush1.bf16.msra.mxu0 %v9647_v39  ;;  %3329 = vmatpush1.bf16.msra.mxu1 %v9649_v42  ;;  %v11038_v39 = vld [vmem:[#allocation12 + $0x8] sm:$0xff]  }
 0xe05   :  { %3287 = vmatprep.subr.bf16.mxu0 %v9632_v43  ;;  %3330 = vmatprep.subr.bf16.mxu1 %v9634_v46  ;;  %v11039_v42 = vld [vmem:[#allocation12 + $0x88] sm:$0xff]   ;;  %v11040_v43 = vld [vmem:[#allocation12 + $0x40] sm:$0xff]  }
 0xe06   :  { %v11041_v46 = vld [vmem:[#allocation12 + $0xc0] sm:$0xff]  }
 0xe08   :  { %3288 = vmatpush1.bf16.msra.mxu0 %v9631_v54  ;;  %3331 = vmatpush1.bf16.msra.mxu1 %v9633_v2  ;;  %v12082_v54 = vsub.s32 3, %v11839_v44  ;;  %v12087_v2 = vld [vmem:[%s12496_s11] sm:$0xff] }
 0xe09   :  { %3289 = vmatprep.subr.bf16.mxu0 %v9616_v55  ;;  %3332 = vmatprep.subr.bf16.mxu1 %v9618_v56  ;;  %v2308_v57 = vrot.slane %v12087_v2, %v11845_v47  ;;  %v2304_v1 = vrot.slane %v12087_v2, %v11849_v49  ;;  %v2312_v61 = vrot.slane %v12087_v2, %v11842_v45 }
 0xe0a   :  { %v2316_v60 = vrot.slane %v12087_v2, %v12082_v54 }
 0xe0c   :  { %3290 = vmatpush1.bf16.msra.mxu0 %v9615_v62  ;;  %3333 = vmatpush1.bf16.msra.mxu1 %v9617_v63 }
 0xe0d   :  { %3291 = vmatprep.subr.bf16.mxu0 %v9600_v53  ;;  %3334 = vmatprep.subr.bf16.mxu1 %v9602_v3 }
 0xe10   :  { %3292 = vmatpush1.bf16.msra.mxu0 %v9599_v7  ;;  %3335 = vmatpush1.bf16.msra.mxu1 %v9601_v8 }
 0xe11   :  { %3293 = vmatprep.subr.bf16.mxu0 %v9584_v33  ;;  %3336 = vmatprep.subr.bf16.mxu1 %v9586_v9 }
 0xe14   :  { %3294 = vmatpush1.bf16.msra.mxu0 %v9583_v10  ;;  %3337 = vmatpush1.bf16.msra.mxu1 %v9585_v37 }
 0xe15   :  { %10237 = vmatprep.subr.bf16.mxu0 %v11012_v11  ;;  %10259 = vmatprep.subr.bf16.mxu1 %v11013_v12 }
 0xe17   :  { %3312 = vmatmul.mubr.bf16.vlgmr.msra.gmra.mxu0 %v12065_v20  ;;  %3355 = vmatmul.mubr.bf16.vlgmr.msra.gmra.mxu1 %v12065_v20  ;;  %v11027_v20 = vld [vmem:[#allocation12 + $0xa0] sm:$0xff]  }
 0xe18   :  { %10238 = vmatpush3.bf16.msra.mxu0 %v11014_v13  ;;  %10260 = vmatpush3.bf16.msra.mxu1 %v11015_v14 }
 0xe19   :  { %10239 = vmatprep.subr.bf16.mxu0 %v11016_v15  ;;  %10261 = vmatprep.subr.bf16.mxu1 %v11017_v16 }
 0xe1c   :  { %10240 = vmatpush3.bf16.msra.mxu0 %v11018_v17  ;;  %10262 = vmatpush3.bf16.msra.mxu1 %v11019_v18 }
 0xe1d   :  { %10241 = vmatprep.subr.bf16.mxu0 %v11020_v40  ;;  %10263 = vmatprep.subr.bf16.mxu1 %v11021_v19 }
 0xe20   :  { %10242 = vmatpush3.bf16.msra.mxu0 %v11022_v21  ;;  %10264 = vmatpush3.bf16.msra.mxu1 %v11023_v22  ;;  %v11046_v21 = vld [vmem:[#allocation12 + $0x138] sm:$0xff]  }
 0xe21   :  { %10243 = vmatprep.subr.bf16.mxu0 %v11024_v41  ;;  %10265 = vmatprep.subr.bf16.mxu1 %v11025_v24  ;;  %v11047_v22 = vld [vmem:[#allocation12 + $0x1b8] sm:$0xff]  }
 0xe24   :  { %10244 = vmatpush3.bf16.msra.mxu0 %v11026_v25  ;;  %10266 = vmatpush3.bf16.msra.mxu1 %v11027_v20  ;;  %v11048_v25 = vld [vmem:[#allocation12 + $0x170] sm:$0xff]  }
 0xe25   :  { %10245 = vmatprep.subr.bf16.mxu0 %v11028_v26  ;;  %10267 = vmatprep.subr.bf16.mxu1 %v11029_v27  ;;  %v11049_v20 = vld [vmem:[#allocation12 + $0x1f0] sm:$0xff]  }
 0xe26   :  { %v11050_v26 = vld [vmem:[#allocation12 + $0x130] sm:$0xff]  }
 0xe27   :  { %v11051_v27 = vld [vmem:[#allocation12 + $0x1b0] sm:$0xff]  }
 0xe28   :  { %10246 = vmatpush3.bf16.msra.mxu0 %v11030_v28  ;;  %10268 = vmatpush3.bf16.msra.mxu1 %v11031_v29  ;;  %v11052_v28 = vld [vmem:[#allocation12 + $0x168] sm:$0xff]  }
 0xe29   :  { %10247 = vmatprep.subr.bf16.mxu0 %v11032_v31  ;;  %10269 = vmatprep.subr.bf16.mxu1 %v11033_v32  ;;  %v11053_v29 = vld [vmem:[#allocation12 + $0x1e8] sm:$0xff]  }
 0xe2a   :  { %v11054_v31 = vld [vmem:[#allocation12 + $0x128] sm:$0xff]  }
 0xe2b   :  { %v11055_v32 = vld [vmem:[#allocation12 + $0x1a8] sm:$0xff]  }
 0xe2c   :  { %10248 = vmatpush3.bf16.msra.mxu0 %v11034_v34  ;;  %10270 = vmatpush3.bf16.msra.mxu1 %v11035_v35  ;;  %v11056_v34 = vld [vmem:[#allocation12 + $0x160] sm:$0xff]  }
 0xe2d   :  { %10249 = vmatprep.subr.bf16.mxu0 %v11036_v36  ;;  %10271 = vmatprep.subr.bf16.mxu1 %v11037_v38  ;;  %v11057_v35 = vld [vmem:[#allocation12 + $0x1e0] sm:$0xff]  }
 0xe2e   :  { %v11058_v36 = vld [vmem:[#allocation12 + $0x120] sm:$0xff]  }
 0xe2f   :  { %v11059_v38 = vld [vmem:[#allocation12 + $0x1a0] sm:$0xff]  }
 0xe30   :  { %10250 = vmatpush3.bf16.msra.mxu0 %v11038_v39  ;;  %10272 = vmatpush3.bf16.msra.mxu1 %v11039_v42  ;;  %v11060_v39 = vld [vmem:[#allocation12 + $0x158] sm:$0xff]  }
 0xe31   :  { %10251 = vmatprep.subr.bf16.mxu0 %v11040_v43  ;;  %10273 = vmatprep.subr.bf16.mxu1 %v11041_v46  ;;  %v11061_v42 = vld [vmem:[#allocation12 + $0x1d8] sm:$0xff]  }
 0xe32   :  { %v11062_v43 = vld [vmem:[#allocation12 + $0x118] sm:$0xff]  }
 0xe33   :  { %v11063_v46 = vld [vmem:[#allocation12 + $0x198] sm:$0xff]  }
 0xe34   :  { %10252 = vmatpush3.bf16.msra.mxu0 %v11042_v48  ;;  %10274 = vmatpush3.bf16.msra.mxu1 %v11043_v50  ;;  %v11064_v48 = vld [vmem:[#allocation12 + $0x150] sm:$0xff]  }
 0xe35   :  { %10281 = vmatprep.subr.bf16.mxu0 %v11044_v51  ;;  %10303 = vmatprep.subr.bf16.mxu1 %v11045_v52  ;;  %v11065_v50 = vld [vmem:[#allocation12 + $0x1d0] sm:$0xff]   ;;  %v12098_v51 = vsub.s32 5, %v11839_v44  ;;  %v12101_v52 = vsub.s32 7, %v11839_v44 }
 0xe77   :  { %v3055_v55 = vpop.f32.mrf.mxu0  ;;  %v3098_v56 = vpop.f32.mrf.mxu1 }
 0xe78   :  { %v3056_v7 = vadd.f32 %v3055_v55, %v2304_v1  ;;  %v3099_v8 = vadd.f32 %v3098_v56, %v2312_v61  ;;  %v12104_v55 = vsub.s32 4, %v11839_v44  ;;  %v12107_v56 = vsub.s32 6, %v11839_v44 }
 0xe79   :  { %v3057_v62 = vpop.f32.mrf.mxu0  ;;  %v3100_v63 = vpop.f32.mrf.mxu1 }
 0xe7a   :  { %v3058_v23 = vadd.f32 %v3057_v62, %v2308_v57  ;;  %v3101_v4 = vadd.f32 %v3100_v63, %v2316_v60  ;;  %v3365_v17 = vmax.f32 %v3056_v7, 0.0  ;;  %v3367_v18 = vmax.f32 %v3099_v8, 0.0  ;;  %v11068_v62 = vld [vmem:[#allocation12 + $0x148] sm:$0xff]  }
 0xe7b   :  { %v3059_v53 = vpop.f32.mrf.mxu0  ;;  %v3102_v3 = vpop.f32.mrf.mxu1  ;;  %v11069_v63 = vld [vmem:[#allocation12 + $0x1c8] sm:$0xff]   ;;  %v2320_v44 = vrot.slane %v12087_v2, %v12104_v55 }
 0xe7c   :  { %v3060_v5 = vadd.f32 %v3059_v53, %v2304_v1  ;;  %v3103_v6 = vadd.f32 %v3102_v3, %v2312_v61  ;;  %v3366_v13 = vmax.f32 %v3058_v23, 0.0  ;;  %v3368_v14 = vmax.f32 %v3101_v4, 0.0  ;;  %v11071_v7 = vld [vmem:[#allocation12 + $0x188] sm:$0xff]  }
 0xe7d   :  { %v3061_v33 = vpop.f32.mrf.mxu0  ;;  %v3104_v9 = vpop.f32.mrf.mxu1  ;;  %v2324_v53 = vrot.slane %v12087_v2, %v12098_v51  ;;  %v2332_v3 = vrot.slane %v12087_v2, %v12101_v52  ;;  %v2328_v23 = vrot.slane %v12087_v2, %v12107_v56 }
 0xe7e   :  { %v3062_v10 = vadd.f32 %v3061_v33, %v2308_v57  ;;  %v3105_v37 = vadd.f32 %v3104_v9, %v2316_v60  ;;  %v3381_v11 = vmax.f32 %v3060_v5, 0.0  ;;  %v3383_v12 = vmax.f32 %v3103_v6, 0.0  ;;  %v11066_v57 = vld [vmem:[#allocation12 + $0x110] sm:$0xff]   ;;  %v11070_v6 = vld [vmem:[#allocation12 + $0x108] sm:$0xff]   ;;  %v11072_v9 = vld [vmem:[#allocation12 + $0x140] sm:$0xff]  }
 0xe7f   :  { %v11067_v60 = vld [vmem:[#allocation12 + $0x190] sm:$0xff]  }
 0xe80   :  { %v3382_v15 = vmax.f32 %v3062_v10, 0.0  ;;  %v3384_v16 = vmax.f32 %v3105_v37, 0.0  ;;  %v3397_v41 = vpack.c.bf16 %v3381_v11, %v3365_v17  ;;  %v3399_v24 = vpack.c.bf16 %v3383_v12, %v3367_v18  ;;  %v11073_v10 = vld [vmem:[#allocation12 + $0x1c0] sm:$0xff]  }
 0xe82   :  { %v3398_v40 = vpack.c.bf16 %v3382_v15, %v3366_v13  ;;  %v3400_v19 = vpack.c.bf16 %v3384_v16, %v3368_v14 }
 0xe84   :  { %4476 = vmatprep.mubr.bf16.mxu0 %v3398_v40  ;;  %4517 = vmatprep.mubr.bf16.mxu1 %v3400_v19  ;;  %v11074_v40 = vld [vmem:[#allocation12 + $0x100] sm:$0xff]  }
 0xe85   :  { %4477 = vmatmul.mubr.bf16.vlgmr.msra.gmra.mxu0 %v3397_v41  ;;  %4518 = vmatmul.mubr.bf16.vlgmr.msra.gmra.mxu1 %v3399_v24  ;;  %v11075_v19 = vld [vmem:[#allocation12 + $0x180] sm:$0xff]   ;;  %v11076_v41 = vld [vmem:[#allocation12 + $0x278] sm:$0xff]  }
 0xe86   :  { %10282 = vmatpush3.bf16.msra.mxu0 %v11046_v21  ;;  %10304 = vmatpush3.bf16.msra.mxu1 %v11047_v22  ;;  %v11077_v24 = vld [vmem:[#allocation12 + $0x2f8] sm:$0xff]  }
 0xe87   :  { %10283 = vmatprep.subr.bf16.mxu0 %v11048_v25  ;;  %10305 = vmatprep.subr.bf16.mxu1 %v11049_v20 }
 0xe8a   :  { %10284 = vmatpush3.bf16.msra.mxu0 %v11050_v26  ;;  %10306 = vmatpush3.bf16.msra.mxu1 %v11051_v27 }
 0xe8b   :  { %10285 = vmatprep.subr.bf16.mxu0 %v11052_v28  ;;  %10307 = vmatprep.subr.bf16.mxu1 %v11053_v29 }
 0xe8e   :  { %10286 = vmatpush3.bf16.msra.mxu0 %v11054_v31  ;;  %10308 = vmatpush3.bf16.msra.mxu1 %v11055_v32 }
 0xe8f   :  { %10287 = vmatprep.subr.bf16.mxu0 %v11056_v34  ;;  %10309 = vmatprep.subr.bf16.mxu1 %v11057_v35  ;;  %v11078_v34 = vld [vmem:[#allocation12 + $0x238] sm:$0xff]  }
 0xe90   :  { %v11079_v35 = vld [vmem:[#allocation12 + $0x2b8] sm:$0xff]  }
 0xe92   :  { %10288 = vmatpush3.bf16.msra.mxu0 %v11058_v36  ;;  %10310 = vmatpush3.bf16.msra.mxu1 %v11059_v38 }
 0xe93   :  { %10289 = vmatprep.subr.bf16.mxu0 %v11060_v39  ;;  %10311 = vmatprep.subr.bf16.mxu1 %v11061_v42  ;;  %v11080_v39 = vld [vmem:[#allocation12 + $0x270] sm:$0xff]  }
 0xe94   :  { %v11081_v42 = vld [vmem:[#allocation12 + $0x2f0] sm:$0xff]  }
 0xe96   :  { %10290 = vmatpush3.bf16.msra.mxu0 %v11062_v43  ;;  %10312 = vmatpush3.bf16.msra.mxu1 %v11063_v46  ;;  %v11082_v43 = vld [vmem:[#allocation12 + $0x230] sm:$0xff]  }
 0xe97   :  { %v3141_v1 = vpop.f32.mrf.mxu0  ;;  %v3184_v61 = vpop.f32.mrf.mxu1  ;;  %10291 = vmatprep.subr.bf16.mxu0 %v11064_v48  ;;  %10313 = vmatprep.subr.bf16.mxu1 %v11065_v50  ;;  %v11083_v46 = vld [vmem:[#allocation12 + $0x2b0] sm:$0xff]   ;;  %v11084_v48 = vld [vmem:[#allocation12 + $0x268] sm:$0xff]  }
 0xe98   :  { %v3142_v14 = vadd.f32 %v3141_v1, %v2320_v44  ;;  %v3185_v15 = vadd.f32 %v3184_v61, %v2328_v23  ;;  %v11085_v50 = vld [vmem:[#allocation12 + $0x2e8] sm:$0xff]   ;;  %v11088_v1 = vld [vmem:[#allocation12 + $0x260] sm:$0xff]  }
 0xe99   :  { %v3143_v4 = vpop.f32.mrf.mxu0  ;;  %v3186_v5 = vpop.f32.mrf.mxu1  ;;  %v11089_v61 = vld [vmem:[#allocation12 + $0x2e0] sm:$0xff]  }
 0xe9a   :  { %10292 = vmatpush3.bf16.msra.mxu0 %v11066_v57  ;;  %10314 = vmatpush3.bf16.msra.mxu1 %v11067_v60  ;;  %v3144_v37 = vadd.f32 %v3143_v4, %v2324_v53  ;;  %v3187_v11 = vadd.f32 %v3186_v5, %v2332_v3  ;;  %v3369_v28 = vmax.f32 %v3142_v14, 0.0  ;;  %v3371_v29 = vmax.f32 %v3185_v15, 0.0  ;;  %v11086_v57 = vld [vmem:[#allocation12 + $0x228] sm:$0xff]   ;;  %v11096_v4 = vld [vmem:[#allocation12 + $0x250] sm:$0xff]  }
 0xe9b   :  { %v3145_v8 = vpop.f32.mrf.mxu0  ;;  %v3188_v33 = vpop.f32.mrf.mxu1  ;;  %10293 = vmatprep.subr.bf16.mxu0 %v11068_v62  ;;  %10315 = vmatprep.subr.bf16.mxu1 %v11069_v63  ;;  %v11087_v60 = vld [vmem:[#allocation12 + $0x2a8] sm:$0xff]   ;;  %v11090_v62 = vld [vmem:[#allocation12 + $0x220] sm:$0xff]   ;;  %v11097_v5 = vld [vmem:[#allocation12 + $0x2d0] sm:$0xff]  }
 0xe9c   :  { %v3146_v12 = vadd.f32 %v3145_v8, %v2320_v44  ;;  %v3189_v13 = vadd.f32 %v3188_v33, %v2328_v23  ;;  %v3370_v25 = vmax.f32 %v3144_v37, 0.0  ;;  %v3372_v20 = vmax.f32 %v3187_v11, 0.0  ;;  %v11091_v63 = vld [vmem:[#allocation12 + $0x2a0] sm:$0xff]   ;;  %v11094_v44 = vld [vmem:[#allocation12 + $0x218] sm:$0xff]   ;;  %v11099_v8 = vld [vmem:[#allocation12 + $0x290] sm:$0xff]  }
 0xe9d   :  { %v3147_v16 = vpop.f32.mrf.mxu0  ;;  %v3190_v2 = vpop.f32.mrf.mxu1  ;;  %v11095_v23 = vld [vmem:[#allocation12 + $0x298] sm:$0xff]   ;;  %v11101_v37 = vld [vmem:[#allocation12 + $0x2c8] sm:$0xff]  }
 0xe9e   :  { %v3148_v17 = vadd.f32 %v3147_v16, %v2324_v53  ;;  %v3191_v18 = vadd.f32 %v3190_v2, %v2332_v3  ;;  %10294 = vmatpush3.bf16.msra.mxu0 %v11070_v6  ;;  %10316 = vmatpush3.bf16.msra.mxu1 %v11071_v7  ;;  %v3385_v21 = vmax.f32 %v3146_v12, 0.0  ;;  %v3387_v22 = vmax.f32 %v3189_v13, 0.0  ;;  %v11092_v53 = vld [vmem:[#allocation12 + $0x258] sm:$0xff]   ;;  %v12120_v6 = vld [vmem:[%s12496_s11 + $0x8] sm:$0xff]  ;;  %v11098_v7 = vld [vmem:[#allocation12 + $0x210] sm:$0xff]  }
 0xe9f   :  { %10295 = vmatprep.subr.bf16.mxu0 %v11072_v9  ;;  %10317 = vmatprep.subr.bf16.mxu1 %v11073_v10  ;;  %v11093_v3 = vld [vmem:[#allocation12 + $0x2d8] sm:$0xff]   ;;  %v11100_v10 = vld [vmem:[#allocation12 + $0x248] sm:$0xff]   ;;  %v2340_v11 = vrot.slane %v12120_v6, %v11845_v47  ;;  %v2348_v12 = vrot.slane %v12120_v6, %v12082_v54  ;;  %v2336_v13 = vrot.slane %v12120_v6, %v11849_v49 }
 0xea0   :  { %v3386_v26 = vmax.f32 %v3148_v17, 0.0  ;;  %v3388_v27 = vmax.f32 %v3191_v18, 0.0  ;;  %v3401_v36 = vpack.c.bf16 %v3385_v21, %v3369_v28  ;;  %v3403_v38 = vpack.c.bf16 %v3387_v22, %v3371_v29  ;;  %v11102_v2 = vld [vmem:[#allocation12 + $0x208] sm:$0xff]   ;;  %v11105_v21 = vld [vmem:[#allocation12 + $0x2c0] sm:$0xff]  }
 0xea1   :  { %v2344_v14 = vrot.slane %v12120_v6, %v11842_v45  ;;  %v11103_v17 = vld [vmem:[#allocation12 + $0x288] sm:$0xff]  }
 0xea2   :  { %v3402_v31 = vpack.c.bf16 %v3386_v26, %v3370_v25  ;;  %v3404_v32 = vpack.c.bf16 %v3388_v27, %v3372_v20  ;;  %10296 = vmatpush3.bf16.msra.mxu0 %v11074_v40  ;;  %10318 = vmatpush3.bf16.msra.mxu1 %v11075_v19  ;;  %v11104_v19 = vld [vmem:[#allocation12 + $0x240] sm:$0xff]  }
 0xea3   :  { %10325 = vmatprep.subr.bf16.mxu0 %v11076_v41  ;;  %10347 = vmatprep.subr.bf16.mxu1 %v11077_v24 }
 0xea4   :  { %4558 = vmatprep.mubr.bf16.mxu0 %v3402_v31  ;;  %4599 = vmatprep.mubr.bf16.mxu1 %v3404_v32  ;;  %v11106_v32 = vld [vmem:[#allocation12 + $0x200] sm:$0xff]  }
 0xea5   :  { %4559 = vmatmul.mubr.bf16.vlgmr.msra.gmra.mxu0 %v3401_v36  ;;  %4600 = vmatmul.mubr.bf16.vlgmr.msra.gmra.mxu1 %v3403_v38  ;;  %v11108_v38 = vld [vmem:[#allocation12 + $0x378] sm:$0xff]  }
 0xea6   :  { %10326 = vmatpush3.bf16.msra.mxu0 %v11078_v34  ;;  %10348 = vmatpush3.bf16.msra.mxu1 %v11079_v35  ;;  %v11107_v34 = vld [vmem:[#allocation12 + $0x280] sm:$0xff]  }
 0xea7   :  { %10327 = vmatprep.subr.bf16.mxu0 %v11080_v39  ;;  %10349 = vmatprep.subr.bf16.mxu1 %v11081_v42  ;;  %v11109_v39 = vld [vmem:[#allocation12 + $0x3f8] sm:$0xff]  }
 0xeaa   :  { %10328 = vmatpush3.bf16.msra.mxu0 %v11082_v43  ;;  %10350 = vmatpush3.bf16.msra.mxu1 %v11083_v46 }
 0xeab   :  { %10329 = vmatprep.subr.bf16.mxu0 %v11084_v48  ;;  %10351 = vmatprep.subr.bf16.mxu1 %v11085_v50 }
 0xeae   :  { %10330 = vmatpush3.bf16.msra.mxu0 %v11086_v57  ;;  %10352 = vmatpush3.bf16.msra.mxu1 %v11087_v60 }
 0xeaf   :  { %10331 = vmatprep.subr.bf16.mxu0 %v11088_v1  ;;  %10353 = vmatprep.subr.bf16.mxu1 %v11089_v61  ;;  %v11110_v61 = vld [vmem:[#allocation12 + $0x338] sm:$0xff]  }
 0xeb2   :  { %10332 = vmatpush3.bf16.msra.mxu0 %v11090_v62  ;;  %10354 = vmatpush3.bf16.msra.mxu1 %v11091_v63  ;;  %v11111_v62 = vld [vmem:[#allocation12 + $0x3b8] sm:$0xff]  }
 0xeb3   :  { %10333 = vmatprep.subr.bf16.mxu0 %v11092_v53  ;;  %10355 = vmatprep.subr.bf16.mxu1 %v11093_v3  ;;  %v11112_v3 = vld [vmem:[#allocation12 + $0x370] sm:$0xff]  }
 0xeb6   :  { %10334 = vmatpush3.bf16.msra.mxu0 %v11094_v44  ;;  %10356 = vmatpush3.bf16.msra.mxu1 %v11095_v23  ;;  %v11113_v44 = vld [vmem:[#allocation12 + $0x3f0] sm:$0xff]  }
 0xeb7   :  { %v3227_v33 = vpop.f32.mrf.mxu0  ;;  %v3270_v9 = vpop.f32.mrf.mxu1  ;;  %10335 = vmatprep.subr.bf16.mxu0 %v11096_v4  ;;  %10357 = vmatprep.subr.bf16.mxu1 %v11097_v5  ;;  %v11114_v23 = vld [vmem:[#allocation12 + $0x330] sm:$0xff]   ;;  %v11116_v5 = vld [vmem:[#allocation12 + $0x368] sm:$0xff]  }
 0xeb8   :  { %v3228_v20 = vadd.f32 %v3227_v33, %v2336_v13  ;;  %v3271_v26 = vadd.f32 %v3270_v9, %v2344_v14  ;;  %v11115_v4 = vld [vmem:[#allocation12 + $0x3b0] sm:$0xff]   ;;  %v11119_v33 = vld [vmem:[#allocation12 + $0x3a8] sm:$0xff]   ;;  %v11120_v9 = vld [vmem:[#allocation12 + $0x360] sm:$0xff]  }
 0xeb9   :  { %v3229_v15 = vpop.f32.mrf.mxu0  ;;  %v3272_v16 = vpop.f32.mrf.mxu1 }
 0xeba   :  { %10336 = vmatpush3.bf16.msra.mxu0 %v11098_v7  ;;  %10358 = vmatpush3.bf16.msra.mxu1 %v11099_v8  ;;  %v3230_v22 = vadd.f32 %v3229_v15, %v2340_v11  ;;  %v3273_v41 = vadd.f32 %v3272_v16, %v2348_v12  ;;  %v3373_v50 = vmax.f32 %v3228_v20, 0.0  ;;  %v3375_v57 = vmax.f32 %v3271_v26, 0.0  ;;  %v11117_v7 = vld [vmem:[#allocation12 + $0x3e8] sm:$0xff]   ;;  %v11127_v15 = vld [vmem:[#allocation12 + $0x398] sm:$0xff]   ;;  %v11128_v16 = vld [vmem:[#allocation12 + $0x350] sm:$0xff]  }
 0xebb   :  { %v3231_v18 = vpop.f32.mrf.mxu0  ;;  %v3274_v40 = vpop.f32.mrf.mxu1  ;;  %10337 = vmatprep.subr.bf16.mxu0 %v11100_v10  ;;  %10359 = vmatprep.subr.bf16.mxu1 %v11101_v37  ;;  %v11118_v8 = vld [vmem:[#allocation12 + $0x328] sm:$0xff]   ;;  %v11121_v10 = vld [vmem:[#allocation12 + $0x3e0] sm:$0xff]   ;;  %v2360_v20 = vrot.slane %v12120_v6, %v12107_v56 }
 0xebc   :  { %v3232_v24 = vadd.f32 %v3231_v18, %v2336_v13  ;;  %v3275_v25 = vadd.f32 %v3274_v40, %v2344_v14  ;;  %v3374_v42 = vmax.f32 %v3230_v22, 0.0  ;;  %v3376_v43 = vmax.f32 %v3273_v41, 0.0  ;;  %v11122_v37 = vld [vmem:[#allocation12 + $0x320] sm:$0xff]   ;;  %v11125_v13 = vld [vmem:[#allocation12 + $0x3d8] sm:$0xff]   ;;  %v11131_v18 = vld [vmem:[#allocation12 + $0x390] sm:$0xff]  }
 0xebd   :  { %v3233_v27 = vpop.f32.mrf.mxu0  ;;  %v3276_v28 = vpop.f32.mrf.mxu1  ;;  %v11126_v14 = vld [vmem:[#allocation12 + $0x318] sm:$0xff]   ;;  %v11133_v22 = vld [vmem:[#allocation12 + $0x3c8] sm:$0xff]   ;;  %v2356_v41 = vrot.slane %v12120_v6, %v12098_v51 }
 0xebe   :  { %v3234_v29 = vadd.f32 %v3233_v27, %v2340_v11  ;;  %v3277_v31 = vadd.f32 %v3276_v28, %v2348_v12  ;;  %10338 = vmatpush3.bf16.msra.mxu0 %v11102_v2  ;;  %10360 = vmatpush3.bf16.msra.mxu1 %v11103_v17  ;;  %v3389_v35 = vmax.f32 %v3232_v24, 0.0  ;;  %v3391_v36 = vmax.f32 %v3275_v25, 0.0  ;;  %v11123_v11 = vld [vmem:[#allocation12 + $0x3a0] sm:$0xff]   ;;  %v11124_v12 = vld [vmem:[#allocation12 + $0x358] sm:$0xff]   ;;  %v11129_v2 = vld [vmem:[#allocation12 + $0x3d0] sm:$0xff]  }
 0xebf   :  { %10339 = vmatprep.subr.bf16.mxu0 %v11104_v19  ;;  %10361 = vmatprep.subr.bf16.mxu1 %v11105_v21  ;;  %v11130_v17 = vld [vmem:[#allocation12 + $0x310] sm:$0xff]   ;;  %v11132_v21 = vld [vmem:[#allocation12 + $0x348] sm:$0xff]   ;;  %v2364_v24 = vrot.slane %v12120_v6, %v12101_v52  ;;  %v2352_v25 = vrot.slane %v12120_v6, %v12104_v55 }
 0xec0   :  { %v3390_v46 = vmax.f32 %v3234_v29, 0.0  ;;  %v3392_v48 = vmax.f32 %v3277_v31, 0.0  ;;  %v3405_v63 = vpack.c.bf16 %v3389_v35, %v3373_v50  ;;  %v3407_v53 = vpack.c.bf16 %v3391_v36, %v3375_v57  ;;  %v11134_v28 = vld [vmem:[#allocation12 + $0x308] sm:$0xff]   ;;  %v11137_v35 = vld [vmem:[#allocation12 + $0x3c0] sm:$0xff]  }
 0xec1   :  { %v11135_v29 = vld [vmem:[#allocation12 + $0x388] sm:$0xff]  }
 0xec2   :  { %v3406_v60 = vpack.c.bf16 %v3390_v46, %v3374_v42  ;;  %v3408_v1 = vpack.c.bf16 %v3392_v48, %v3376_v43  ;;  %10340 = vmatpush3.bf16.msra.mxu0 %v11106_v32  ;;  %10362 = vmatpush3.bf16.msra.mxu1 %v11107_v34  ;;  %v11136_v34 = vld [vmem:[#allocation12 + $0x340] sm:$0xff]  }
 0xec3   :  { %10369 = vmatprep.subr.bf16.mxu0 %v11108_v38  ;;  %10391 = vmatprep.subr.bf16.mxu1 %v11109_v39 }
 0xec4   :  { %4640 = vmatprep.mubr.bf16.mxu0 %v3406_v60  ;;  %4681 = vmatprep.mubr.bf16.mxu1 %v3408_v1  ;;  %v11138_v60 = vld [vmem:[#allocation12 + $0x300] sm:$0xff]  }
 0xec5   :  { %4641 = vmatmul.mubr.bf16.vlgmr.msra.gmra.mxu0 %v3405_v63  ;;  %4682 = vmatmul.mubr.bf16.vlgmr.msra.gmra.mxu1 %v3407_v53  ;;  %v11139_v1 = vld [vmem:[#allocation12 + $0x380] sm:$0xff]  }
 0xec6   :  { %10370 = vmatpush3.bf16.msra.mxu0 %v11110_v61  ;;  %10392 = vmatpush3.bf16.msra.mxu1 %v11111_v62 }
 0xec7   :  { %10371 = vmatprep.subr.bf16.mxu0 %v11112_v3  ;;  %10393 = vmatprep.subr.bf16.mxu1 %v11113_v44 }
 0xeca   :  { %10372 = vmatpush3.bf16.msra.mxu0 %v11114_v23  ;;  %10394 = vmatpush3.bf16.msra.mxu1 %v11115_v4 }
 0xecb   :  { %10373 = vmatprep.subr.bf16.mxu0 %v11116_v5  ;;  %10395 = vmatprep.subr.bf16.mxu1 %v11117_v7 }
 0xece   :  { %10374 = vmatpush3.bf16.msra.mxu0 %v11118_v8  ;;  %10396 = vmatpush3.bf16.msra.mxu1 %v11119_v33 }
 0xecf   :  { %10375 = vmatprep.subr.bf16.mxu0 %v11120_v9  ;;  %10397 = vmatprep.subr.bf16.mxu1 %v11121_v10 }
 0xed2   :  { %10376 = vmatpush3.bf16.msra.mxu0 %v11122_v37  ;;  %10398 = vmatpush3.bf16.msra.mxu1 %v11123_v11 }
 0xed3   :  { %10377 = vmatprep.subr.bf16.mxu0 %v11124_v12  ;;  %10399 = vmatprep.subr.bf16.mxu1 %v11125_v13 }
 0xed6   :  { %10378 = vmatpush3.bf16.msra.mxu0 %v11126_v14  ;;  %10400 = vmatpush3.bf16.msra.mxu1 %v11127_v15 }
 0xed7   :  { %v3313_v40 = vpop.f32.mrf.mxu0  ;;  %v3356_v19 = vpop.f32.mrf.mxu1  ;;  %10379 = vmatprep.subr.bf16.mxu0 %v11128_v16  ;;  %10401 = vmatprep.subr.bf16.mxu1 %v11129_v2 }
 0xed8   :  { %v3314_v43 = vadd.f32 %v3313_v40, %v2352_v25  ;;  %v3357_v46 = vadd.f32 %v3356_v19, %v2360_v20 }
 0xed9   :  { %v3315_v26 = vpop.f32.mrf.mxu0  ;;  %v3358_v27 = vpop.f32.mrf.mxu1 }
 0xeda   :  { %10380 = vmatpush3.bf16.msra.mxu0 %v11130_v17  ;;  %10402 = vmatpush3.bf16.msra.mxu1 %v11131_v18  ;;  %v3316_v36 = vadd.f32 %v3315_v26, %v2356_v41  ;;  %v3359_v38 = vadd.f32 %v3358_v27, %v2364_v24  ;;  %v3377_v23 = vmax.f32 %v3314_v43, 0.0  ;;  %v3379_v4 = vmax.f32 %v3357_v46, 0.0 }
 0xedb   :  { %v3317_v31 = vpop.f32.mrf.mxu0  ;;  %v3360_v32 = vpop.f32.mrf.mxu1  ;;  %10381 = vmatprep.subr.bf16.mxu0 %v11132_v21  ;;  %10403 = vmatprep.subr.bf16.mxu1 %v11133_v22 }
 0xedc   :  { %v3318_v39 = vadd.f32 %v3317_v31, %v2352_v25  ;;  %v3361_v42 = vadd.f32 %v3360_v32, %v2360_v20  ;;  %v3378_v63 = vmax.f32 %v3316_v36, 0.0  ;;  %v3380_v53 = vmax.f32 %v3359_v38, 0.0 }
 0xedd   :  { %v3319_v48 = vpop.f32.mrf.mxu0  ;;  %v3362_v6 = vpop.f32.mrf.mxu1 }
 0xede   :  { %v3320_v50 = vadd.f32 %v3319_v48, %v2356_v41  ;;  %v3363_v57 = vadd.f32 %v3362_v6, %v2364_v24  ;;  %10382 = vmatpush3.bf16.msra.mxu0 %v11134_v28  ;;  %10404 = vmatpush3.bf16.msra.mxu1 %v11135_v29  ;;  %v3393_v61 = vmax.f32 %v3318_v39, 0.0  ;;  %v3395_v62 = vmax.f32 %v3361_v42, 0.0  ;;  %v9699_v41 = vld [vmem:[#allocation13] ss:$0 sm:$0xff] }
 0xedf   :  { %10383 = vmatprep.subr.bf16.mxu0 %v11136_v34  ;;  %10405 = vmatprep.subr.bf16.mxu1 %v11137_v35 }
 0xee0   :  { %v3394_v3 = vmax.f32 %v3320_v50, 0.0  ;;  %v3396_v44 = vmax.f32 %v3363_v57, 0.0  ;;  %v3409_v8 = vpack.c.bf16 %v3393_v61, %v3377_v23  ;;  %v3411_v33 = vpack.c.bf16 %v3395_v62, %v3379_v4 }
 0xee2   :  { %v3410_v5 = vpack.c.bf16 %v3394_v3, %v3378_v63  ;;  %v3412_v7 = vpack.c.bf16 %v3396_v44, %v3380_v53  ;;  %10384 = vmatpush3.bf16.msra.mxu0 %v11138_v60  ;;  %10406 = vmatpush3.bf16.msra.mxu1 %v11139_v1 }
 0xee3   :  { %10791 = vmatprep.subr.bf16.mxu1 %v11650_v0 }
 0xee4   :  { %4722 = vmatprep.mubr.bf16.mxu0 %v3410_v5  ;;  %4763 = vmatprep.mubr.bf16.mxu1 %v3412_v7 }
 0xee5   :  { %4723 = vmatmul.mubr.bf16.vlgmr.msra.gmra.mxu0 %v3409_v8  ;;  %4764 = vmatmul.mubr.bf16.vlgmr.msra.gmra.mxu1 %v3411_v33 }
 0xee6   :  { %5026 = vmatprep.mubr.bf16.mxu0 %v11652_v30  ;;  %10807 = vmatprep.mubr.msk.bf16.mxu1 %vm11651_vm0, %v11650_v0 }
 0xf45   :  { %v10253_v9 = vpop.f32.mrf.mxu0  ;;  %v10275_v10 = vpop.f32.mrf.mxu1 }
 0xf47   :  { %v10254_v37 = vpop.f32.mrf.mxu0  ;;  %v10276_v11 = vpop.f32.mrf.mxu1 }
 0xf48   :  { %v10255_v22 = vadd.f32 %v10254_v37, %v10253_v9  ;;  %v10277_v29 = vadd.f32 %v10276_v11, %v10275_v10 }
 0xf49   :  { %v10256_v12 = vpop.f32.mrf.mxu0  ;;  %v10278_v13 = vpop.f32.mrf.mxu1 }
 0xf4a   :  { %v4479_v26 = vadd.f32 %v10255_v22, %v9699_v41  ;;  %v11140_v22 = vld [vmem:[#allocation6 + $0x168] ss:$12 sps:$4 sm:$0xff]  }
 0xf4b   :  { %v10257_v14 = vpop.f32.mrf.mxu0  ;;  %v10279_v15 = vpop.f32.mrf.mxu1 }
 0xf4c   :  { %v10258_v27 = vadd.f32 %v10257_v14, %v10256_v12  ;;  %v4520_v34 = vadd.f32 %v10277_v29, %v4479_v26  ;;  %v10280_v38 = vadd.f32 %v10279_v15, %v10278_v13 }
 0xf4e   :  { %v4482_v35 = vadd.f32 %v10258_v27, %v9699_v41  ;;  %v11142_v41 = vld [vmem:[#allocation6 + $0x16c] ss:$12 sps:$4 sm:$0xff]  }
 0xf4f   :  { %4994 = vmatprep.subr.bf16.mxu0 %v11142_v41 }
 0xf50   :  { %v4523_v46 = vadd.f32 %v10280_v38, %v4482_v35  ;;  %4995 = vmatpush1.bf16.msra.mxu0 %v11140_v22  ;;  %v11150_v35 = vld [vmem:[#allocation6 + $0x13c] ss:$12 sps:$4 sm:$0xff]   ;;  %v11151_v38 = vld [vmem:[#allocation6 + $0x140] ss:$12 sps:$4 sm:$0xff]  }
 0xf65   :  { %v10297_v16 = vpop.f32.mrf.mxu0  ;;  %v10319_v2 = vpop.f32.mrf.mxu1 }
 0xf67   :  { %v10298_v17 = vpop.f32.mrf.mxu0  ;;  %v10320_v18 = vpop.f32.mrf.mxu1 }
 0xf68   :  { %v10299_v31 = vadd.f32 %v10298_v17, %v10297_v16  ;;  %v10321_v48 = vadd.f32 %v10320_v18, %v10319_v2 }
 0xf69   :  { %v10300_v40 = vpop.f32.mrf.mxu0  ;;  %v10322_v19 = vpop.f32.mrf.mxu1 }
 0xf6a   :  { %v4561_v39 = vadd.f32 %v10299_v31, %v4520_v34  ;;  %v11146_v31 = vld [vmem:[#allocation6 + $0x154] ss:$12 sps:$4 sm:$0xff]   ;;  %v11147_v34 = vld [vmem:[#allocation6 + $0x158] ss:$12 sps:$4 sm:$0xff]  }
 0xf6b   :  { %v10301_v21 = vpop.f32.mrf.mxu0  ;;  %v10323_v24 = vpop.f32.mrf.mxu1  ;;  %4996 = vmatprep.subr.bf16.mxu0 %v11146_v31 }
 0xf6c   :  { %v10302_v42 = vadd.f32 %v10301_v21, %v10300_v40  ;;  %v4602_v57 = vadd.f32 %v10321_v48, %v4561_v39  ;;  %v10324_v61 = vadd.f32 %v10323_v24, %v10322_v19  ;;  %v11143_v24 = vld [vmem:[#allocation6 + $0x170] ss:$12 sps:$4 sm:$0xff]   ;;  %v11152_v39 = vld [vmem:[#allocation6 + $0x120] ss:$12 sps:$4 sm:$0xff]   ;;  %v11156_v48 = vld [vmem:[#allocation6 + $0x108] ss:$12 sps:$4 sm:$0xff]  }
 0xf6d   :  { %10792 = vmatpush3.bf16.msra.mxu1 %v11143_v24 }
 0xf6e   :  { %v4564_v60 = vadd.f32 %v10302_v42, %v4523_v46  ;;  %10793 = vmatprep.subr.bf16.mxu1 %v11650_v0  ;;  %v11154_v42 = vld [vmem:[#allocation6 + $0x124] ss:$12 sps:$4 sm:$0xff]   ;;  %v11158_v46 = vld [vmem:[#allocation6 + $0x10c] ss:$12 sps:$4 sm:$0xff]  }
 0xf70   :  { %v4605_v44 = vadd.f32 %v10324_v61, %v4564_v60  ;;  %v11163_v60 = vld [vmem:[#allocation6 + $0xf8] ss:$12 sps:$4 sm:$0xff]  }
 0xf71   :  { %10794 = vmatpush3.bf16.msra.mxu1 %v11147_v34  ;;  %v11164_v61 = vld [vmem:[#allocation6 + $0xd8] ss:$12 sps:$4 sm:$0xff]  }
 0xf72   :  { %10795 = vmatprep.subr.bf16.mxu1 %v11650_v0 }
 0xf75   :  { %10796 = vmatpush3.bf16.msra.mxu1 %v11151_v38 }
 0xf76   :  { %10797 = vmatprep.subr.bf16.mxu1 %v11650_v0 }
 0xf85   :  { %v10341_v25 = vpop.f32.mrf.mxu0  ;;  %v10363_v20 = vpop.f32.mrf.mxu1 }
 0xf87   :  { %v10342_v28 = vpop.f32.mrf.mxu0  ;;  %v10364_v32 = vpop.f32.mrf.mxu1 }
 0xf88   :  { %v10343_v6 = vadd.f32 %v10342_v28, %v10341_v25  ;;  %v10365_v23 = vadd.f32 %v10364_v32, %v10363_v20  ;;  %v11144_v32 = vld [vmem:[#allocation6 + $0x150] ss:$12 sps:$4 sm:$0xff]  }
 0xf89   :  { %v10344_v36 = vpop.f32.mrf.mxu0  ;;  %v10366_v43 = vpop.f32.mrf.mxu1  ;;  %4997 = vmatpush1.bf16.msra.mxu0 %v11144_v32 }
 0xf8a   :  { %v4643_v62 = vadd.f32 %v10343_v6, %v4602_v57  ;;  %4998 = vmatprep.subr.bf16.mxu0 %v11150_v35  ;;  %v11159_v6 = vld [vmem:[#allocation6 + $0x110] ss:$12 sps:$4 sm:$0xff]  }
 0xf8b   :  { %v10345_v50 = vpop.f32.mrf.mxu0  ;;  %v10367_v1 = vpop.f32.mrf.mxu1  ;;  %v11160_v57 = vld [vmem:[#allocation6 + $0xf0] ss:$12 sps:$4 sm:$0xff]  }
 0xf8c   :  { %v10346_v63 = vadd.f32 %v10345_v50, %v10344_v36  ;;  %v4684_v7 = vadd.f32 %v10365_v23, %v4643_v62  ;;  %v10368_v37 = vadd.f32 %v10367_v1, %v10366_v43  ;;  %v11148_v36 = vld [vmem:[#allocation6 + $0x138] ss:$12 sps:$4 sm:$0xff]   ;;  %v11155_v43 = vld [vmem:[#allocation6 + $0x128] ss:$12 sps:$4 sm:$0xff]   ;;  %v11167_v62 = vld [vmem:[#allocation6 + $0xe0] ss:$12 sps:$4 sm:$0xff]  }
 0xf8d   :  { %4999 = vmatpush1.bf16.msra.mxu0 %v11148_v36  ;;  %10798 = vmatpush3.bf16.msra.mxu1 %v11155_v43  ;;  %v11162_v50 = vld [vmem:[#allocation6 + $0xf4] ss:$12 sps:$4 sm:$0xff]   ;;  %v11166_v1 = vld [vmem:[#allocation6 + $0xdc] ss:$12 sps:$4 sm:$0xff]  }
 0xf8e   :  { %v4646_v8 = vadd.f32 %v10346_v63, %v4605_v44  ;;  %5000 = vmatprep.subr.bf16.mxu0 %v11154_v42  ;;  %10799 = vmatprep.subr.bf16.mxu1 %v11650_v0  ;;  %v11170_v63 = vld [vmem:[#allocation6 + $0xc4] ss:$12 sps:$4 sm:$0xff]  }
 0xf90   :  { %v4687_v15 = vadd.f32 %v10368_v37, %v4646_v8 }
 0xf91   :  { %5001 = vmatpush1.bf16.msra.mxu0 %v11152_v39  ;;  %10800 = vmatpush3.bf16.msra.mxu1 %v11159_v6 }
 0xf92   :  { %5002 = vmatprep.subr.bf16.mxu0 %v11158_v46  ;;  %10801 = vmatprep.subr.bf16.mxu1 %v11650_v0 }
 0xf95   :  { %5003 = vmatpush1.bf16.msra.mxu0 %v11156_v48  ;;  %10802 = vmatpush3.bf16.msra.mxu1 %v11163_v60 }
 0xf96   :  { %5004 = vmatprep.subr.bf16.mxu0 %v11162_v50  ;;  %10803 = vmatprep.subr.bf16.mxu1 %v11650_v0 }
 0xf99   :  { %5005 = vmatpush1.bf16.msra.mxu0 %v11160_v57  ;;  %10804 = vmatpush3.bf16.msra.mxu1 %v11167_v62 }
 0xf9a   :  { %5006 = vmatprep.subr.bf16.mxu0 %v11166_v1  ;;  %10805 = vmatprep.subr.bf16.mxu1 %v11650_v0 }
 0xf9d   :  { %5007 = vmatpush1.bf16.msra.mxu0 %v11164_v61 }
 0xf9e   :  { %5008 = vmatprep.subr.bf16.mxu0 %v11170_v63 }
 0xfa5   :  { %v10385_v53 = vpop.f32.mrf.mxu0  ;;  %v10407_v3 = vpop.f32.mrf.mxu1 }
 0xfa7   :  { %v10386_v4 = vpop.f32.mrf.mxu0  ;;  %v10408_v5 = vpop.f32.mrf.mxu1 }
 0xfa8   :  { %v10387_v33 = vadd.f32 %v10386_v4, %v10385_v53  ;;  %v10409_v12 = vadd.f32 %v10408_v5, %v10407_v3  ;;  %v11168_v53 = vld [vmem:[#allocation6 + $0xc0] ss:$12 sps:$4 sm:$0xff]   ;;  %v11171_v3 = vld [vmem:[#allocation6 + $0xc8] ss:$12 sps:$4 sm:$0xff]  }
 0xfa9   :  { %v10388_v9 = vpop.f32.mrf.mxu0  ;;  %v10410_v10 = vpop.f32.mrf.mxu1  ;;  %5009 = vmatpush1.bf16.msra.mxu0 %v11168_v53  ;;  %10806 = vmatpush3.bf16.msra.mxu1 %v11171_v3 }
 0xfaa   :  { %v4725_v11 = vadd.f32 %v10387_v33, %v4684_v7  ;;  %10821 = vmatprep.subr.mxu1 %v11650_v0  ;;  %10811 = vmatprep.subr.mxu0 %v11650_v0 }
 0xfab   :  { %v10389_v13 = vpop.f32.mrf.mxu0  ;;  %v10411_v14 = vpop.f32.mrf.mxu1 }
 0xfac   :  { %v4766_v16 = vadd.f32 %v10409_v12, %v4725_v11  ;;  %v10390_v2 = vadd.f32 %v10389_v13, %v10388_v9  ;;  %v10412_v18 = vadd.f32 %v10411_v14, %v10410_v10  ;;  %v9828_v10 = vld [vmem:[#allocation15] ss:$0 sm:$0xff]  ;;  %v9829_v13 = vld [vmem:[#allocation16] ss:$0 sm:$0xff] }
 0xfae   :  { %v4728_v17 = vadd.f32 %v10390_v2, %v4687_v15  ;;  %v4772_v40 = vadd.f32 %v4766_v16, %v12059_v58 }
 0xfb0   :  { %v4769_v19 = vadd.f32 %v10412_v18, %v4728_v17  ;;  %4776 = vadd.xlane.f32.xlu0 %v4772_v40  ;;  %v4849_v17 = vld [vmem:[#allocation7 + $0x3] sm:$0x7] }
 0xfb1   :  { %v4854_v18 = vrot.slane %v4849_v17, %v11849_v49 }
 0xfb2   :  { %v4773_v21 = vadd.f32 %v4769_v19, %v12061_v59  ;;  %v4858_v19 = vrot.slane %v4849_v17, %v11845_v47 }
 0xfb4   :  { %4778 = vadd.xlane.f32.xlu0 %v4773_v21 }
0x1039   :  { %v4777_v25 = vpop.xlane.xlu0 %4776 }
0x103a   :  { %v4780_v20 = vmul.f32 0.0078125, %v4777_v25 }
0x103c   :  { %v12145_v26 = vsub.f32 %v4772_v40, %v4780_v20  ;;  %v4862_v40 = vrot.slane %v4849_v17, %v11842_v45 }
0x103d   :  { %v4779_v27 = vpop.xlane.xlu0 %4778 }
0x103e   :  { %v4781_v28 = vmul.f32 0.0078125, %v4779_v27  ;;  %v4784_v58 = vmul.f32 %v12145_v26, %v12145_v26 }
0x1040   :  { %v12149_v29 = vsub.f32 %v4773_v21, %v4781_v28  ;;  %4786 = vadd.xlane.f32.xlu0 %v4784_v58 }
0x1042   :  { %v4785_v59 = vmul.f32 %v12149_v29, %v12149_v29 }
0x1044   :  { %4788 = vadd.xlane.f32.xlu1 %v4785_v59 }
0x10c9   :  { %v4787_v44 = vpop.xlane.xlu0 %4786 }
0x10ca   :  { %v4790_v23 = vmul.f32 0.0078125, %v4787_v44 }
0x10cc   :  { %v4792_v4 = vadd.f32 1e-05, %v4790_v23 }
0x10cd   :  { %v4789_v5 = vpop.xlane.xlu1 %4788 }
0x10ce   :  { %11352 = vrsqrt.f32 %v4792_v4  ;;  %v4791_v7 = vmul.f32 0.0078125, %v4789_v5 }
0x10d0   :  { %v4793_v8 = vadd.f32 1e-05, %v4791_v7 }
0x10d2   :  { %11354 = vrsqrt.f32 %v4793_v8 }
0x10db   :  { %v11353_v33 = vpop.eup %11352 }
0x10dc   :  { %v4796_v9 = vmul.f32 %v11353_v33, %v12145_v26 }
0x10de   :  { %v4804_v12 = vmul.f32 %v9828_v10, %v4796_v9 }
0x10df   :  { %v11355_v37 = vpop.eup %11354 }
0x10e0   :  { %v4797_v11 = vmul.f32 %v11355_v37, %v12149_v29  ;;  %v12163_v15 = vadd.f32 %v9829_v13, %v4804_v12 }
0x10e2   :  { %v4805_v14 = vmul.f32 %v9828_v10, %v4797_v11 }
0x10e4   :  { %v12165_v16 = vadd.f32 %v9829_v13, %v4805_v14 }
0x10e6   :  { %v4814_v2 = vpack.c.bf16 %v12165_v16, %v12163_v15 }
0x10e8   :  { %5027 = vmatmul.mubr.bf16.vlgmr.msra.gmra.mxu0 %v4814_v2  ;;  %10808 = vmatmul.mubr.bf16.vlgmr.msra.gmra.mxu1 %v4814_v2 }
0x10e9   :  { %10813 = vmatprep.mubr.msk.f32.mxu0 %vm11651_vm0, %v11650_v0  ;;  %10823 = vmatprep.mubr.msk.f32.mxu1 %vm11651_vm0, %v11650_v0 }
0x11a8   :  { %v5028_v21 = vpop.f32.mrf.mxu0  ;;  %v5071_v22 = vpop.f32.mrf.mxu1 }
0x11a9   :  { %v12176_v41 = vadd.f32 %v5028_v21, %v4854_v18  ;;  %v12178_v24 = vadd.f32 %v5071_v22, %v4862_v40  ;;  %v11173_v22 = vld [vmem:[%s12491_s6 + $0x40] sm:$0xff]  }
0x11aa   :  { %v5030_v25 = vpop.f32.mrf.mxu0  ;;  %v10809_v20 = vpop.f32.mrf.mxu1 }
0x11ab   :  { %v12180_v26 = vadd.f32 %v5030_v25, %v4858_v19  ;;  %10822 = vmatpush3.msra.mxu1 %v12178_v24  ;;  %5485 = vrot.lane.b32.xlu1 %v12176_v41, %s11653_s3 }
0x11ac   :  { %v5032_v27 = vpop.f32.mrf.mxu0  ;;  %v5074_v28 = vpop.f32.mrf.mxu1  ;;  %10831 = vmatprep.subr.bf16.mxu1 %v11650_v0 }
0x11ad   :  { %10812 = vmatpush3.xpose.msk.msra.mxu0 %vm233_vm1, %v12180_v26  ;;  %v12197_v31 = vadd.f32 %v5032_v27, %v4854_v18  ;;  %v12200_v32 = vadd.f32 %v5074_v28, %v4862_v40  ;;  %v11172_v40 = vld [vmem:[%s12491_s6 + $0x48] sm:$0xff]  }
0x11ae   :  { %v5034_v58 = vpop.f32.mrf.mxu0  ;;  %v10810_v29 = vpop.f32.mrf.mxu1  ;;  %10816 = vmatprep.subr.mxu0 %v11650_v0 }
0x11af   :  { %v12189_v59 = vadd.f32 %v5034_v58, %v4858_v19 }
0x11b0   :  { %10814 = vmatmul.mubr.msk.f32.vlgmr.msra.gmra.mxu0 %vm233_vm1, %v12176_v41 }
0x11b1   :  { %10817 = vmatpush3.xpose.msk.msra.mxu0 %vm233_vm1, %v12189_v59  ;;  %10818 = vmatprep.mubr.msk.f32.mxu0 %vm11651_vm0, %v11650_v0 }
0x11b2   :  { %10826 = vmatprep.subr.mxu0 %v11650_v0 }
0x11b4   :  { %10819 = vmatmul.mubr.msk.f32.vlgmr.msra.gmra.mxu0 %vm233_vm1, %v12197_v31 }
0x11b5   :  { %10827 = vmatpush3.msra.mxu0 %v12200_v32  ;;  %10828 = vmatprep.mubr.msk.f32.mxu0 %vm11651_vm0, %v11650_v0 }
0x11b6   :  { %10839 = vmatprep.subr.mxu0 %v11650_v0 }
0x121d   :  { %v5486_v1 = vpop.permute.xlu1 %5485 }
0x1270   :  { %v5176_v34 = vpop.f32.mrf.mxu0 }
0x1271   :  { %v5256_v57 = vmul.f32 0.17677669, %v5176_v34 }
0x1272   :  { %v10815_v35 = vpop.f32.mrf.mxu0 }
0x1273   :  { %v5258_v60 = vsel %vm722_vm2, %v5256_v57, -inf }
0x1274   :  { %v5252_v36 = vpop.f32.mrf.mxu0 }
0x1275   :  { %v5257_v38 = vmul.f32 0.17677669, %v5252_v36 }
0x1276   :  { %v10820_v39 = vpop.f32.mrf.mxu0 }
0x1277   :  { %v5261_v42 = vsel %vm722_vm2, %v5257_v38, -inf }
0x1278   :  { %5262 = vmax.xlane.f32.xlu0 %v5261_v42 }
0x128e   :  { %5487 = vrot.lane.b32.xlu0 %v12180_v26, %s11653_s3 }
0x1292   :  { %5563 = vrot.lane.b32.xlu0 %v12197_v31, %s11653_s3 }
0x1301   :  { %v5263_v43 = vpop.xlane.xlu0 %5262 }
0x1302   :  { %v5265_v46 = vsub.f32 %v5257_v38, %v5263_v43 }
0x1304   :  { %v5268_v48 = vmul.f32 1.442695, %v5265_v46 }
0x1305   :  { %v5488_v53 = vpop.permute.xlu0 %5487 }
0x1306   :  { %11356 = vpow2.f32 %v5268_v48 }
0x1309   :  { %v5564_v44 = vpop.permute.xlu0 %5563 }
0x1313   :  { %v11357_v6 = vpop.eup %11356 }
0x1314   :  { %v5273_v50 = vsel %vm722_vm2, %v11357_v6, 0.0 }
0x1315   :  { %5274 = vadd.xlane.f32.xlu1 %v5273_v50 }
0x1326   :  { %5565 = vrot.lane.b32.xlu1 %v12189_v59, %s11653_s3 }
0x134a   :  { %5259 = vmax.xlane.f32.xlu1 %v5258_v60 }
0x135b   :  { %5880 = vrot.lane.b32.xlu1 %v12180_v26, %s11629_s30 }
0x135f   :  { %5878 = vrot.lane.b32.xlu1 %v12176_v41, %s11629_s30 }
0x139e   :  { %v5275_v61 = vpop.xlane.xlu1 %5274 }
0x139f   :  { %11358 = vrcp.f32 %v5275_v61 }
0x13a2   :  { %v5566_v3 = vpop.permute.xlu1 %5565 }
0x13ac   :  { %v11359_v62 = vpop.eup %11358 }
0x13ad   :  { %v5279_v63 = vmul.f32 %v11359_v62, %v11357_v6 }
0x13af   :  { %10829 = vmatmul.mubr.msk.f32.vlgmr.msra.gmra.mxu0 %vm722_vm2, %v5279_v63 }
0x13b0   :  { %10840 = vmatpush3.xpose.msk.msra.mxu0 %vm233_vm1, %v5488_v53  ;;  %10841 = vmatprep.mubr.msk.f32.mxu0 %vm11651_vm0, %v11650_v0 }
0x13b1   :  { %10844 = vmatprep.subr.mxu0 %v11650_v0 }
0x13b3   :  { %10842 = vmatmul.mubr.msk.f32.vlgmr.msra.gmra.mxu0 %vm233_vm1, %v5486_v1 }
0x13b4   :  { %10845 = vmatpush3.xpose.msk.msra.mxu0 %vm233_vm1, %v5566_v3  ;;  %10846 = vmatprep.mubr.msk.f32.mxu0 %vm11651_vm0, %v11650_v0 }
0x13b5   :  { %10849 = vmatprep.subr.mxu0 %v11650_v0 }
0x13b7   :  { %10847 = vmatmul.mubr.msk.f32.vlgmr.msra.gmra.mxu0 %vm233_vm1, %v5564_v44 }
0x13b8   :  { %10851 = vmatprep.mubr.msk.f32.mxu0 %vm11651_vm0, %v11650_v0 }
0x13d3   :  { %v5260_v23 = vpop.xlane.xlu1 %5259 }
0x13d4   :  { %v5264_v4 = vsub.f32 %v5256_v57, %v5260_v23  ;;  %v11174_v23 = vld [vmem:[%s12491_s6 + $0x58] sm:$0xff]  }
0x13d6   :  { %v5266_v5 = vmul.f32 1.442695, %v5264_v4  ;;  %v11175_v4 = vld [vmem:[%s12491_s6 + $0x50] sm:$0xff]  }
0x13d7   :  { %v5881_v46 = vpop.permute.xlu1 %5880 }
0x13d8   :  { %11360 = vpow2.f32 %v5266_v5 }
0x13db   :  { %v5879_v48 = vpop.permute.xlu1 %5878 }
0x13e5   :  { %v11361_v7 = vpop.eup %11360 }
0x13e6   :  { %v5270_v8 = vsel %vm722_vm2, %v11361_v7, 0.0 }
0x13e7   :  { %5271 = vadd.xlane.f32.xlu0 %v5270_v8 }
0x146f   :  { %v5422_v33 = vpop.f32.mrf.mxu0 }
0x1470   :  { %v5272_v9 = vpop.xlane.xlu0 %5271 }
0x1471   :  { %11362 = vrcp.f32 %v5272_v9  ;;  %v10830_v10 = vpop.f32.mrf.mxu0 }
0x1473   :  { %v5559_v37 = vpop.f32.mrf.mxu0 }
0x1474   :  { %v5641_v19 = vmul.f32 0.17677669, %v5559_v37 }
0x1475   :  { %v10843_v11 = vpop.f32.mrf.mxu0 }
0x1476   :  { %v5643_v21 = vsel %vm722_vm2, %v5641_v19, -inf }
0x1477   :  { %v5637_v12 = vpop.f32.mrf.mxu0 }
0x1478   :  { %v5642_v13 = vmul.f32 0.17677669, %v5637_v12 }
0x1479   :  { %v10848_v14 = vpop.f32.mrf.mxu0 }
0x147a   :  { %v5646_v2 = vsel %vm722_vm2, %v5642_v13, -inf }
0x147b   :  { %5647 = vmax.xlane.f32.xlu0 %v5646_v2 }
0x147e   :  { %v11363_v17 = vpop.eup %11362 }
0x147f   :  { %v5277_v18 = vmul.f32 %v11363_v17, %v11361_v7 }
0x1481   :  { %10824 = vmatmul.mubr.msk.f32.vlgmr.msra.gmra.mxu1 %vm722_vm2, %v5277_v18 }
0x1482   :  { %10835 = vmatprep.mubr.msk.bf16.mxu1 %vm11651_vm0, %v11650_v0  ;;  %10832 = vmatpush3.bf16.msra.mxu1 %v11172_v40 }
0x1483   :  { %10833 = vmatprep.subr.bf16.mxu1 %v11650_v0 }
0x1486   :  { %10834 = vmatpush3.bf16.msra.mxu1 %v11173_v22 }
0x1487   :  { %10854 = vmatprep.subr.mxu1 %v11650_v0 }
0x1491   :  { %5743 = vrot.lane.b32.xlu0 %v12200_v32, %s11653_s3 }
0x1495   :  { %5958 = vrot.lane.b32.xlu0 %v12189_v59, %s11629_s30 }
0x14b4   :  { %5644 = vmax.xlane.f32.xlu0 %v5643_v21 }
0x14ca   :  { %5666 = vrot.lane.b32.xlu0 %v12178_v24, %s11653_s3 }
0x14ce   :  { %6271 = vrot.lane.b32.xlu0 %v12180_v26, %s11654_s29 }
0x14d2   :  { %6269 = vrot.lane.b32.xlu0 %v12176_v41, %s11654_s29 }
0x14d6   :  { %6349 = vrot.lane.b32.xlu0 %v12189_v59, %s11654_s29 }
0x1504   :  { %v5648_v25 = vpop.xlane.xlu0 %5647 }
0x1505   :  { %v5650_v20 = vsub.f32 %v5642_v13, %v5648_v25 }
0x1507   :  { %v5653_v27 = vmul.f32 1.442695, %v5650_v20 }
0x1508   :  { %v5744_v29 = vpop.permute.xlu0 %5743 }
0x1509   :  { %11364 = vpow2.f32 %v5653_v27 }
0x150c   :  { %v5959_v34 = vpop.permute.xlu0 %5958 }
0x1516   :  { %v11365_v28 = vpop.eup %11364 }
0x1517   :  { %v5658_v58 = vsel %vm722_vm2, %v11365_v28, 0.0 }
0x1518   :  { %5659 = vadd.xlane.f32.xlu1 %v5658_v58 }
0x1529   :  { %5956 = vrot.lane.b32.xlu1 %v12197_v31, %s11629_s30 }
0x153d   :  { %v5645_v26 = vpop.xlane.xlu0 %5644 }
0x153e   :  { %v5649_v35 = vsub.f32 %v5641_v19, %v5645_v26 }
0x1540   :  { %v5651_v36 = vmul.f32 1.442695, %v5649_v35 }
0x1541   :  { %v5349_v41 = vpop.f32.mrf.mxu1  ;;  %v5667_v38 = vpop.permute.xlu0 %5666 }
0x1542   :  { %11366 = vpow2.f32 %v5651_v36  ;;  %v5426_v59 = vpack.c.bf16 %v5422_v33, %v5349_v41  ;;  %10850 = vmatpush3.msra.mxu0 %v5667_v38  ;;  %v9871_v36 = vld [vmem:[%s12492_s7 + $0x1] ss:$0 sm:$0xff] }
0x1543   :  { %v10825_v39 = vpop.f32.mrf.mxu1  ;;  %10859 = vmatprep.subr.bf16.mxu0 %v11650_v0 }
0x1544   :  { %10836 = vmatmul.mubr.msk.bf16.vlgmr.msra.gmra.mxu1 %vm233_vm1, %v5426_v59 }
0x1545   :  { %10855 = vmatpush3.msra.mxu1 %v5744_v29  ;;  %10856 = vmatprep.mubr.msk.f32.mxu1 %vm11651_vm0, %v11650_v0  ;;  %v6272_v18 = vpop.permute.xlu0 %6271 }
0x1546   :  { %10867 = vmatprep.subr.mxu1 %v11650_v0 }
0x1549   :  { %v6270_v40 = vpop.permute.xlu0 %6269 }
0x154d   :  { %v6350_v19 = vpop.permute.xlu0 %6349 }
0x154f   :  { %v11367_v42 = vpop.eup %11366 }
0x1550   :  { %v5655_v43 = vsel %vm722_vm2, %v11367_v42, 0.0 }
0x1551   :  { %5656 = vadd.xlane.f32.xlu1 %v5655_v43 }
0x15a1   :  { %v5660_v6 = vpop.xlane.xlu1 %5659 }
0x15a2   :  { %11368 = vrcp.f32 %v5660_v6 }
0x15a5   :  { %v5957_v60 = vpop.permute.xlu1 %5956 }
0x15af   :  { %v11369_v50 = vpop.eup %11368 }
0x15b0   :  { %v5664_v57 = vmul.f32 %v11369_v50, %v11365_v28 }
0x15b2   :  { %10857 = vmatmul.mubr.msk.f32.vlgmr.msra.gmra.mxu1 %vm722_vm2, %v5664_v57 }
0x15b3   :  { %10868 = vmatpush3.xpose.msk.msra.mxu1 %vm233_vm1, %v5881_v46  ;;  %10869 = vmatprep.mubr.msk.f32.mxu1 %vm11651_vm0, %v11650_v0 }
0x15b4   :  { %10872 = vmatprep.subr.mxu1 %v11650_v0 }
0x15b6   :  { %10870 = vmatmul.mubr.msk.f32.vlgmr.msra.gmra.mxu1 %vm233_vm1, %v5879_v48 }
0x15b7   :  { %10873 = vmatpush3.xpose.msk.msra.mxu1 %vm233_vm1, %v5959_v34  ;;  %10874 = vmatprep.mubr.msk.f32.mxu1 %vm11651_vm0, %v11650_v0 }
0x15b8   :  { %10877 = vmatprep.subr.mxu1 %v11650_v0 }
0x15ba   :  { %10875 = vmatmul.mubr.msk.f32.vlgmr.msra.gmra.mxu1 %vm233_vm1, %v5957_v60 }
0x15bb   :  { %10879 = vmatprep.mubr.msk.f32.mxu1 %vm11651_vm0, %v11650_v0 }
0x15da   :  { %v5657_v1 = vpop.xlane.xlu1 %5656 }
0x15db   :  { %11370 = vrcp.f32 %v5657_v1 }
0x15e8   :  { %v11371_v61 = vpop.eup %11370 }
0x15e9   :  { %v5662_v62 = vmul.f32 %v11371_v61, %v11367_v42 }
0x15eb   :  { %10852 = vmatmul.mubr.msk.f32.vlgmr.msra.gmra.mxu0 %vm722_vm2, %v5662_v62 }
0x15ec   :  { %10863 = vmatprep.mubr.msk.bf16.mxu0 %vm11651_vm0, %v11650_v0  ;;  %10860 = vmatpush3.bf16.msra.mxu0 %v11174_v23 }
0x15ed   :  { %10861 = vmatprep.subr.bf16.mxu0 %v11650_v0 }
0x15f0   :  { %10862 = vmatpush3.bf16.msra.mxu0 %v11175_v4 }
0x15f1   :  { %10882 = vmatprep.subr.mxu0 %v11650_v0 }
0x1604   :  { %v5476_v63 = vpop.f32.mrf.mxu1 }
0x1605   :  { %v5483_v41 = vadd.f32 %v9871_v36, %v5476_v63  ;;  %v11176_v63 = vld [vmem:[%s12491_s6 + $0x68] sm:$0xff]  }
0x1606   :  { %v10837_v53 = vpop.f32.mrf.mxu1 }
0x1607   :  { %v11177_v53 = vld [vmem:[%s12491_s6 + $0x60] sm:$0xff]  }
0x1608   :  { %v5479_v3 = vpop.f32.mrf.mxu1 }
0x1609   :  { %v5484_v42 = vadd.f32 %v9871_v36, %v5479_v3 }
0x160a   :  { %v10838_v44 = vpop.f32.mrf.mxu1 }
0x1672   :  { %v5815_v5 = vpop.f32.mrf.mxu1 }
0x1674   :  { %v10858_v7 = vpop.f32.mrf.mxu1 }
0x1676   :  { %v5952_v8 = vpop.f32.mrf.mxu1 }
0x1677   :  { %v6034_v33 = vmul.f32 0.17677669, %v5952_v8 }
0x1678   :  { %v10871_v9 = vpop.f32.mrf.mxu1 }
0x1679   :  { %v6036_v10 = vsel %vm722_vm2, %v6034_v33, -inf }
0x167a   :  { %6037 = vmax.xlane.f32.xlu0 %v6036_v10  ;;  %v6030_v37 = vpop.f32.mrf.mxu1 }
0x167b   :  { %v6035_v11 = vmul.f32 0.17677669, %v6030_v37 }
0x167c   :  { %v10876_v12 = vpop.f32.mrf.mxu1 }
0x167d   :  { %v6039_v13 = vsel %vm722_vm2, %v6035_v11, -inf }
0x167e   :  { %6040 = vmax.xlane.f32.xlu1 %v6039_v13 }
0x168f   :  { %6134 = vrot.lane.b32.xlu1 %v12200_v32, %s11629_s30 }
0x1690   :  { %6058 = vrot.lane.b32.xlu0 %v12178_v24, %s11629_s30 }
0x1694   :  { %6449 = vrot.lane.b32.xlu0 %v12178_v24, %s11654_s29 }
0x16ab   :  { %v5738_v14 = vpop.f32.mrf.mxu0 }
0x16ac   :  { %v5819_v2 = vpack.c.bf16 %v5815_v5, %v5738_v14 }
0x16ad   :  { %v10853_v17 = vpop.f32.mrf.mxu0 }
0x16ae   :  { %10864 = vmatmul.mubr.msk.bf16.vlgmr.msra.gmra.mxu0 %vm233_vm1, %v5819_v2 }
0x16af   :  { %10884 = vmatprep.mubr.msk.f32.mxu0 %vm11651_vm0, %v11650_v0 }
0x1703   :  { %v6038_v21 = vpop.xlane.xlu0 %6037 }
0x1704   :  { %v6042_v29 = vsub.f32 %v6034_v33, %v6038_v21 }
0x1706   :  { %v6044_v34 = vmul.f32 1.442695, %v6042_v29 }
0x1707   :  { %v6041_v22 = vpop.xlane.xlu1 %6040  ;;  %v6059_v25 = vpop.permute.xlu0 %6058 }
0x1708   :  { %v6043_v20 = vsub.f32 %v6035_v11, %v6041_v22  ;;  %10878 = vmatpush3.msra.mxu1 %v6059_v25 }
0x1709   :  { %10887 = vmatprep.subr.bf16.mxu1 %v11650_v0 }
0x170a   :  { %v6046_v27 = vmul.f32 1.442695, %v6043_v20 }
0x170b   :  { %v6135_v24 = vpop.permute.xlu1 %6134  ;;  %v6450_v60 = vpop.permute.xlu0 %6449 }
0x170c   :  { %11372 = vpow2.f32 %v6046_v27  ;;  %10883 = vmatpush3.msra.mxu0 %v6135_v24 }
0x170d   :  { %10895 = vmatprep.subr.mxu0 %v11650_v0  ;;  %11374 = vpow2.f32 %v6044_v34 }
0x1719   :  { %v11373_v28 = vpop.eup %11372 }
0x171a   :  { %v6051_v58 = vsel %vm722_vm2, %v11373_v28, 0.0  ;;  %v11375_v26 = vpop.eup %11374 }
0x171b   :  { %6052 = vadd.xlane.f32.xlu1 %v6051_v58  ;;  %v6048_v35 = vsel %vm722_vm2, %v11375_v26, 0.0 }
0x172c   :  { %6347 = vrot.lane.b32.xlu1 %v12197_v31, %s11654_s29 }
0x1750   :  { %6049 = vadd.xlane.f32.xlu1 %v6048_v35 }
0x176e   :  { %v5869_v38 = vpop.f32.mrf.mxu0 }
0x176f   :  { %v12313_v59 = vadd.f32 %v5869_v38, %v5483_v41 }
0x1770   :  { %v10865_v39 = vpop.f32.mrf.mxu0 }
0x1771   :  { %v11179_v39 = vld [vmem:[%s12491_s6 + $0x70] sm:$0xff]  }
0x1772   :  { %v5872_v43 = vpop.f32.mrf.mxu0 }
0x1773   :  { %v12315_v46 = vadd.f32 %v5872_v43, %v5484_v42 }
0x1774   :  { %v10866_v31 = vpop.f32.mrf.mxu0 }
0x17a4   :  { %v6053_v48 = vpop.xlane.xlu1 %6052 }
0x17a5   :  { %11376 = vrcp.f32 %v6053_v48 }
0x17a8   :  { %v6348_v57 = vpop.permute.xlu1 %6347 }
0x17b2   :  { %v11377_v6 = vpop.eup %11376 }
0x17b3   :  { %v6057_v50 = vmul.f32 %v11377_v6, %v11373_v28 }
0x17b5   :  { %10885 = vmatmul.mubr.msk.f32.vlgmr.msra.gmra.mxu0 %vm722_vm2, %v6057_v50 }
0x17b6   :  { %10896 = vmatpush3.xpose.msk.msra.mxu0 %vm233_vm1, %v6272_v18  ;;  %10897 = vmatprep.mubr.msk.f32.mxu0 %vm11651_vm0, %v11650_v0 }
0x17b7   :  { %10900 = vmatprep.subr.mxu0 %v11650_v0 }
0x17b9   :  { %10898 = vmatmul.mubr.msk.f32.vlgmr.msra.gmra.mxu0 %vm233_vm1, %v6270_v40 }
0x17ba   :  { %10901 = vmatpush3.xpose.msk.msra.mxu0 %vm233_vm1, %v6350_v19  ;;  %10902 = vmatprep.mubr.msk.f32.mxu0 %vm11651_vm0, %v11650_v0 }
0x17bb   :  { %10905 = vmatprep.subr.mxu0 %v11650_v0 }
0x17bd   :  { %10903 = vmatmul.mubr.msk.f32.vlgmr.msra.gmra.mxu0 %vm233_vm1, %v6348_v57 }
0x17be   :  { %10906 = vmatpush3.msra.mxu0 %v6450_v60  ;;  %10907 = vmatprep.mubr.msk.f32.mxu0 %vm11651_vm0, %v11650_v0 }
0x17bf   :  { %10915 = vmatprep.subr.bf16.mxu0 %v11650_v0 }
0x17d9   :  { %v6050_v1 = vpop.xlane.xlu1 %6049 }
0x17da   :  { %11378 = vrcp.f32 %v6050_v1 }
0x17e7   :  { %v11379_v61 = vpop.eup %11378 }
0x17e8   :  { %v6055_v62 = vmul.f32 %v11379_v61, %v11375_v26 }
0x17ea   :  { %10880 = vmatmul.mubr.msk.f32.vlgmr.msra.gmra.mxu1 %vm722_vm2, %v6055_v62 }
0x17eb   :  { %10891 = vmatprep.mubr.msk.bf16.mxu1 %vm11651_vm0, %v11650_v0  ;;  %10888 = vmatpush3.bf16.msra.mxu1 %v11176_v63 }
0x17ec   :  { %10889 = vmatprep.subr.bf16.mxu1 %v11650_v0 }
0x17ef   :  { %10890 = vmatpush3.bf16.msra.mxu1 %v11177_v53  ;;  %v6818_v53 = vld [vmem:[#allocation10 + $0x780] sm:$0xff] }
0x17f0   :  { %10910 = vmatprep.subr.mxu1 %v11650_v0 }
0x1875   :  { %v6206_v3 = vpop.f32.mrf.mxu0 }
0x1877   :  { %v10886_v44 = vpop.f32.mrf.mxu0 }
0x1878   :  { %v6819_v44 = vld [vmem:[#allocation10 + $0x788] sm:$0xff] }
0x1879   :  { %v6343_v23 = vpop.f32.mrf.mxu0 }
0x187a   :  { %v6425_v4 = vmul.f32 0.17677669, %v6343_v23 }
0x187b   :  { %v10899_v5 = vpop.f32.mrf.mxu0 }
0x187c   :  { %v6427_v7 = vsel %vm722_vm2, %v6425_v4, -inf  ;;  %v6827_v5 = vld [vmem:[#allocation10 + $0x7c8] sm:$0xff] }
0x187d   :  { %6428 = vmax.xlane.f32.xlu1 %v6427_v7  ;;  %v6421_v8 = vpop.f32.mrf.mxu0  ;;  %v10027_v7 = vcombine.low %v6819_v44, %v6827_v5 }
0x187e   :  { %v6426_v33 = vmul.f32 0.17677669, %v6421_v8  ;;  %v10028_v8 = vcombine.high %v6819_v44, %v6827_v5  ;;  %v6722_v44 = vld [vmem:[#allocation10 + $0x480] sm:$0xff] }
0x187f   :  { %v10904_v9 = vpop.f32.mrf.mxu0 }
0x1880   :  { %v6430_v10 = vsel %vm722_vm2, %v6426_v33, -inf }
0x1881   :  { %6431 = vmax.xlane.f32.xlu1 %v6430_v10 }
0x18aa   :  { %v6130_v37 = vpop.f32.mrf.mxu1 }
0x18ab   :  { %v6210_v11 = vpack.c.bf16 %v6206_v3, %v6130_v37  ;;  %v6826_v3 = vld [vmem:[#allocation10 + $0x7c0] sm:$0xff] }
0x18ac   :  { %v10881_v12 = vpop.f32.mrf.mxu1  ;;  %v10025_v23 = vcombine.low %v6818_v53, %v6826_v3 }
0x18ad   :  { %10892 = vmatmul.mubr.msk.bf16.vlgmr.msra.gmra.mxu1 %vm233_vm1, %v6210_v11 }
0x18ae   :  { %10912 = vmatprep.mubr.msk.f32.mxu1 %vm11651_vm0, %v11650_v0 }
0x1906   :  { %v6429_v13 = vpop.xlane.xlu1 %6428 }
0x1907   :  { %v6433_v14 = vsub.f32 %v6425_v4, %v6429_v13  ;;  %v10026_v4 = vcombine.high %v6818_v53, %v6826_v3  ;;  %v6802_v13 = vld [vmem:[#allocation10 + $0x700] sm:$0xff] }
0x1909   :  { %v6435_v2 = vmul.f32 1.442695, %v6433_v14  ;;  %v6810_v14 = vld [vmem:[#allocation10 + $0x740] sm:$0xff] }
0x190a   :  { %v6432_v17 = vpop.xlane.xlu1 %6431 }
0x190b   :  { %11380 = vpow2.f32 %v6435_v2  ;;  %v6434_v18 = vsub.f32 %v6426_v33, %v6432_v17  ;;  %v6803_v2 = vld [vmem:[#allocation10 + $0x708] sm:$0xff]  ;;  %v10010_v17 = vcombine.high %v6802_v13, %v6810_v14 }
0x190d   :  { %v6437_v40 = vmul.f32 1.442695, %v6434_v18  ;;  %v6811_v18 = vld [vmem:[#allocation10 + $0x748] sm:$0xff] }
0x190f   :  { %11382 = vpow2.f32 %v6437_v40  ;;  %v10009_v40 = vcombine.low %v6802_v13, %v6810_v14  ;;  %v6715_v13 = vld [vmem:[#allocation10 + $0x448] sm:$0xff] }
0x1918   :  { %v11381_v19 = vpop.eup %11380 }
0x1919   :  { %v6439_v21 = vsel %vm722_vm2, %v11381_v19, 0.0 }
0x191a   :  { %6440 = vadd.xlane.f32.xlu1 %v6439_v21  ;;  %v10012_v21 = vcombine.high %v6803_v2, %v6811_v18 }
0x191c   :  { %v11383_v22 = vpop.eup %11382 }
0x191d   :  { %v6442_v25 = vsel %vm722_vm2, %v11383_v22, 0.0 }
0x191e   :  { %6443 = vadd.xlane.f32.xlu1 %v6442_v25  ;;  %v6794_v25 = vld [vmem:[#allocation10 + $0x6c0] sm:$0xff] }
0x192f   :  { %6525 = vrot.lane.b32.xlu1 %v12200_v32, %s11654_s29 }
0x196d   :  { %v6260_v20 = vpop.f32.mrf.mxu1 }
0x196e   :  { %v6267_v27 = vadd.f32 %v6260_v20, %v12313_v59  ;;  %v11178_v59 = vld [vmem:[%s12491_s6 + $0x78] sm:$0xff]   ;;  %v6787_v20 = vld [vmem:[#allocation10 + $0x688] sm:$0xff] }
0x196f   :  { %v10893_v24 = vpop.f32.mrf.mxu1 }
0x1970   :  { %v6795_v24 = vld [vmem:[#allocation10 + $0x6c8] sm:$0xff] }
0x1971   :  { %v6263_v28 = vpop.f32.mrf.mxu1 }
0x1972   :  { %v6268_v58 = vadd.f32 %v6263_v28, %v12315_v46 }
0x1973   :  { %v10894_v29 = vpop.f32.mrf.mxu1 }
0x1974   :  { %v9996_v29 = vcombine.high %v6787_v20, %v6795_v24 }
0x19a3   :  { %v6441_v34 = vpop.xlane.xlu1 %6440 }
0x19a4   :  { %11384 = vrcp.f32 %v6441_v34  ;;  %v6770_v34 = vld [vmem:[#allocation10 + $0x600] sm:$0xff] }
0x19a7   :  { %v6444_v26 = vpop.xlane.xlu1 %6443 }
0x19a8   :  { %11386 = vrcp.f32 %v6444_v26  ;;  %v6778_v26 = vld [vmem:[#allocation10 + $0x640] sm:$0xff] }
0x19ab   :  { %v6526_v35 = vpop.permute.xlu1 %6525 }
0x19ac   :  { %10911 = vmatpush3.msra.mxu1 %v6526_v35  ;;  %v6771_v35 = vld [vmem:[#allocation10 + $0x608] sm:$0xff] }
0x19ad   :  { %7559 = vmatprep.subr.bf16.mxu1 %v10026_v4  ;;  %v6723_v4 = vld [vmem:[#allocation10 + $0x488] sm:$0xff] }
0x19b1   :  { %v11385_v36 = vpop.eup %11384 }
0x19b2   :  { %v6446_v41 = vmul.f32 %v11385_v36, %v11381_v19  ;;  %v10011_v19 = vcombine.low %v6803_v2, %v6811_v18  ;;  %v9978_v36 = vcombine.high %v6770_v34, %v6778_v26  ;;  %v6820_v18 = vld [vmem:[#allocation10 + $0x790] sm:$0xff] }
0x19b4   :  { %10908 = vmatmul.mubr.msk.f32.vlgmr.msra.gmra.mxu0 %vm722_vm2, %v6446_v41  ;;  %v6779_v41 = vld [vmem:[#allocation10 + $0x648] sm:$0xff] }
0x19b5   :  { %v11387_v38 = vpop.eup %11386  ;;  %10919 = vmatprep.mubr.msk.bf16.mxu0 %vm11651_vm0, %v11650_v0  ;;  %10916 = vmatpush3.bf16.msra.mxu0 %v11178_v59  ;;  %v9980_v59 = vcombine.high %v6771_v35, %v6779_v41 }
0x19b6   :  { %v6448_v32 = vmul.f32 %v11387_v38, %v11383_v22  ;;  %10917 = vmatprep.subr.bf16.mxu0 %v11650_v0  ;;  %v6786_v22 = vld [vmem:[#allocation10 + $0x680] sm:$0xff]  ;;  %v9977_v38 = vcombine.low %v6770_v34, %v6778_v26 }
0x19b7   :  { %v9993_v28 = vcombine.low %v6786_v22, %v6794_v25 }
0x19b8   :  { %10913 = vmatmul.mubr.msk.f32.vlgmr.msra.gmra.mxu1 %vm722_vm2, %v6448_v32  ;;  %v9979_v32 = vcombine.low %v6771_v35, %v6779_v41  ;;  %v9909_v41 = vld [vmem:[%s12493_s8 + $0x1] ss:$0 sm:$0xff] }
0x19b9   :  { %7591 = vmatprep.mubr.bf16.mxu1 %v11652_v30  ;;  %10918 = vmatpush3.bf16.msra.mxu0 %v11179_v39  ;;  %v6754_v39 = vld [vmem:[#allocation10 + $0x580] sm:$0xff] }
0x19ba   :  { %7602 = vmatprep.subr.bf16.mxu0 %v10028_v8  ;;  %7560 = vmatpush1.bf16.msra.mxu1 %v10025_v23  ;;  %v6730_v23 = vld [vmem:[#allocation10 + $0x4c0] sm:$0xff] }
0x19bb   :  { %7561 = vmatprep.subr.bf16.mxu1 %v10010_v17  ;;  %v9930_v5 = vcombine.high %v6722_v44, %v6730_v23  ;;  %v9929_v8 = vcombine.low %v6722_v44, %v6730_v23  ;;  %v6772_v23 = vld [vmem:[#allocation10 + $0x610] sm:$0xff] }
0x19be   :  { %7562 = vmatpush1.bf16.msra.mxu1 %v10009_v40  ;;  %v6828_v40 = vld [vmem:[#allocation10 + $0x7d0] sm:$0xff] }
0x1a74   :  { %v6521_v42 = vpop.f32.mrf.mxu0 }
0x1a76   :  { %v10909_v43 = vpop.f32.mrf.mxu0 }
0x1a77   :  { %v6755_v43 = vld [vmem:[#allocation10 + $0x588] sm:$0xff] }
0x1a78   :  { %v6597_v46 = vpop.f32.mrf.mxu1 }
0x1a79   :  { %v6601_v31 = vpack.c.bf16 %v6597_v46, %v6521_v42  ;;  %v6762_v42 = vld [vmem:[#allocation10 + $0x5c0] sm:$0xff] }
0x1a7a   :  { %v10914_v48 = vpop.f32.mrf.mxu1  ;;  %v9962_v46 = vcombine.high %v6754_v39, %v6762_v42 }
0x1a7b   :  { %10920 = vmatmul.mubr.msk.bf16.vlgmr.msra.gmra.mxu0 %vm233_vm1, %v6601_v31  ;;  %v6763_v31 = vld [vmem:[#allocation10 + $0x5c8] sm:$0xff]  ;;  %v9961_v48 = vcombine.low %v6754_v39, %v6762_v42  ;;  %v9910_v39 = vld [vmem:[#allocation9 + $0x1] ss:$0 sm:$0xff] }
0x1a7c   :  { %7634 = vmatprep.mubr.bf16.mxu0 %v11652_v30  ;;  %7603 = vmatpush1.bf16.msra.mxu0 %v10027_v7  ;;  %v6731_v7 = vld [vmem:[#allocation10 + $0x4c8] sm:$0xff] }
0x1a7d   :  { %7604 = vmatprep.subr.bf16.mxu0 %v10012_v21  ;;  %v10029_v21 = vcombine.low %v6820_v18, %v6828_v40 }
0x1a80   :  { %7605 = vmatpush1.bf16.msra.mxu0 %v10011_v19  ;;  %v6821_v19 = vld [vmem:[#allocation10 + $0x798] sm:$0xff] }
0x1a81   :  { %7606 = vmatprep.subr.bf16.mxu0 %v9996_v29 }
0x1b3b   :  { %v6651_v6 = vpop.f32.mrf.mxu0 }
0x1b3c   :  { %v6658_v50 = vadd.f32 %v6651_v6, %v6267_v27  ;;  %v9994_v27 = vcombine.high %v6786_v22, %v6794_v25  ;;  %v9963_v6 = vcombine.low %v6755_v43, %v6763_v31  ;;  %v10030_v22 = vcombine.high %v6820_v18, %v6828_v40  ;;  %v6829_v25 = vld [vmem:[#allocation10 + $0x7d8] sm:$0xff]  ;;  %v6740_v40 = vld [vmem:[#allocation10 + $0x510] sm:$0xff] }
0x1b3d   :  { %v10921_v57 = vpop.f32.mrf.mxu0 }
0x1b3e   :  { %v6660_v60 = vadd.f32 %v6658_v50, %v12163_v15  ;;  %7563 = vmatprep.subr.bf16.mxu1 %v9994_v27  ;;  %v9964_v50 = vcombine.high %v6755_v43, %v6763_v31  ;;  %v6738_v57 = vld [vmem:[#allocation10 + $0x500] sm:$0xff]  ;;  %v10032_v27 = vcombine.high %v6821_v19, %v6829_v25  ;;  %v6804_v43 = vld [vmem:[#allocation10 + $0x710] sm:$0xff]  ;;  %v6805_v31 = vld [vmem:[#allocation10 + $0x718] sm:$0xff] }
0x1b3f   :  { %v6654_v1 = vpop.f32.mrf.mxu0  ;;  %7564 = vmatpush1.bf16.msra.mxu1 %v9993_v28 }
0x1b40   :  { %v6659_v61 = vadd.f32 %v6654_v1, %v6268_v58  ;;  %6666 = vadd.xlane.f32.xlu0 %v6660_v60  ;;  %v9995_v58 = vcombine.low %v6787_v20, %v6795_v24  ;;  %7565 = vmatprep.subr.bf16.mxu1 %v9978_v36  ;;  %v6739_v1 = vld [vmem:[#allocation10 + $0x508] sm:$0xff]  ;;  %v10031_v20 = vcombine.low %v6821_v19, %v6829_v25  ;;  %v6748_v19 = vld [vmem:[#allocation10 + $0x550] sm:$0xff] }
0x1b41   :  { %v10922_v62 = vpop.f32.mrf.mxu0 }
0x1b42   :  { %v6661_v63 = vadd.f32 %v6659_v61, %v12165_v16  ;;  %7607 = vmatpush1.bf16.msra.mxu0 %v9995_v58  ;;  %v6747_v62 = vld [vmem:[#allocation10 + $0x548] sm:$0xff] }
0x1b43   :  { %7608 = vmatprep.subr.bf16.mxu0 %v9980_v59  ;;  %7566 = vmatpush1.bf16.msra.mxu1 %v9977_v38  ;;  %v9947_v53 = vcombine.low %v6739_v1, %v6747_v62  ;;  %v9948_v3 = vcombine.high %v6739_v1, %v6747_v62  ;;  %v6788_v1 = vld [vmem:[#allocation10 + $0x690] sm:$0xff]  ;;  %v6789_v62 = vld [vmem:[#allocation10 + $0x698] sm:$0xff] }
0x1b44   :  { %6668 = vadd.xlane.f32.xlu1 %v6661_v63  ;;  %7567 = vmatprep.subr.bf16.mxu1 %v9962_v46  ;;  %v6812_v46 = vld [vmem:[#allocation10 + $0x750] sm:$0xff] }
0x1b46   :  { %7609 = vmatpush1.bf16.msra.mxu0 %v9979_v32 }
0x1b47   :  { %7610 = vmatprep.subr.bf16.mxu0 %v9964_v50  ;;  %7568 = vmatpush1.bf16.msra.mxu1 %v9961_v48  ;;  %v6813_v48 = vld [vmem:[#allocation10 + $0x758] sm:$0xff] }
0x1b4a   :  { %7611 = vmatpush1.bf16.msra.mxu0 %v9963_v6 }
0x1b4b   :  { %7612 = vmatprep.subr.bf16.mxu0 %v9948_v3 }
0x1b4e   :  { %7613 = vmatpush1.bf16.msra.mxu0 %v9947_v53  ;;  %v10015_v53 = vcombine.low %v6805_v31, %v6813_v48 }
0x1bc9   :  { %v6667_v15 = vpop.xlane.xlu0 %6666 }
0x1bca   :  { %v6670_v33 = vmul.f32 0.0078125, %v6667_v15  ;;  %v9931_v15 = vcombine.low %v6723_v4, %v6731_v7 }
0x1bcc   :  { %v12369_v9 = vsub.f32 %v6660_v60, %v6670_v33  ;;  %v6746_v60 = vld [vmem:[#allocation10 + $0x540] sm:$0xff]  ;;  %v9932_v33 = vcombine.high %v6723_v4, %v6731_v7  ;;  %v6780_v4 = vld [vmem:[#allocation10 + $0x650] sm:$0xff]  ;;  %v6781_v7 = vld [vmem:[#allocation10 + $0x658] sm:$0xff] }
0x1bcd   :  { %v6669_v10 = vpop.xlane.xlu1 %6668  ;;  %v9946_v61 = vcombine.high %v6738_v57, %v6746_v60 }
0x1bce   :  { %v6671_v37 = vmul.f32 0.0078125, %v6669_v10  ;;  %v6674_v16 = vmul.f32 %v12369_v9, %v12369_v9  ;;  %7614 = vmatprep.subr.bf16.mxu0 %v9932_v33  ;;  %v6706_v10 = vld [vmem:[#allocation10 + $0x400] sm:$0xff]  ;;  %v9982_v33 = vcombine.high %v6772_v23, %v6780_v4 }
0x1bcf   :  { %7569 = vmatprep.subr.bf16.mxu1 %v9946_v61  ;;  %7615 = vmatpush1.bf16.msra.mxu0 %v9931_v15  ;;  %v6796_v61 = vld [vmem:[#allocation10 + $0x6d0] sm:$0xff] }
0x1bd0   :  { %v12373_v11 = vsub.f32 %v6661_v63, %v6671_v37  ;;  %6676 = vadd.xlane.f32.xlu0 %v6674_v16  ;;  %v9945_v63 = vcombine.low %v6738_v57, %v6746_v60  ;;  %v6714_v37 = vld [vmem:[#allocation10 + $0x440] sm:$0xff]  ;;  %v6707_v16 = vld [vmem:[#allocation10 + $0x408] sm:$0xff]  ;;  %v10014_v57 = vcombine.high %v6804_v43, %v6812_v46  ;;  %v10016_v60 = vcombine.high %v6805_v31, %v6813_v48 }
0x1bd1   :  { %v9913_v14 = vcombine.low %v6706_v10, %v6714_v37  ;;  %v9915_v2 = vcombine.low %v6707_v16, %v6715_v13  ;;  %v9916_v17 = vcombine.high %v6707_v16, %v6715_v13  ;;  %v9998_v3 = vcombine.high %v6788_v1, %v6796_v61  ;;  %v6764_v16 = vld [vmem:[#allocation10 + $0x5d0] sm:$0xff]  ;;  %v6765_v13 = vld [vmem:[#allocation10 + $0x5d8] sm:$0xff]  ;;  %v6822_v48 = vld [vmem:[#allocation10 + $0x7a0] sm:$0xff] }
0x1bd2   :  { %v6675_v12 = vmul.f32 %v12373_v11, %v12373_v11  ;;  %7570 = vmatpush1.bf16.msra.mxu1 %v9945_v63  ;;  %v10013_v63 = vcombine.low %v6804_v43, %v6812_v46 }
0x1bd3   :  { %7571 = vmatprep.subr.bf16.mxu1 %v9930_v5  ;;  %7616 = vmatprep.subr.bf16.mxu0 %v9916_v17  ;;  %v6773_v5 = vld [vmem:[#allocation10 + $0x618] sm:$0xff] }
0x1bd4   :  { %6678 = vadd.xlane.f32.xlu0 %v6675_v12  ;;  %v9914_v12 = vcombine.high %v6706_v10, %v6714_v37  ;;  %7617 = vmatpush1.bf16.msra.mxu0 %v9915_v2  ;;  %v9984_v10 = vcombine.high %v6773_v5, %v6781_v7  ;;  %v6756_v37 = vld [vmem:[#allocation10 + $0x590] sm:$0xff]  ;;  %v9983_v2 = vcombine.low %v6773_v5, %v6781_v7 }
0x1bd5   :  { %7688 = vmatprep.subr.bf16.mxu0 %v10032_v27  ;;  %v9966_v17 = vcombine.high %v6756_v37, %v6764_v16  ;;  %v9965_v25 = vcombine.low %v6756_v37, %v6764_v16  ;;  %v9950_v27 = vcombine.high %v6740_v40, %v6748_v19  ;;  %v6799_v37 = vld [vmem:[#allocation10 + $0x6e8] sm:$0xff] }
0x1bd6   :  { %7572 = vmatpush1.bf16.msra.mxu1 %v9929_v8  ;;  %v9997_v8 = vcombine.low %v6788_v1, %v6796_v61  ;;  %v6831_v1 = vld [vmem:[#allocation10 + $0x7e8] sm:$0xff] }
0x1bd7   :  { %7573 = vmatprep.subr.bf16.mxu1 %v9914_v12  ;;  %v6757_v12 = vld [vmem:[#allocation10 + $0x598] sm:$0xff] }
0x1bd8   :  { %v9968_v18 = vcombine.high %v6757_v12, %v6765_v13 }
0x1bda   :  { %7574 = vmatpush1.bf16.msra.mxu1 %v9913_v14  ;;  %v9981_v14 = vcombine.low %v6772_v23, %v6780_v4  ;;  %v6815_v23 = vld [vmem:[#allocation10 + $0x768] sm:$0xff] }
0x1bdb   :  { %7645 = vmatprep.subr.bf16.mxu1 %v10030_v22  ;;  %v6749_v22 = vld [vmem:[#allocation10 + $0x558] sm:$0xff] }
0x1c59   :  { %v6677_v24 = vpop.xlane.xlu0 %6676 }
0x1c5a   :  { %v6680_v28 = vmul.f32 0.0078125, %v6677_v24 }
0x1c5c   :  { %v6682_v58 = vadd.f32 1e-05, %v6680_v28  ;;  %v6724_v28 = vld [vmem:[#allocation10 + $0x490] sm:$0xff] }
0x1c5d   :  { %v6679_v29 = vpop.xlane.xlu0 %6678 }
0x1c5e   :  { %11388 = vrsqrt.f32 %v6682_v58  ;;  %v6681_v34 = vmul.f32 0.0078125, %v6679_v29  ;;  %v6732_v58 = vld [vmem:[#allocation10 + $0x4d0] sm:$0xff]  ;;  %v6725_v29 = vld [vmem:[#allocation10 + $0x498] sm:$0xff] }
0x1c60   :  { %v6683_v26 = vadd.f32 1e-05, %v6681_v34  ;;  %v6733_v34 = vld [vmem:[#allocation10 + $0x4d8] sm:$0xff] }
0x1c61   :  { %v9935_v43 = vcombine.low %v6725_v29, %v6733_v34 }
0x1c62   :  { %11390 = vrsqrt.f32 %v6683_v26  ;;  %v9949_v26 = vcombine.low %v6740_v40, %v6748_v19  ;;  %v6783_v40 = vld [vmem:[#allocation10 + $0x668] sm:$0xff] }
0x1c6b   :  { %v11389_v35 = vpop.eup %11388 }
0x1c6c   :  { %v6686_v36 = vmul.f32 %v11389_v35, %v12369_v9 }
0x1c6e   :  { %v6694_v32 = vmul.f32 %v9909_v41, %v6686_v36  ;;  %v9934_v36 = vcombine.high %v6724_v28, %v6732_v58 }
0x1c6f   :  { %v11391_v38 = vpop.eup %11390 }
0x1c70   :  { %v6687_v59 = vmul.f32 %v11391_v38, %v12373_v11  ;;  %v12382_v6 = vadd.f32 %v9910_v39, %v6694_v32  ;;  %v6797_v11 = vld [vmem:[#allocation10 + $0x6d8] sm:$0xff]  ;;  %v6708_v38 = vld [vmem:[#allocation10 + $0x410] sm:$0xff] }
0x1c71   :  { %v10000_v44 = vcombine.high %v6789_v62, %v6797_v11  ;;  %v9999_v15 = vcombine.low %v6789_v62, %v6797_v11  ;;  %v6716_v32 = vld [vmem:[#allocation10 + $0x450] sm:$0xff] }
0x1c72   :  { %v6695_v42 = vmul.f32 %v9909_v41, %v6687_v59  ;;  %v9936_v41 = vcombine.high %v6725_v29, %v6733_v34  ;;  %v6709_v59 = vld [vmem:[#allocation10 + $0x418] sm:$0xff]  ;;  %v9918_v46 = vcombine.high %v6708_v38, %v6716_v32  ;;  %v9917_v61 = vcombine.low %v6708_v38, %v6716_v32  ;;  %v6751_v38 = vld [vmem:[#allocation10 + $0x568] sm:$0xff] }
0x1c74   :  { %v12384_v50 = vadd.f32 %v9910_v39, %v6695_v42  ;;  %v6717_v39 = vld [vmem:[#allocation10 + $0x458] sm:$0xff]  ;;  %v9933_v42 = vcombine.low %v6724_v28, %v6732_v58  ;;  %v6767_v28 = vld [vmem:[#allocation10 + $0x5e8] sm:$0xff] }
0x1c75   :  { %v9920_v31 = vcombine.high %v6709_v59, %v6717_v39  ;;  %v9919_v62 = vcombine.low %v6709_v59, %v6717_v39 }
0x1c76   :  { %v12388_v9 = vpack.c.bf16 %v12384_v50, %v12382_v6 }
0x1c78   :  { %7592 = vmatmul.mubr.bf16.vlgmr.msra.gmra.mxu1 %v12388_v9  ;;  %7635 = vmatmul.mubr.bf16.vlgmr.msra.gmra.mxu0 %v12388_v9 }
0x1c79   :  { %7646 = vmatpush1.bf16.msra.mxu1 %v10029_v21  ;;  %7689 = vmatpush1.bf16.msra.mxu0 %v10031_v20  ;;  %v6741_v21 = vld [vmem:[#allocation10 + $0x518] sm:$0xff]  ;;  %v9967_v20 = vcombine.low %v6757_v12, %v6765_v13 }
0x1c7a   :  { %7647 = vmatprep.subr.bf16.mxu1 %v10014_v57  ;;  %7690 = vmatprep.subr.bf16.mxu0 %v10016_v60  ;;  %v9952_v24 = vcombine.high %v6741_v21, %v6749_v22  ;;  %v9951_v35 = vcombine.low %v6741_v21, %v6749_v22  ;;  %v6830_v57 = vld [vmem:[#allocation10 + $0x7e0] sm:$0xff]  ;;  %v6823_v60 = vld [vmem:[#allocation10 + $0x7a8] sm:$0xff] }
0x1c7b   :  { %7677 = vmatprep.mubr.bf16.mxu1 %v11652_v30  ;;  %7720 = vmatprep.mubr.bf16.mxu0 %v11652_v30  ;;  %v10034_v11 = vcombine.high %v6822_v48, %v6830_v57  ;;  %v10033_v4 = vcombine.low %v6822_v48, %v6830_v57  ;;  %v10035_v5 = vcombine.low %v6823_v60, %v6831_v1  ;;  %v6735_v48 = vld [vmem:[#allocation10 + $0x4e8] sm:$0xff] }
0x1c7d   :  { %7648 = vmatpush1.bf16.msra.mxu1 %v10013_v63  ;;  %7691 = vmatpush1.bf16.msra.mxu0 %v10015_v53  ;;  %v10036_v63 = vcombine.high %v6823_v60, %v6831_v1  ;;  %v6806_v53 = vld [vmem:[#allocation10 + $0x720] sm:$0xff] }
0x1c7e   :  { %7649 = vmatprep.subr.bf16.mxu1 %v9998_v3  ;;  %7692 = vmatprep.subr.bf16.mxu0 %v10000_v44  ;;  %v6814_v3 = vld [vmem:[#allocation10 + $0x760] sm:$0xff]  ;;  %v6807_v44 = vld [vmem:[#allocation10 + $0x728] sm:$0xff] }
0x1c7f   :  { %v10018_v7 = vcombine.high %v6806_v53, %v6814_v3  ;;  %v10017_v16 = vcombine.low %v6806_v53, %v6814_v3  ;;  %v10019_v12 = vcombine.low %v6807_v44, %v6815_v23  ;;  %v6719_v53 = vld [vmem:[#allocation10 + $0x468] sm:$0xff] }
0x1c81   :  { %7650 = vmatpush1.bf16.msra.mxu1 %v9997_v8  ;;  %7693 = vmatpush1.bf16.msra.mxu0 %v9999_v15  ;;  %v10020_v8 = vcombine.high %v6807_v44, %v6815_v23  ;;  %v6790_v15 = vld [vmem:[#allocation10 + $0x6a0] sm:$0xff] }
0x1c82   :  { %7651 = vmatprep.subr.bf16.mxu1 %v9982_v33  ;;  %7694 = vmatprep.subr.bf16.mxu0 %v9984_v10  ;;  %v6798_v33 = vld [vmem:[#allocation10 + $0x6e0] sm:$0xff]  ;;  %v6791_v10 = vld [vmem:[#allocation10 + $0x6a8] sm:$0xff] }
0x1c83   :  { %v10002_v13 = vcombine.high %v6790_v15, %v6798_v33  ;;  %v10001_v19 = vcombine.low %v6790_v15, %v6798_v33  ;;  %v10003_v21 = vcombine.low %v6791_v10, %v6799_v37  ;;  %v6833_v15 = vld [vmem:[#allocation10 + $0x7f8] sm:$0xff] }
0x1c85   :  { %7652 = vmatpush1.bf16.msra.mxu1 %v9981_v14  ;;  %7695 = vmatpush1.bf16.msra.mxu0 %v9983_v2  ;;  %v10004_v14 = vcombine.high %v6791_v10, %v6799_v37  ;;  %v6774_v2 = vld [vmem:[#allocation10 + $0x620] sm:$0xff] }
0x1c86   :  { %7653 = vmatprep.subr.bf16.mxu1 %v9966_v17  ;;  %7696 = vmatprep.subr.bf16.mxu0 %v9968_v18  ;;  %v6782_v17 = vld [vmem:[#allocation10 + $0x660] sm:$0xff]  ;;  %v6775_v18 = vld [vmem:[#allocation10 + $0x628] sm:$0xff] }
0x1c87   :  { %v9986_v22 = vcombine.high %v6774_v2, %v6782_v17  ;;  %v9985_v58 = vcombine.low %v6774_v2, %v6782_v17  ;;  %v9987_v29 = vcombine.low %v6775_v18, %v6783_v40  ;;  %v6817_v2 = vld [vmem:[#allocation10 + $0x778] sm:$0xff] }
0x1c89   :  { %7654 = vmatpush1.bf16.msra.mxu1 %v9965_v25  ;;  %7697 = vmatpush1.bf16.msra.mxu0 %v9967_v20  ;;  %v9988_v25 = vcombine.high %v6775_v18, %v6783_v40  ;;  %v6758_v20 = vld [vmem:[#allocation10 + $0x5a0] sm:$0xff] }
0x1c8a   :  { %7655 = vmatprep.subr.bf16.mxu1 %v9950_v27  ;;  %7698 = vmatprep.subr.bf16.mxu0 %v9952_v24  ;;  %v6766_v27 = vld [vmem:[#allocation10 + $0x5e0] sm:$0xff]  ;;  %v6759_v24 = vld [vmem:[#allocation10 + $0x5a8] sm:$0xff] }
0x1c8b   :  { %v9970_v34 = vcombine.high %v6758_v20, %v6766_v27  ;;  %v9969_v32 = vcombine.low %v6758_v20, %v6766_v27  ;;  %v9971_v59 = vcombine.low %v6759_v24, %v6767_v28  ;;  %v6801_v20 = vld [vmem:[#allocation10 + $0x6f8] sm:$0xff] }
0x1c8d   :  { %7656 = vmatpush1.bf16.msra.mxu1 %v9949_v26  ;;  %7699 = vmatpush1.bf16.msra.mxu0 %v9951_v35  ;;  %v9972_v26 = vcombine.high %v6759_v24, %v6767_v28  ;;  %v6742_v35 = vld [vmem:[#allocation10 + $0x520] sm:$0xff] }
0x1c8e   :  { %7657 = vmatprep.subr.bf16.mxu1 %v9934_v36  ;;  %7700 = vmatprep.subr.bf16.mxu0 %v9936_v41  ;;  %v6750_v36 = vld [vmem:[#allocation10 + $0x560] sm:$0xff]  ;;  %v6743_v41 = vld [vmem:[#allocation10 + $0x528] sm:$0xff] }
0x1c8f   :  { %v9954_v39 = vcombine.high %v6742_v35, %v6750_v36  ;;  %v9953_v57 = vcombine.low %v6742_v35, %v6750_v36  ;;  %v9955_v60 = vcombine.low %v6743_v41, %v6751_v38  ;;  %v6785_v35 = vld [vmem:[#allocation10 + $0x678] sm:$0xff] }
0x1c91   :  { %7658 = vmatpush1.bf16.msra.mxu1 %v9933_v42  ;;  %7701 = vmatpush1.bf16.msra.mxu0 %v9935_v43  ;;  %v9956_v42 = vcombine.high %v6743_v41, %v6751_v38  ;;  %v6726_v43 = vld [vmem:[#allocation10 + $0x4a0] sm:$0xff] }
0x1c92   :  { %7659 = vmatprep.subr.bf16.mxu1 %v9918_v46  ;;  %7702 = vmatprep.subr.bf16.mxu0 %v9920_v31  ;;  %v6734_v46 = vld [vmem:[#allocation10 + $0x4e0] sm:$0xff]  ;;  %v6727_v31 = vld [vmem:[#allocation10 + $0x4a8] sm:$0xff] }
0x1c93   :  { %v9938_v1 = vcombine.high %v6726_v43, %v6734_v46  ;;  %v9937_v3 = vcombine.low %v6726_v43, %v6734_v46  ;;  %v9939_v44 = vcombine.low %v6727_v31, %v6735_v48  ;;  %v6769_v43 = vld [vmem:[#allocation10 + $0x5f8] sm:$0xff] }
0x1c95   :  { %7660 = vmatpush1.bf16.msra.mxu1 %v9917_v61  ;;  %7703 = vmatpush1.bf16.msra.mxu0 %v9919_v62  ;;  %v9940_v61 = vcombine.high %v6727_v31, %v6735_v48  ;;  %v6710_v62 = vld [vmem:[#allocation10 + $0x420] sm:$0xff] }
0x1c96   :  { %7731 = vmatprep.subr.bf16.mxu1 %v10034_v11  ;;  %7774 = vmatprep.subr.bf16.mxu0 %v10036_v63  ;;  %v6718_v11 = vld [vmem:[#allocation10 + $0x460] sm:$0xff]  ;;  %v6711_v63 = vld [vmem:[#allocation10 + $0x428] sm:$0xff] }
0x1c97   :  { %v9922_v23 = vcombine.high %v6710_v62, %v6718_v11  ;;  %v9921_v33 = vcombine.low %v6710_v62, %v6718_v11  ;;  %v9923_v10 = vcombine.low %v6711_v63, %v6719_v53 }
0x1c98   :  { %7678 = vmatmul.mubr.bf16.vlgmr.msra.gmra.mxu1 %v12388_v9  ;;  %7721 = vmatmul.mubr.bf16.vlgmr.msra.gmra.mxu0 %v12388_v9 }
0x1c99   :  { %7732 = vmatpush1.bf16.msra.mxu1 %v10033_v4  ;;  %7775 = vmatpush1.bf16.msra.mxu0 %v10035_v5  ;;  %v9924_v4 = vcombine.high %v6711_v63, %v6719_v53  ;;  %v6824_v5 = vld [vmem:[#allocation10 + $0x7b0] sm:$0xff] }
0x1c9a   :  { %7733 = vmatprep.subr.bf16.mxu1 %v10018_v7  ;;  %7776 = vmatprep.subr.bf16.mxu0 %v10020_v8  ;;  %v6832_v7 = vld [vmem:[#allocation10 + $0x7f0] sm:$0xff]  ;;  %v6825_v8 = vld [vmem:[#allocation10 + $0x7b8] sm:$0xff] }
0x1c9b   :  { %7763 = vmatprep.mubr.bf16.mxu1 %v11652_v30  ;;  %7806 = vmatprep.mubr.bf16.mxu0 %v11652_v30  ;;  %v10038_v37 = vcombine.high %v6824_v5, %v6832_v7  ;;  %v10037_v17 = vcombine.low %v6824_v5, %v6832_v7  ;;  %v10039_v18 = vcombine.low %v6825_v8, %v6833_v15 }
0x1c9d   :  { %7734 = vmatpush1.bf16.msra.mxu1 %v10017_v16  ;;  %7777 = vmatpush1.bf16.msra.mxu0 %v10019_v12  ;;  %v10040_v16 = vcombine.high %v6825_v8, %v6833_v15  ;;  %v6808_v12 = vld [vmem:[#allocation10 + $0x730] sm:$0xff] }
0x1c9e   :  { %7735 = vmatprep.subr.bf16.mxu1 %v10002_v13  ;;  %7778 = vmatprep.subr.bf16.mxu0 %v10004_v14  ;;  %v6816_v13 = vld [vmem:[#allocation10 + $0x770] sm:$0xff]  ;;  %v6809_v14 = vld [vmem:[#allocation10 + $0x738] sm:$0xff] }
0x1c9f   :  { %v10022_v40 = vcombine.high %v6808_v12, %v6816_v13  ;;  %v10021_v27 = vcombine.low %v6808_v12, %v6816_v13  ;;  %v10023_v24 = vcombine.low %v6809_v14, %v6817_v2 }
0x1ca1   :  { %7736 = vmatpush1.bf16.msra.mxu1 %v10001_v19  ;;  %7779 = vmatpush1.bf16.msra.mxu0 %v10003_v21  ;;  %v10024_v19 = vcombine.high %v6809_v14, %v6817_v2  ;;  %v6792_v21 = vld [vmem:[#allocation10 + $0x6b0] sm:$0xff] }
0x1ca2   :  { %7737 = vmatprep.subr.bf16.mxu1 %v9986_v22  ;;  %7780 = vmatprep.subr.bf16.mxu0 %v9988_v25  ;;  %v6800_v22 = vld [vmem:[#allocation10 + $0x6f0] sm:$0xff]  ;;  %v6793_v25 = vld [vmem:[#allocation10 + $0x6b8] sm:$0xff] }
0x1ca3   :  { %v10006_v28 = vcombine.high %v6792_v21, %v6800_v22  ;;  %v10005_v36 = vcombine.low %v6792_v21, %v6800_v22  ;;  %v10007_v41 = vcombine.low %v6793_v25, %v6801_v20  ;;  %v11182_v21 = vld [vmem:[#allocation12 + $0x438] sm:$0xff]  }
0x1ca4   :  { %v11183_v22 = vld [vmem:[#allocation12 + $0x4b8] sm:$0xff]  }
0x1ca5   :  { %7738 = vmatpush1.bf16.msra.mxu1 %v9985_v58  ;;  %7781 = vmatpush1.bf16.msra.mxu0 %v9987_v29  ;;  %v10008_v58 = vcombine.high %v6793_v25, %v6801_v20  ;;  %v6776_v29 = vld [vmem:[#allocation10 + $0x630] sm:$0xff] }
0x1ca6   :  { %7739 = vmatprep.subr.bf16.mxu1 %v9970_v34  ;;  %7782 = vmatprep.subr.bf16.mxu0 %v9972_v26  ;;  %v6784_v34 = vld [vmem:[#allocation10 + $0x670] sm:$0xff]  ;;  %v6777_v26 = vld [vmem:[#allocation10 + $0x638] sm:$0xff] }
0x1ca7   :  { %v9990_v38 = vcombine.high %v6776_v29, %v6784_v34  ;;  %v9989_v46 = vcombine.low %v6776_v29, %v6784_v34  ;;  %v9991_v31 = vcombine.low %v6777_v26, %v6785_v35  ;;  %v11184_v25 = vld [vmem:[#allocation12 + $0x470] sm:$0xff]   ;;  %v11190_v29 = vld [vmem:[#allocation12 + $0x428] sm:$0xff]  }
0x1ca8   :  { %v11185_v20 = vld [vmem:[#allocation12 + $0x4f0] sm:$0xff]   ;;  %v11191_v34 = vld [vmem:[#allocation12 + $0x4a8] sm:$0xff]  }
0x1ca9   :  { %7740 = vmatpush1.bf16.msra.mxu1 %v9969_v32  ;;  %7783 = vmatpush1.bf16.msra.mxu0 %v9971_v59  ;;  %v9992_v32 = vcombine.high %v6777_v26, %v6785_v35  ;;  %v6760_v59 = vld [vmem:[#allocation10 + $0x5b0] sm:$0xff]  ;;  %v11192_v26 = vld [vmem:[#allocation12 + $0x460] sm:$0xff]  }
0x1caa   :  { %7741 = vmatprep.subr.bf16.mxu1 %v9954_v39  ;;  %7784 = vmatprep.subr.bf16.mxu0 %v9956_v42  ;;  %v6768_v39 = vld [vmem:[#allocation10 + $0x5f0] sm:$0xff]  ;;  %v6761_v42 = vld [vmem:[#allocation10 + $0x5b8] sm:$0xff]  ;;  %v11193_v35 = vld [vmem:[#allocation12 + $0x4e0] sm:$0xff]  }
0x1cab   :  { %v9974_v48 = vcombine.high %v6760_v59, %v6768_v39  ;;  %v9973_v62 = vcombine.low %v6760_v59, %v6768_v39  ;;  %v9975_v11 = vcombine.low %v6761_v42, %v6769_v43  ;;  %v11199_v59 = vld [vmem:[#allocation12 + $0x498] sm:$0xff]   ;;  %v11200_v39 = vld [vmem:[#allocation12 + $0x450] sm:$0xff]  }
0x1cad   :  { %7742 = vmatpush1.bf16.msra.mxu1 %v9953_v57  ;;  %7785 = vmatpush1.bf16.msra.mxu0 %v9955_v60  ;;  %v6744_v57 = vld [vmem:[#allocation10 + $0x530] sm:$0xff] }
0x1cae   :  { %7743 = vmatprep.subr.bf16.mxu1 %v9938_v1  ;;  %7786 = vmatprep.subr.bf16.mxu0 %v9940_v61  ;;  %v6752_v60 = vld [vmem:[#allocation10 + $0x570] sm:$0xff]  ;;  %v6745_v1 = vld [vmem:[#allocation10 + $0x538] sm:$0xff] }
0x1caf   :  { %v6753_v61 = vld [vmem:[#allocation10 + $0x578] sm:$0xff]  ;;  %v9958_v63 = vcombine.high %v6744_v57, %v6752_v60  ;;  %v9957_v5 = vcombine.low %v6744_v57, %v6752_v60  ;;  %v11207_v57 = vld [vmem:[#allocation12 + $0x488] sm:$0xff]   ;;  %v11208_v60 = vld [vmem:[#allocation12 + $0x440] sm:$0xff]  }
0x1cb0   :  { %v9960_v53 = vcombine.high %v6745_v1, %v6753_v61  ;;  %v9959_v7 = vcombine.low %v6745_v1, %v6753_v61  ;;  %v11209_v1 = vld [vmem:[#allocation12 + $0x4c0] sm:$0xff]  }
0x1cb1   :  { %7744 = vmatpush1.bf16.msra.mxu1 %v9937_v3  ;;  %7787 = vmatpush1.bf16.msra.mxu0 %v9939_v44  ;;  %v6728_v3 = vld [vmem:[#allocation10 + $0x4b0] sm:$0xff]  ;;  %v11210_v61 = vld [vmem:[#allocation12 + $0x400] sm:$0xff]  }
0x1cb2   :  { %7745 = vmatprep.subr.bf16.mxu1 %v9922_v23  ;;  %7788 = vmatprep.subr.bf16.mxu0 %v9924_v4  ;;  %v6736_v44 = vld [vmem:[#allocation10 + $0x4f0] sm:$0xff]  ;;  %v6729_v23 = vld [vmem:[#allocation10 + $0x4b8] sm:$0xff] }
0x1cb3   :  { %v6737_v4 = vld [vmem:[#allocation10 + $0x4f8] sm:$0xff]  ;;  %v9942_v8 = vcombine.high %v6728_v3, %v6736_v44  ;;  %v9941_v12 = vcombine.low %v6728_v3, %v6736_v44 }
0x1cb4   :  { %v9944_v15 = vcombine.high %v6729_v23, %v6737_v4  ;;  %v9943_v13 = vcombine.low %v6729_v23, %v6737_v4 }
0x1cb5   :  { %7746 = vmatpush1.bf16.msra.mxu1 %v9921_v33  ;;  %7789 = vmatpush1.bf16.msra.mxu0 %v9923_v10  ;;  %v6712_v33 = vld [vmem:[#allocation10 + $0x430] sm:$0xff] }
0x1cb6   :  { %7817 = vmatprep.subr.bf16.mxu1 %v10038_v37  ;;  %7860 = vmatprep.subr.bf16.mxu0 %v10040_v16  ;;  %v6720_v10 = vld [vmem:[#allocation10 + $0x470] sm:$0xff]  ;;  %v6713_v37 = vld [vmem:[#allocation10 + $0x438] sm:$0xff] }
0x1cb7   :  { %v6721_v16 = vld [vmem:[#allocation10 + $0x478] sm:$0xff]  ;;  %v9926_v14 = vcombine.high %v6712_v33, %v6720_v10 }
0x1cb8   :  { %7764 = vmatmul.mubr.bf16.vlgmr.msra.gmra.mxu1 %v12388_v9  ;;  %7807 = vmatmul.mubr.bf16.vlgmr.msra.gmra.mxu0 %v12388_v9  ;;  %v9928_v2 = vcombine.high %v6713_v37, %v6721_v16 }
0x1cb9   :  { %7818 = vmatpush1.bf16.msra.mxu1 %v10037_v17  ;;  %7861 = vmatpush1.bf16.msra.mxu0 %v10039_v18  ;;  %v9925_v17 = vcombine.low %v6712_v33, %v6720_v10  ;;  %v9927_v18 = vcombine.low %v6713_v37, %v6721_v16 }
0x1cba   :  { %7819 = vmatprep.subr.bf16.mxu1 %v10022_v40  ;;  %7862 = vmatprep.subr.bf16.mxu0 %v10024_v19  ;;  %v11180_v40 = vld [vmem:[#allocation12 + $0x478] sm:$0xff]  }
0x1cbb   :  { %7849 = vmatprep.mubr.bf16.mxu1 %v11652_v30  ;;  %7892 = vmatprep.mubr.bf16.mxu0 %v11652_v30  ;;  %v9976_v30 = vcombine.high %v6761_v42, %v6769_v43  ;;  %v11181_v19 = vld [vmem:[#allocation12 + $0x4f8] sm:$0xff]   ;;  %v11201_v42 = vld [vmem:[#allocation12 + $0x4d0] sm:$0xff]  }
0x1cbc   :  { %v11202_v43 = vld [vmem:[#allocation12 + $0x410] sm:$0xff]  }
0x1cbd   :  { %7820 = vmatpush1.bf16.msra.mxu1 %v10021_v27  ;;  %7863 = vmatpush1.bf16.msra.mxu0 %v10023_v24  ;;  %v11186_v27 = vld [vmem:[#allocation12 + $0x430] sm:$0xff]  }
0x1cbe   :  { %7821 = vmatprep.subr.bf16.mxu1 %v10006_v28  ;;  %7864 = vmatprep.subr.bf16.mxu0 %v10008_v58  ;;  %v11187_v24 = vld [vmem:[#allocation12 + $0x4b0] sm:$0xff]   ;;  %v11188_v28 = vld [vmem:[#allocation12 + $0x468] sm:$0xff]  }
0x1cbf   :  { %v11189_v58 = vld [vmem:[#allocation12 + $0x4e8] sm:$0xff]  }
0x1cc1   :  { %7822 = vmatpush1.bf16.msra.mxu1 %v10005_v36  ;;  %7865 = vmatpush1.bf16.msra.mxu0 %v10007_v41  ;;  %v11194_v36 = vld [vmem:[#allocation12 + $0x420] sm:$0xff]   ;;  %v11196_v41 = vld [vmem:[#allocation12 + $0x458] sm:$0xff]  }
0x1cc2   :  { %7823 = vmatprep.subr.bf16.mxu1 %v9990_v38  ;;  %7866 = vmatprep.subr.bf16.mxu0 %v9992_v32  ;;  %v11197_v38 = vld [vmem:[#allocation12 + $0x4d8] sm:$0xff]  }
0x1cc3   :  { %v11198_v32 = vld [vmem:[#allocation12 + $0x418] sm:$0xff]  }
0x1cc5   :  { %7824 = vmatpush1.bf16.msra.mxu1 %v9989_v46  ;;  %7867 = vmatpush1.bf16.msra.mxu0 %v9991_v31  ;;  %v11203_v46 = vld [vmem:[#allocation12 + $0x490] sm:$0xff]   ;;  %v11204_v31 = vld [vmem:[#allocation12 + $0x448] sm:$0xff]  }
0x1cc6   :  { %7825 = vmatprep.subr.bf16.mxu1 %v9974_v48  ;;  %7868 = vmatprep.subr.bf16.mxu0 %v9976_v30  ;;  %v11205_v48 = vld [vmem:[#allocation12 + $0x4c8] sm:$0xff]  }
0x1cc7   :  { %v11206_v30 = vld [vmem:[#allocation12 + $0x408] sm:$0xff]  }
0x1cc9   :  { %7826 = vmatpush1.bf16.msra.mxu1 %v9973_v62  ;;  %7869 = vmatpush1.bf16.msra.mxu0 %v9975_v11  ;;  %v11211_v62 = vld [vmem:[#allocation12 + $0x480] sm:$0xff]   ;;  %v11212_v11 = vld [vmem:[#allocation12 + $0x578] sm:$0xff]  }
0x1cca   :  { %7827 = vmatprep.subr.bf16.mxu1 %v9958_v63  ;;  %7870 = vmatprep.subr.bf16.mxu0 %v9960_v53  ;;  %v11213_v63 = vld [vmem:[#allocation12 + $0x5f8] sm:$0xff]   ;;  %v12407_v53 = vld [vmem:[%s12496_s11 + $0x10] sm:$0xff] }
0x1ccb   :  { %v6846_v23 = vrot.slane %v12407_v53, %v11845_v47  ;;  %v6854_v4 = vrot.slane %v12407_v53, %v12082_v54 }
0x1ccd   :  { %7828 = vmatpush1.bf16.msra.mxu1 %v9957_v5  ;;  %7871 = vmatpush1.bf16.msra.mxu0 %v9959_v7  ;;  %v6842_v5 = vrot.slane %v12407_v53, %v11849_v49  ;;  %v6850_v7 = vrot.slane %v12407_v53, %v11842_v45 }
0x1cce   :  { %7829 = vmatprep.subr.bf16.mxu1 %v9942_v8  ;;  %7872 = vmatprep.subr.bf16.mxu0 %v9944_v15 }
0x1cd1   :  { %7830 = vmatpush1.bf16.msra.mxu1 %v9941_v12  ;;  %7873 = vmatpush1.bf16.msra.mxu0 %v9943_v13 }
0x1cd2   :  { %7831 = vmatprep.subr.bf16.mxu1 %v9926_v14  ;;  %7874 = vmatprep.subr.bf16.mxu0 %v9928_v2 }
0x1cd5   :  { %7832 = vmatpush1.bf16.msra.mxu1 %v9925_v17  ;;  %7875 = vmatpush1.bf16.msra.mxu0 %v9927_v18 }
0x1cd6   :  { %10466 = vmatprep.subr.bf16.mxu1 %v11180_v40  ;;  %10488 = vmatprep.subr.bf16.mxu0 %v11181_v19 }
0x1cd8   :  { %7850 = vmatmul.mubr.bf16.vlgmr.msra.gmra.mxu1 %v12388_v9  ;;  %7893 = vmatmul.mubr.bf16.vlgmr.msra.gmra.mxu0 %v12388_v9  ;;  %v11195_v9 = vld [vmem:[#allocation12 + $0x4a0] sm:$0xff]  }
0x1cd9   :  { %10467 = vmatpush3.bf16.msra.mxu1 %v11182_v21  ;;  %10489 = vmatpush3.bf16.msra.mxu0 %v11183_v22 }
0x1cda   :  { %10468 = vmatprep.subr.bf16.mxu1 %v11184_v25  ;;  %10490 = vmatprep.subr.bf16.mxu0 %v11185_v20 }
0x1cdd   :  { %10469 = vmatpush3.bf16.msra.mxu1 %v11186_v27  ;;  %10491 = vmatpush3.bf16.msra.mxu0 %v11187_v24 }
0x1cde   :  { %10470 = vmatprep.subr.bf16.mxu1 %v11188_v28  ;;  %10492 = vmatprep.subr.bf16.mxu0 %v11189_v58 }
0x1ce1   :  { %10471 = vmatpush3.bf16.msra.mxu1 %v11190_v29  ;;  %10493 = vmatpush3.bf16.msra.mxu0 %v11191_v34 }
0x1ce2   :  { %10472 = vmatprep.subr.bf16.mxu1 %v11192_v26  ;;  %10494 = vmatprep.subr.bf16.mxu0 %v11193_v35  ;;  %v11214_v26 = vld [vmem:[#allocation12 + $0x538] sm:$0xff]  }
0x1ce3   :  { %v11215_v35 = vld [vmem:[#allocation12 + $0x5b8] sm:$0xff]  }
0x1ce5   :  { %10473 = vmatpush3.bf16.msra.mxu1 %v11194_v36  ;;  %10495 = vmatpush3.bf16.msra.mxu0 %v11195_v9 }
0x1ce6   :  { %10474 = vmatprep.subr.bf16.mxu1 %v11196_v41  ;;  %10496 = vmatprep.subr.bf16.mxu0 %v11197_v38  ;;  %v11216_v41 = vld [vmem:[#allocation12 + $0x570] sm:$0xff]  }
0x1ce7   :  { %v11217_v38 = vld [vmem:[#allocation12 + $0x5f0] sm:$0xff]  }
0x1ce9   :  { %10475 = vmatpush3.bf16.msra.mxu1 %v11198_v32  ;;  %10497 = vmatpush3.bf16.msra.mxu0 %v11199_v59  ;;  %v11218_v32 = vld [vmem:[#allocation12 + $0x530] sm:$0xff]  }
0x1cea   :  { %10476 = vmatprep.subr.bf16.mxu1 %v11200_v39  ;;  %10498 = vmatprep.subr.bf16.mxu0 %v11201_v42  ;;  %v11219_v59 = vld [vmem:[#allocation12 + $0x5b0] sm:$0xff]   ;;  %v11220_v39 = vld [vmem:[#allocation12 + $0x568] sm:$0xff]  }
0x1ceb   :  { %v11221_v42 = vld [vmem:[#allocation12 + $0x5e8] sm:$0xff]  }
0x1ced   :  { %10477 = vmatpush3.bf16.msra.mxu1 %v11202_v43  ;;  %10499 = vmatpush3.bf16.msra.mxu0 %v11203_v46  ;;  %v11222_v43 = vld [vmem:[#allocation12 + $0x528] sm:$0xff]  }
0x1cee   :  { %10478 = vmatprep.subr.bf16.mxu1 %v11204_v31  ;;  %10500 = vmatprep.subr.bf16.mxu0 %v11205_v48  ;;  %v11223_v46 = vld [vmem:[#allocation12 + $0x5a8] sm:$0xff]   ;;  %v11224_v31 = vld [vmem:[#allocation12 + $0x560] sm:$0xff]  }
0x1cef   :  { %v11225_v48 = vld [vmem:[#allocation12 + $0x5e0] sm:$0xff]  }
0x1cf1   :  { %10479 = vmatpush3.bf16.msra.mxu1 %v11206_v30  ;;  %10501 = vmatpush3.bf16.msra.mxu0 %v11207_v57  ;;  %v11226_v30 = vld [vmem:[#allocation12 + $0x520] sm:$0xff]  }
0x1cf2   :  { %10480 = vmatprep.subr.bf16.mxu1 %v11208_v60  ;;  %10502 = vmatprep.subr.bf16.mxu0 %v11209_v1  ;;  %v11227_v57 = vld [vmem:[#allocation12 + $0x5a0] sm:$0xff]   ;;  %v11228_v60 = vld [vmem:[#allocation12 + $0x558] sm:$0xff]  }
0x1cf3   :  { %v11229_v1 = vld [vmem:[#allocation12 + $0x5d8] sm:$0xff]  }
0x1cf5   :  { %10481 = vmatpush3.bf16.msra.mxu1 %v11210_v61  ;;  %10503 = vmatpush3.bf16.msra.mxu0 %v11211_v62  ;;  %v11230_v61 = vld [vmem:[#allocation12 + $0x518] sm:$0xff]  }
0x1cf6   :  { %10510 = vmatprep.subr.bf16.mxu1 %v11212_v11  ;;  %10532 = vmatprep.subr.bf16.mxu0 %v11213_v63  ;;  %v11231_v62 = vld [vmem:[#allocation12 + $0x598] sm:$0xff]   ;;  %v11232_v11 = vld [vmem:[#allocation12 + $0x550] sm:$0xff]  }
0x1cf7   :  { %v11233_v63 = vld [vmem:[#allocation12 + $0x5d0] sm:$0xff]  }
0x1d38   :  { %v7593_v3 = vpop.f32.mrf.mxu1  ;;  %v7636_v44 = vpop.f32.mrf.mxu0 }
0x1d39   :  { %v7594_v14 = vadd.f32 %v7593_v3, %v6842_v5  ;;  %v7637_v2 = vadd.f32 %v7636_v44, %v6850_v7  ;;  %v11234_v3 = vld [vmem:[#allocation12 + $0x510] sm:$0xff]  }
0x1d3a   :  { %v7595_v8 = vpop.f32.mrf.mxu1  ;;  %v7638_v15 = vpop.f32.mrf.mxu0  ;;  %v11235_v44 = vld [vmem:[#allocation12 + $0x590] sm:$0xff]  }
0x1d3b   :  { %v7596_v37 = vadd.f32 %v7595_v8, %v6846_v23  ;;  %v7639_v16 = vadd.f32 %v7638_v15, %v6854_v4  ;;  %v7903_v28 = vmax.f32 %v7594_v14, 0.0  ;;  %v7905_v58 = vmax.f32 %v7637_v2, 0.0 }
0x1d3c   :  { %v7597_v33 = vpop.f32.mrf.mxu1  ;;  %v7640_v10 = vpop.f32.mrf.mxu0  ;;  %v6862_v8 = vrot.slane %v12407_v53, %v12098_v51  ;;  %v6870_v15 = vrot.slane %v12407_v53, %v12101_v52 }
0x1d3d   :  { %v7598_v12 = vadd.f32 %v7597_v33, %v6842_v5  ;;  %v7641_v13 = vadd.f32 %v7640_v10, %v6850_v7  ;;  %v7904_v25 = vmax.f32 %v7596_v37, 0.0  ;;  %v7906_v20 = vmax.f32 %v7639_v16, 0.0  ;;  %v11236_v5 = vld [vmem:[#allocation12 + $0x548] sm:$0xff]  }
0x1d3e   :  { %v7599_v17 = vpop.f32.mrf.mxu1  ;;  %v7642_v18 = vpop.f32.mrf.mxu0  ;;  %v11237_v7 = vld [vmem:[#allocation12 + $0x5c8] sm:$0xff]   ;;  %v6858_v33 = vrot.slane %v12407_v53, %v12104_v55  ;;  %v6866_v10 = vrot.slane %v12407_v53, %v12107_v56 }
0x1d3f   :  { %v7600_v40 = vadd.f32 %v7599_v17, %v6846_v23  ;;  %v7643_v19 = vadd.f32 %v7642_v18, %v6854_v4  ;;  %v7919_v21 = vmax.f32 %v7598_v12, 0.0  ;;  %v7921_v22 = vmax.f32 %v7641_v13, 0.0  ;;  %v11238_v12 = vld [vmem:[#allocation12 + $0x508] sm:$0xff]   ;;  %v11240_v17 = vld [vmem:[#allocation12 + $0x540] sm:$0xff]  }
0x1d40   :  { %v11239_v13 = vld [vmem:[#allocation12 + $0x588] sm:$0xff]   ;;  %v11241_v18 = vld [vmem:[#allocation12 + $0x5c0] sm:$0xff]  }
0x1d41   :  { %v7920_v27 = vmax.f32 %v7600_v40, 0.0  ;;  %v7922_v24 = vmax.f32 %v7643_v19, 0.0  ;;  %v7935_v36 = vpack.c.bf16 %v7919_v21, %v7903_v28  ;;  %v7937_v9 = vpack.c.bf16 %v7921_v22, %v7905_v58  ;;  %v11242_v58 = vld [vmem:[#allocation12 + $0x500] sm:$0xff]  }
0x1d43   :  { %v7936_v29 = vpack.c.bf16 %v7920_v27, %v7904_v25  ;;  %v7938_v34 = vpack.c.bf16 %v7922_v24, %v7906_v20 }
0x1d45   :  { %9016 = vmatprep.mubr.bf16.mxu1 %v7936_v29  ;;  %9057 = vmatprep.mubr.bf16.mxu0 %v7938_v34  ;;  %v11243_v29 = vld [vmem:[#allocation12 + $0x580] sm:$0xff]  }
0x1d46   :  { %9017 = vmatmul.mubr.bf16.vlgmr.msra.gmra.mxu1 %v7935_v36  ;;  %9058 = vmatmul.mubr.bf16.vlgmr.msra.gmra.mxu0 %v7937_v9  ;;  %v11245_v36 = vld [vmem:[#allocation12 + $0x6f8] sm:$0xff]  }
0x1d47   :  { %10511 = vmatpush3.bf16.msra.mxu1 %v11214_v26  ;;  %10533 = vmatpush3.bf16.msra.mxu0 %v11215_v35  ;;  %v11244_v35 = vld [vmem:[#allocation12 + $0x678] sm:$0xff]  }
0x1d48   :  { %10512 = vmatprep.subr.bf16.mxu1 %v11216_v41  ;;  %10534 = vmatprep.subr.bf16.mxu0 %v11217_v38 }
0x1d4b   :  { %10513 = vmatpush3.bf16.msra.mxu1 %v11218_v32  ;;  %10535 = vmatpush3.bf16.msra.mxu0 %v11219_v59 }
0x1d4c   :  { %10514 = vmatprep.subr.bf16.mxu1 %v11220_v39  ;;  %10536 = vmatprep.subr.bf16.mxu0 %v11221_v42 }
0x1d4f   :  { %10515 = vmatpush3.bf16.msra.mxu1 %v11222_v43  ;;  %10537 = vmatpush3.bf16.msra.mxu0 %v11223_v46  ;;  %v11246_v46 = vld [vmem:[#allocation12 + $0x638] sm:$0xff]  }
0x1d50   :  { %10516 = vmatprep.subr.bf16.mxu1 %v11224_v31  ;;  %10538 = vmatprep.subr.bf16.mxu0 %v11225_v48  ;;  %v11247_v31 = vld [vmem:[#allocation12 + $0x6b8] sm:$0xff]  }
0x1d53   :  { %10517 = vmatpush3.bf16.msra.mxu1 %v11226_v30  ;;  %10539 = vmatpush3.bf16.msra.mxu0 %v11227_v57  ;;  %v11248_v57 = vld [vmem:[#allocation12 + $0x670] sm:$0xff]  }
0x1d54   :  { %10518 = vmatprep.subr.bf16.mxu1 %v11228_v60  ;;  %10540 = vmatprep.subr.bf16.mxu0 %v11229_v1  ;;  %v11249_v60 = vld [vmem:[#allocation12 + $0x6f0] sm:$0xff]  }
0x1d55   :  { %v11250_v1 = vld [vmem:[#allocation12 + $0x630] sm:$0xff]  }
0x1d57   :  { %10519 = vmatpush3.bf16.msra.mxu1 %v11230_v61  ;;  %10541 = vmatpush3.bf16.msra.mxu0 %v11231_v62  ;;  %v11251_v61 = vld [vmem:[#allocation12 + $0x6b0] sm:$0xff]   ;;  %v11252_v62 = vld [vmem:[#allocation12 + $0x668] sm:$0xff]  }
0x1d58   :  { %v7679_v23 = vpop.f32.mrf.mxu1  ;;  %v7722_v4 = vpop.f32.mrf.mxu0  ;;  %10520 = vmatprep.subr.bf16.mxu1 %v11232_v11  ;;  %10542 = vmatprep.subr.bf16.mxu0 %v11233_v63  ;;  %v11253_v11 = vld [vmem:[#allocation12 + $0x6e8] sm:$0xff]  }
0x1d59   :  { %v7680_v25 = vadd.f32 %v7679_v23, %v6858_v33  ;;  %v7723_v20 = vadd.f32 %v7722_v4, %v6866_v10  ;;  %v11254_v63 = vld [vmem:[#allocation12 + $0x628] sm:$0xff]   ;;  %v11257_v23 = vld [vmem:[#allocation12 + $0x6e0] sm:$0xff]  }
0x1d5a   :  { %v7681_v37 = vpop.f32.mrf.mxu1  ;;  %v7724_v16 = vpop.f32.mrf.mxu0  ;;  %v11258_v4 = vld [vmem:[#allocation12 + $0x620] sm:$0xff]  }
0x1d5b   :  { %10521 = vmatpush3.bf16.msra.mxu1 %v11234_v3  ;;  %10543 = vmatpush3.bf16.msra.mxu0 %v11235_v44  ;;  %v7682_v40 = vadd.f32 %v7681_v37, %v6862_v8  ;;  %v7725_v19 = vadd.f32 %v7724_v16, %v6870_v15  ;;  %v7907_v59 = vmax.f32 %v7680_v25, 0.0  ;;  %v7909_v39 = vmax.f32 %v7723_v20, 0.0  ;;  %v11255_v3 = vld [vmem:[#allocation12 + $0x6a8] sm:$0xff]   ;;  %v11256_v44 = vld [vmem:[#allocation12 + $0x660] sm:$0xff]   ;;  %v11265_v37 = vld [vmem:[#allocation12 + $0x6d0] sm:$0xff]  }
0x1d5c   :  { %v7683_v14 = vpop.f32.mrf.mxu1  ;;  %v7726_v2 = vpop.f32.mrf.mxu0  ;;  %10522 = vmatprep.subr.bf16.mxu1 %v11236_v5  ;;  %10544 = vmatprep.subr.bf16.mxu0 %v11237_v7  ;;  %v11259_v5 = vld [vmem:[#allocation12 + $0x6a0] sm:$0xff]   ;;  %v11260_v7 = vld [vmem:[#allocation12 + $0x658] sm:$0xff]   ;;  %v12428_v16 = vld [vmem:[%s12496_s11 + $0x18] sm:$0xff] }
0x1d5d   :  { %v7684_v21 = vadd.f32 %v7683_v14, %v6858_v33  ;;  %v7727_v22 = vadd.f32 %v7726_v2, %v6866_v10  ;;  %v7908_v9 = vmax.f32 %v7682_v40, 0.0  ;;  %v7910_v41 = vmax.f32 %v7725_v19, 0.0  ;;  %v11263_v33 = vld [vmem:[#allocation12 + $0x698] sm:$0xff]   ;;  %v11264_v10 = vld [vmem:[#allocation12 + $0x650] sm:$0xff]  }
0x1d5e   :  { %v7685_v27 = vpop.f32.mrf.mxu1  ;;  %v7728_v53 = vpop.f32.mrf.mxu0  ;;  %v6878_v40 = vrot.slane %v12428_v16, %v11845_v47  ;;  %v6886_v19 = vrot.slane %v12428_v16, %v12082_v54  ;;  %v11272_v47 = vld [vmem:[#allocation12 + $0x640] sm:$0xff]  }
0x1d5f   :  { %v7686_v24 = vadd.f32 %v7685_v27, %v6862_v8  ;;  %v7729_v28 = vadd.f32 %v7728_v53, %v6870_v15  ;;  %10523 = vmatpush3.bf16.msra.mxu1 %v11238_v12  ;;  %10545 = vmatpush3.bf16.msra.mxu0 %v11239_v13  ;;  %v7923_v34 = vmax.f32 %v7684_v21, 0.0  ;;  %v7925_v26 = vmax.f32 %v7727_v22, 0.0  ;;  %v11261_v8 = vld [vmem:[#allocation12 + $0x6d8] sm:$0xff]   ;;  %v11266_v12 = vld [vmem:[#allocation12 + $0x610] sm:$0xff]   ;;  %v11270_v27 = vld [vmem:[#allocation12 + $0x608] sm:$0xff]  }
0x1d60   :  { %10524 = vmatprep.subr.bf16.mxu1 %v11240_v17  ;;  %10546 = vmatprep.subr.bf16.mxu0 %v11241_v18  ;;  %v11262_v15 = vld [vmem:[#allocation12 + $0x618] sm:$0xff]   ;;  %v11267_v13 = vld [vmem:[#allocation12 + $0x690] sm:$0xff]   ;;  %v11268_v17 = vld [vmem:[#allocation12 + $0x648] sm:$0xff]   ;;  %v6874_v21 = vrot.slane %v12428_v16, %v11849_v49  ;;  %v6882_v22 = vrot.slane %v12428_v16, %v11842_v45 }
0x1d61   :  { %v7924_v38 = vmax.f32 %v7686_v24, 0.0  ;;  %v7926_v32 = vmax.f32 %v7729_v28, 0.0  ;;  %v7939_v48 = vpack.c.bf16 %v7923_v34, %v7907_v59  ;;  %v7941_v30 = vpack.c.bf16 %v7925_v26, %v7909_v39  ;;  %v11269_v18 = vld [vmem:[#allocation12 + $0x6c8] sm:$0xff]  }
0x1d62   :  { %v11271_v53 = vld [vmem:[#allocation12 + $0x688] sm:$0xff]  }
0x1d63   :  { %v7940_v42 = vpack.c.bf16 %v7924_v38, %v7908_v9  ;;  %v7942_v43 = vpack.c.bf16 %v7926_v32, %v7910_v41  ;;  %10525 = vmatpush3.bf16.msra.mxu1 %v11242_v58  ;;  %10547 = vmatpush3.bf16.msra.mxu0 %v11243_v29  ;;  %v11273_v58 = vld [vmem:[#allocation12 + $0x6c0] sm:$0xff]  }
0x1d64   :  { %10554 = vmatprep.subr.bf16.mxu1 %v11244_v35  ;;  %10576 = vmatprep.subr.bf16.mxu0 %v11245_v36  ;;  %v11274_v38 = vld [vmem:[#allocation12 + $0x600] sm:$0xff]  }
0x1d65   :  { %9098 = vmatprep.mubr.bf16.mxu1 %v7940_v42  ;;  %9139 = vmatprep.mubr.bf16.mxu0 %v7942_v43  ;;  %v11275_v32 = vld [vmem:[#allocation12 + $0x680] sm:$0xff]   ;;  %v11276_v42 = vld [vmem:[#allocation12 + $0x778] sm:$0xff]  }
0x1d66   :  { %9099 = vmatmul.mubr.bf16.vlgmr.msra.gmra.mxu1 %v7939_v48  ;;  %9140 = vmatmul.mubr.bf16.vlgmr.msra.gmra.mxu0 %v7941_v30  ;;  %v11277_v43 = vld [vmem:[#allocation12 + $0x7f8] sm:$0xff]  }
0x1d67   :  { %10555 = vmatpush3.bf16.msra.mxu1 %v11246_v46  ;;  %10577 = vmatpush3.bf16.msra.mxu0 %v11247_v31 }
0x1d68   :  { %10556 = vmatprep.subr.bf16.mxu1 %v11248_v57  ;;  %10578 = vmatprep.subr.bf16.mxu0 %v11249_v60 }
0x1d6b   :  { %10557 = vmatpush3.bf16.msra.mxu1 %v11250_v1  ;;  %10579 = vmatpush3.bf16.msra.mxu0 %v11251_v61 }
0x1d6c   :  { %10558 = vmatprep.subr.bf16.mxu1 %v11252_v62  ;;  %10580 = vmatprep.subr.bf16.mxu0 %v11253_v11  ;;  %v11278_v62 = vld [vmem:[#allocation12 + $0x738] sm:$0xff]  }
0x1d6d   :  { %v11279_v11 = vld [vmem:[#allocation12 + $0x7b8] sm:$0xff]  }
0x1d6f   :  { %10559 = vmatpush3.bf16.msra.mxu1 %v11254_v63  ;;  %10581 = vmatpush3.bf16.msra.mxu0 %v11255_v3 }
0x1d70   :  { %10560 = vmatprep.subr.bf16.mxu1 %v11256_v44  ;;  %10582 = vmatprep.subr.bf16.mxu0 %v11257_v23  ;;  %v11280_v44 = vld [vmem:[#allocation12 + $0x770] sm:$0xff]  }
0x1d71   :  { %v11281_v23 = vld [vmem:[#allocation12 + $0x7f0] sm:$0xff]  }
0x1d73   :  { %10561 = vmatpush3.bf16.msra.mxu1 %v11258_v4  ;;  %10583 = vmatpush3.bf16.msra.mxu0 %v11259_v5  ;;  %v11282_v4 = vld [vmem:[#allocation12 + $0x730] sm:$0xff]  }
0x1d74   :  { %10562 = vmatprep.subr.bf16.mxu1 %v11260_v7  ;;  %10584 = vmatprep.subr.bf16.mxu0 %v11261_v8  ;;  %v11283_v5 = vld [vmem:[#allocation12 + $0x7b0] sm:$0xff]   ;;  %v11284_v7 = vld [vmem:[#allocation12 + $0x768] sm:$0xff]  }
0x1d75   :  { %v11285_v8 = vld [vmem:[#allocation12 + $0x7e8] sm:$0xff]  }
0x1d77   :  { %10563 = vmatpush3.bf16.msra.mxu1 %v11262_v15  ;;  %10585 = vmatpush3.bf16.msra.mxu0 %v11263_v33  ;;  %v11286_v15 = vld [vmem:[#allocation12 + $0x728] sm:$0xff]  }
0x1d78   :  { %v7765_v14 = vpop.f32.mrf.mxu1  ;;  %v7808_v2 = vpop.f32.mrf.mxu0  ;;  %10564 = vmatprep.subr.bf16.mxu1 %v11264_v10  ;;  %10586 = vmatprep.subr.bf16.mxu0 %v11265_v37  ;;  %v11287_v33 = vld [vmem:[#allocation12 + $0x7a8] sm:$0xff]   ;;  %v11288_v10 = vld [vmem:[#allocation12 + $0x760] sm:$0xff]  }
0x1d79   :  { %v7766_v49 = vadd.f32 %v7765_v14, %v6874_v21  ;;  %v7809_v35 = vadd.f32 %v7808_v2, %v6882_v22  ;;  %v11289_v37 = vld [vmem:[#allocation12 + $0x7e0] sm:$0xff]   ;;  %v11292_v14 = vld [vmem:[#allocation12 + $0x758] sm:$0xff]  }
0x1d7a   :  { %v7767_v25 = vpop.f32.mrf.mxu1  ;;  %v7810_v20 = vpop.f32.mrf.mxu0  ;;  %v11293_v2 = vld [vmem:[#allocation12 + $0x7d8] sm:$0xff]  }
0x1d7b   :  { %10565 = vmatpush3.bf16.msra.mxu1 %v11266_v12  ;;  %10587 = vmatpush3.bf16.msra.mxu0 %v11267_v13  ;;  %v7768_v29 = vadd.f32 %v7767_v25, %v6878_v40  ;;  %v7811_v54 = vadd.f32 %v7810_v20, %v6886_v19  ;;  %v7911_v57 = vmax.f32 %v7766_v49, 0.0  ;;  %v7913_v60 = vmax.f32 %v7809_v35, 0.0  ;;  %v11290_v12 = vld [vmem:[#allocation12 + $0x720] sm:$0xff]  }
0x1d7c   :  { %v7769_v24 = vpop.f32.mrf.mxu1  ;;  %v7812_v28 = vpop.f32.mrf.mxu0  ;;  %10566 = vmatprep.subr.bf16.mxu1 %v11268_v17  ;;  %10588 = vmatprep.subr.bf16.mxu0 %v11269_v18  ;;  %v11291_v13 = vld [vmem:[#allocation12 + $0x7a0] sm:$0xff]   ;;  %v11294_v17 = vld [vmem:[#allocation12 + $0x718] sm:$0xff]  }
0x1d7d   :  { %v7770_v34 = vadd.f32 %v7769_v24, %v6874_v21  ;;  %v7813_v26 = vadd.f32 %v7812_v28, %v6882_v22  ;;  %v7912_v46 = vmax.f32 %v7768_v29, 0.0  ;;  %v7914_v31 = vmax.f32 %v7811_v54, 0.0  ;;  %v11295_v18 = vld [vmem:[#allocation12 + $0x798] sm:$0xff]   ;;  %v11298_v21 = vld [vmem:[#allocation12 + $0x710] sm:$0xff]  }
0x1d7e   :  { %v7771_v36 = vpop.f32.mrf.mxu1  ;;  %v7814_v45 = vpop.f32.mrf.mxu0  ;;  %v11299_v22 = vld [vmem:[#allocation12 + $0x790] sm:$0xff]   ;;  %v6894_v24 = vrot.slane %v12428_v16, %v12098_v51  ;;  %v6902_v28 = vrot.slane %v12428_v16, %v12101_v52  ;;  %v11304_v51 = vld [vmem:[#allocation12 + $0x740] sm:$0xff]  }
0x1d7f   :  { %v7772_v9 = vadd.f32 %v7771_v36, %v6878_v40  ;;  %v7815_v41 = vadd.f32 %v7814_v45, %v6886_v19  ;;  %10567 = vmatpush3.bf16.msra.mxu1 %v11270_v27  ;;  %10589 = vmatpush3.bf16.msra.mxu0 %v11271_v53  ;;  %v7927_v59 = vmax.f32 %v7770_v34, 0.0  ;;  %v7929_v39 = vmax.f32 %v7813_v26, 0.0  ;;  %v11296_v40 = vld [vmem:[#allocation12 + $0x750] sm:$0xff]   ;;  %v11300_v27 = vld [vmem:[#allocation12 + $0x748] sm:$0xff]   ;;  %v11305_v36 = vld [vmem:[#allocation12 + $0x7c0] sm:$0xff]  }
0x1d80   :  { %10568 = vmatprep.subr.bf16.mxu1 %v11272_v47  ;;  %10590 = vmatprep.subr.bf16.mxu0 %v11273_v58  ;;  %v11297_v19 = vld [vmem:[#allocation12 + $0x7d0] sm:$0xff]   ;;  %v11301_v53 = vld [vmem:[#allocation12 + $0x7c8] sm:$0xff]   ;;  %v6890_v47 = vrot.slane %v12428_v16, %v12104_v55  ;;  %v6898_v58 = vrot.slane %v12428_v16, %v12107_v56 }
0x1d81   :  { %v7928_v48 = vmax.f32 %v7772_v9, 0.0  ;;  %v7930_v30 = vmax.f32 %v7815_v41, 0.0  ;;  %v7943_v63 = vpack.c.bf16 %v7927_v59, %v7911_v57  ;;  %v7945_v3 = vpack.c.bf16 %v7929_v39, %v7913_v60  ;;  %v11302_v34 = vld [vmem:[#allocation12 + $0x708] sm:$0xff]   ;;  %v11306_v39 = vld [vmem:[#allocation12 + $0x700] sm:$0xff]  }
0x1d82   :  { %v11303_v26 = vld [vmem:[#allocation12 + $0x788] sm:$0xff]  }
0x1d83   :  { %v7944_v1 = vpack.c.bf16 %v7928_v48, %v7912_v46  ;;  %v7946_v61 = vpack.c.bf16 %v7930_v30, %v7914_v31  ;;  %10569 = vmatpush3.bf16.msra.mxu1 %v11274_v38  ;;  %10591 = vmatpush3.bf16.msra.mxu0 %v11275_v32 }
0x1d84   :  { %10598 = vmatprep.subr.bf16.mxu1 %v11276_v42  ;;  %10620 = vmatprep.subr.bf16.mxu0 %v11277_v43  ;;  %v11307_v42 = vld [vmem:[#allocation12 + $0x780] sm:$0xff]  }
0x1d85   :  { %9180 = vmatprep.mubr.bf16.mxu1 %v7944_v1  ;;  %9221 = vmatprep.mubr.bf16.mxu0 %v7946_v61 }
0x1d86   :  { %9181 = vmatmul.mubr.bf16.vlgmr.msra.gmra.mxu1 %v7943_v63  ;;  %9222 = vmatmul.mubr.bf16.vlgmr.msra.gmra.mxu0 %v7945_v3 }
0x1d87   :  { %10599 = vmatpush3.bf16.msra.mxu1 %v11278_v62  ;;  %10621 = vmatpush3.bf16.msra.mxu0 %v11279_v11 }
0x1d88   :  { %10600 = vmatprep.subr.bf16.mxu1 %v11280_v44  ;;  %10622 = vmatprep.subr.bf16.mxu0 %v11281_v23 }
0x1d8b   :  { %10601 = vmatpush3.bf16.msra.mxu1 %v11282_v4  ;;  %10623 = vmatpush3.bf16.msra.mxu0 %v11283_v5 }
0x1d8c   :  { %10602 = vmatprep.subr.bf16.mxu1 %v11284_v7  ;;  %10624 = vmatprep.subr.bf16.mxu0 %v11285_v8 }
0x1d8f   :  { %10603 = vmatpush3.bf16.msra.mxu1 %v11286_v15  ;;  %10625 = vmatpush3.bf16.msra.mxu0 %v11287_v33 }
0x1d90   :  { %10604 = vmatprep.subr.bf16.mxu1 %v11288_v10  ;;  %10626 = vmatprep.subr.bf16.mxu0 %v11289_v37 }
0x1d93   :  { %10605 = vmatpush3.bf16.msra.mxu1 %v11290_v12  ;;  %10627 = vmatpush3.bf16.msra.mxu0 %v11291_v13 }
0x1d94   :  { %10606 = vmatprep.subr.bf16.mxu1 %v11292_v14  ;;  %10628 = vmatprep.subr.bf16.mxu0 %v11293_v2 }
0x1d97   :  { %10607 = vmatpush3.bf16.msra.mxu1 %v11294_v17  ;;  %10629 = vmatpush3.bf16.msra.mxu0 %v11295_v18  ;;  %v10041_v18 = vld [vmem:[#allocation13 + $0x1] ss:$0 sm:$0xff] }
0x1d98   :  { %v7851_v25 = vpop.f32.mrf.mxu1  ;;  %v7894_v20 = vpop.f32.mrf.mxu0  ;;  %10608 = vmatprep.subr.bf16.mxu1 %v11296_v40  ;;  %10630 = vmatprep.subr.bf16.mxu0 %v11297_v19 }
0x1d99   :  { %v7852_v55 = vadd.f32 %v7851_v25, %v6890_v47  ;;  %v7895_v38 = vadd.f32 %v7894_v20, %v6898_v58 }
0x1d9a   :  { %v7853_v29 = vpop.f32.mrf.mxu1  ;;  %v7896_v54 = vpop.f32.mrf.mxu0 }
0x1d9b   :  { %10609 = vmatpush3.bf16.msra.mxu1 %v11298_v21  ;;  %10631 = vmatpush3.bf16.msra.mxu0 %v11299_v22  ;;  %v7854_v45 = vadd.f32 %v7853_v29, %v6894_v24  ;;  %v7897_v52 = vadd.f32 %v7896_v54, %v6902_v28  ;;  %v7915_v60 = vmax.f32 %v7852_v55, 0.0  ;;  %v7917_v1 = vmax.f32 %v7895_v38, 0.0 }
0x1d9c   :  { %v7855_v49 = vpop.f32.mrf.mxu1  ;;  %v7898_v35 = vpop.f32.mrf.mxu0  ;;  %10610 = vmatprep.subr.bf16.mxu1 %v11300_v27  ;;  %10632 = vmatprep.subr.bf16.mxu0 %v11301_v53 }
0x1d9d   :  { %v7856_v9 = vadd.f32 %v7855_v49, %v6890_v47  ;;  %v7899_v41 = vadd.f32 %v7898_v35, %v6898_v58  ;;  %v7916_v31 = vmax.f32 %v7854_v45, 0.0  ;;  %v7918_v48 = vmax.f32 %v7897_v52, 0.0 }
0x1d9e   :  { %v7857_v32 = vpop.f32.mrf.mxu1  ;;  %v7900_v56 = vpop.f32.mrf.mxu0 }
0x1d9f   :  { %v7858_v16 = vadd.f32 %v7857_v32, %v6894_v24  ;;  %v7901_v59 = vadd.f32 %v7900_v56, %v6902_v28  ;;  %10611 = vmatpush3.bf16.msra.mxu1 %v11302_v34  ;;  %10633 = vmatpush3.bf16.msra.mxu0 %v11303_v26  ;;  %v7931_v43 = vmax.f32 %v7856_v9, 0.0  ;;  %v7933_v46 = vmax.f32 %v7899_v41, 0.0 }
0x1da0   :  { %10612 = vmatprep.subr.bf16.mxu1 %v11304_v51  ;;  %10634 = vmatprep.subr.bf16.mxu0 %v11305_v36 }
0x1da1   :  { %v7932_v30 = vmax.f32 %v7858_v16, 0.0  ;;  %v7934_v57 = vmax.f32 %v7901_v59, 0.0  ;;  %v7947_v11 = vpack.c.bf16 %v7931_v43, %v7915_v60  ;;  %v7949_v63 = vpack.c.bf16 %v7933_v46, %v7917_v1 }
0x1da3   :  { %v7948_v61 = vpack.c.bf16 %v7932_v30, %v7916_v31  ;;  %v7950_v62 = vpack.c.bf16 %v7934_v57, %v7918_v48  ;;  %10613 = vmatpush3.bf16.msra.mxu1 %v11306_v39  ;;  %10635 = vmatpush3.bf16.msra.mxu0 %v11307_v42 }
0x1da4   :  { %10923 = vmatprep.subr.bf16.mxu1 %v11650_v0 }
0x1da5   :  { %9262 = vmatprep.mubr.bf16.mxu1 %v7948_v61  ;;  %9303 = vmatprep.mubr.bf16.mxu0 %v7950_v62 }
0x1da6   :  { %9263 = vmatmul.mubr.bf16.vlgmr.msra.gmra.mxu1 %v7947_v11  ;;  %9304 = vmatmul.mubr.bf16.vlgmr.msra.gmra.mxu0 %v7949_v63 }
0x1da7   :  { %10939 = vmatprep.mubr.msk.bf16.mxu1 %vm11651_vm0, %v11650_v0 }
0x1e06   :  { %v10482_v3 = vpop.f32.mrf.mxu1  ;;  %v10504_v44 = vpop.f32.mrf.mxu0 }
0x1e08   :  { %v10483_v23 = vpop.f32.mrf.mxu1  ;;  %v10505_v4 = vpop.f32.mrf.mxu0 }
0x1e09   :  { %v10484_v17 = vadd.f32 %v10483_v23, %v10482_v3  ;;  %v10506_v27 = vadd.f32 %v10505_v4, %v10504_v44 }
0x1e0a   :  { %v10485_v5 = vpop.f32.mrf.mxu1  ;;  %v10507_v7 = vpop.f32.mrf.mxu0 }
0x1e0b   :  { %v9019_v22 = vadd.f32 %v10484_v17, %v10041_v18  ;;  %v11311_v17 = vld [vmem:[%s12501_s16 + $0x20] sm:$0xff]  }
0x1e0c   :  { %v10486_v8 = vpop.f32.mrf.mxu1  ;;  %v10508_v15 = vpop.f32.mrf.mxu0 }
0x1e0d   :  { %v10487_v25 = vadd.f32 %v10486_v8, %v10485_v5  ;;  %v9060_v28 = vadd.f32 %v10506_v27, %v9019_v22  ;;  %v10509_v29 = vadd.f32 %v10508_v15, %v10507_v7 }
0x1e0f   :  { %v9022_v47 = vadd.f32 %v10487_v25, %v10041_v18  ;;  %v11312_v18 = vld [vmem:[%s12501_s16 + $0x18] sm:$0xff]  }
0x1e11   :  { %v9063_v49 = vadd.f32 %v10509_v29, %v9022_v47  ;;  %v10170_v47 = vld [vmem:[#allocation15 + $0x1] ss:$0 sm:$0xff]  ;;  %v10171_v29 = vld [vmem:[#allocation16 + $0x1] ss:$0 sm:$0xff] }
0x1e26   :  { %v10526_v33 = vpop.f32.mrf.mxu1  ;;  %v10548_v10 = vpop.f32.mrf.mxu0 }
0x1e28   :  { %v10527_v37 = vpop.f32.mrf.mxu1  ;;  %v10549_v12 = vpop.f32.mrf.mxu0 }
0x1e29   :  { %v10528_v53 = vadd.f32 %v10527_v37, %v10526_v33  ;;  %v10550_v35 = vadd.f32 %v10549_v12, %v10548_v10 }
0x1e2a   :  { %v10529_v13 = vpop.f32.mrf.mxu1  ;;  %v10551_v14 = vpop.f32.mrf.mxu0 }
0x1e2b   :  { %v9101_v54 = vadd.f32 %v10528_v53, %v9060_v28 }
0x1e2c   :  { %v10530_v2 = vpop.f32.mrf.mxu1  ;;  %v10552_v40 = vpop.f32.mrf.mxu0 }
0x1e2d   :  { %v10531_v34 = vadd.f32 %v10530_v2, %v10529_v13  ;;  %v9142_v45 = vadd.f32 %v10550_v35, %v9101_v54  ;;  %v10553_v41 = vadd.f32 %v10552_v40, %v10551_v14  ;;  %v11308_v2 = vld [vmem:[%s12501_s16 + $0x38] sm:$0xff]   ;;  %v11313_v40 = vld [vmem:[%s12501_s16 + $0x10] sm:$0xff]  }
0x1e2e   :  { %10924 = vmatpush3.bf16.msra.mxu1 %v11308_v2 }
0x1e2f   :  { %v9104_v52 = vadd.f32 %v10531_v34, %v9063_v49  ;;  %10925 = vmatprep.subr.bf16.mxu1 %v11650_v0 }
0x1e31   :  { %v9145_v16 = vadd.f32 %v10553_v41, %v9104_v52 }
0x1e46   :  { %v10570_v19 = vpop.f32.mrf.mxu1  ;;  %v10592_v21 = vpop.f32.mrf.mxu0 }
0x1e48   :  { %v10571_v20 = vpop.f32.mrf.mxu1  ;;  %v10593_v24 = vpop.f32.mrf.mxu0 }
0x1e49   :  { %v10572_v51 = vadd.f32 %v10571_v20, %v10570_v19  ;;  %v10594_v59 = vadd.f32 %v10593_v24, %v10592_v21  ;;  %v11314_v19 = vld [vmem:[%s12501_s16 + $0x8] sm:$0xff]   ;;  %v11315_v21 = vld [vmem:[%s12501_s16] sm:$0xff]  }
0x1e4a   :  { %v10573_v58 = vpop.f32.mrf.mxu1  ;;  %v10595_v26 = vpop.f32.mrf.mxu0 }
0x1e4b   :  { %v9183_v55 = vadd.f32 %v10572_v51, %v9142_v45 }
0x1e4c   :  { %v10574_v36 = vpop.f32.mrf.mxu1  ;;  %v10596_v9 = vpop.f32.mrf.mxu0 }
0x1e4d   :  { %v10575_v38 = vadd.f32 %v10574_v36, %v10573_v58  ;;  %v9224_v43 = vadd.f32 %v10594_v59, %v9183_v55  ;;  %v10597_v57 = vadd.f32 %v10596_v9, %v10595_v26 }
0x1e4f   :  { %v9186_v46 = vadd.f32 %v10575_v38, %v9145_v16 }
0x1e51   :  { %v9227_v11 = vadd.f32 %v10597_v57, %v9186_v46 }
0x1e66   :  { %v10614_v32 = vpop.f32.mrf.mxu1  ;;  %v10636_v56 = vpop.f32.mrf.mxu0 }
0x1e68   :  { %v10615_v39 = vpop.f32.mrf.mxu1  ;;  %v10637_v42 = vpop.f32.mrf.mxu0 }
0x1e69   :  { %v10616_v31 = vadd.f32 %v10615_v39, %v10614_v32  ;;  %v10638_v1 = vadd.f32 %v10637_v42, %v10636_v56 }
0x1e6a   :  { %v10617_v48 = vpop.f32.mrf.mxu1  ;;  %v10639_v30 = vpop.f32.mrf.mxu0 }
0x1e6b   :  { %v9265_v60 = vadd.f32 %v10616_v31, %v9224_v43 }
0x1e6c   :  { %v10618_v61 = vpop.f32.mrf.mxu1  ;;  %v10640_v62 = vpop.f32.mrf.mxu0 }
0x1e6d   :  { %v9306_v63 = vadd.f32 %v10638_v1, %v9265_v60  ;;  %v10619_v3 = vadd.f32 %v10618_v61, %v10617_v48  ;;  %v10641_v23 = vadd.f32 %v10640_v62, %v10639_v30  ;;  %v10172_v60 = vld [vmem:[#allocation18] ss:$0 sm:$0xff] }
0x1e6f   :  { %v9268_v44 = vadd.f32 %v10619_v3, %v9227_v11  ;;  %v9312_v4 = vadd.f32 %v9306_v63, %v12382_v6  ;;  %v11309_v6 = vld [vmem:[%s12501_s16 + $0x30] sm:$0xff]  }
0x1e70   :  { %10926 = vmatpush3.bf16.msra.mxu1 %v11309_v6 }
0x1e71   :  { %v9309_v5 = vadd.f32 %v10641_v23, %v9268_v44  ;;  %9318 = vadd.xlane.f32.xlu0 %v9312_v4  ;;  %10927 = vmatprep.subr.bf16.mxu1 %v11650_v0 }
0x1e73   :  { %v9313_v7 = vadd.f32 %v9309_v5, %v12384_v50  ;;  %v11310_v50 = vld [vmem:[%s12501_s16 + $0x28] sm:$0xff]  }
0x1e74   :  { %10928 = vmatpush3.bf16.msra.mxu1 %v11310_v50 }
0x1e75   :  { %9320 = vadd.xlane.f32.xlu0 %v9313_v7  ;;  %10929 = vmatprep.subr.bf16.mxu1 %v11650_v0 }
0x1e78   :  { %10930 = vmatpush3.bf16.msra.mxu1 %v11311_v17 }
0x1e79   :  { %10931 = vmatprep.subr.bf16.mxu1 %v11650_v0 }
0x1e7c   :  { %10932 = vmatpush3.bf16.msra.mxu1 %v11312_v18 }
0x1e7d   :  { %10933 = vmatprep.subr.bf16.mxu1 %v11650_v0 }
0x1e80   :  { %10934 = vmatpush3.bf16.msra.mxu1 %v11313_v40 }
0x1e81   :  { %10935 = vmatprep.subr.bf16.mxu1 %v11650_v0 }
0x1e84   :  { %10936 = vmatpush3.bf16.msra.mxu1 %v11314_v19 }
0x1e85   :  { %10937 = vmatprep.subr.bf16.mxu1 %v11650_v0 }
0x1e88   :  { %10938 = vmatpush3.bf16.msra.mxu1 %v11315_v21 }
0x1efa   :  { %v9319_v8 = vpop.xlane.xlu0 %9318 }
0x1efb   :  { %v9322_v15 = vmul.f32 0.0078125, %v9319_v8 }
0x1efd   :  { %v9324_v33 = vsub.f32 %v9312_v4, %v9322_v15 }
0x1efe   :  { %v9321_v10 = vpop.xlane.xlu0 %9320 }
0x1eff   :  { %v9323_v37 = vmul.f32 0.0078125, %v9321_v10  ;;  %v9326_v12 = vmul.f32 %v9324_v33, %v9324_v33 }
0x1f01   :  { %v9325_v13 = vsub.f32 %v9313_v7, %v9323_v37  ;;  %9328 = vadd.xlane.f32.xlu0 %v9326_v12 }
0x1f03   :  { %v9327_v14 = vmul.f32 %v9325_v13, %v9325_v13 }
0x1f05   :  { %9330 = vadd.xlane.f32.xlu1 %v9327_v14 }
0x1f8a   :  { %v9329_v22 = vpop.xlane.xlu0 %9328 }
0x1f8b   :  { %v9332_v25 = vmul.f32 0.0078125, %v9329_v22 }
0x1f8d   :  { %v9334_v20 = vadd.f32 1e-05, %v9332_v25 }
0x1f8e   :  { %v9331_v27 = vpop.xlane.xlu1 %9330 }
0x1f8f   :  { %11392 = vrsqrt.f32 %v9334_v20  ;;  %v9333_v53 = vmul.f32 0.0078125, %v9331_v27 }
0x1f91   :  { %v9335_v24 = vadd.f32 1e-05, %v9333_v53 }
0x1f93   :  { %11394 = vrsqrt.f32 %v9335_v24 }
0x1f9c   :  { %v11393_v28 = vpop.eup %11392 }
0x1f9d   :  { %v9338_v58 = vmul.f32 %v11393_v28, %v9324_v33 }
0x1f9f   :  { %v9346_v54 = vmul.f32 %v10170_v47, %v9338_v58 }
0x1fa0   :  { %v11395_v34 = vpop.eup %11394 }
0x1fa1   :  { %v9354_v26 = vadd.f32 %v10171_v29, %v9346_v54  ;;  %v9339_v49 = vmul.f32 %v11395_v34, %v9325_v13 }
0x1fa3   :  { %v9356_v35 = vrot.slane %v9354_v26, 4  ;;  %v9347_v51 = vmul.f32 %v10170_v47, %v9339_v49 }
0x1fa5   :  { %v9357_v0 = vadd.f32 %v9356_v35, %v9354_v26  ;;  %v9355_v36 = vadd.f32 %v10171_v29, %v9347_v51 }
0x1fa7   :  { %v9362_v45 = vrot.slane %v9355_v36, 4  ;;  %v9358_v52 = vrot.slane %v9357_v0, 2 }
0x1fa9   :  { %v9363_v9 = vadd.f32 %v9362_v45, %v9355_v36  ;;  %v9359_v41 = vadd.f32 %v9358_v52, %v9357_v0 }
0x1fab   :  { %v9360_v55 = vrot.slane %v9359_v41, 1  ;;  %v9364_v38 = vrot.slane %v9363_v9, 2 }
0x1fad   :  { %v9361_v32 = vadd.f32 %v9360_v55, %v9359_v41  ;;  %v9365_v56 = vadd.f32 %v9364_v38, %v9363_v9 }
0x1faf   :  { %v9366_v16 = vrot.slane %v9365_v56, 1  ;;  %v9369_v59 = vmul.f32 0.125, %v9361_v32 }
0x1fb1   :  { %v9367_v39 = vadd.f32 %v9366_v16, %v9365_v56  ;;  %v9371_v43 = vpack.c.bf16 %v9369_v59, %v9369_v59 }
0x1fb3   :  { %v9370_v42 = vmul.f32 0.125, %v9367_v39  ;;  %v9398_v31 = vunpack.c.l.b16 %v9371_v43 }
0x1fb5   :  { %v9372_v46 = vpack.c.bf16 %v9370_v42, %v9370_v42 }
0x1fb7   :  { %v9399_v48 = vunpack.c.l.b16 %v9372_v46 }
0x1fb9   :  { %v9401_v30 = vsel %vm9400_vm3, %v9399_v48, %v9398_v31 }
0x1fba   :  { %v9402_v57 = vpack.c.b16 %v9401_v30, %v9401_v30 }
0x1fbc   :  { %10940 = vmatmul.mubr.bf16.vlgmr.msra.gmra.mxu1 %v9402_v57 }
0x207c   :  { %v9486_v1 = vpop.f32.mrf.mxu1 }
0x207d   :  { %v9487_v61 = vadd.f32 %v10172_v60, %v9486_v1 }
0x207e   :  { %v10941_v62 = vpop.f32.mrf.mxu1 }
0x207f   :  { %9493 = vst.msk [vmem:[%s12503_s18] sm:$0x3] %vm9492_vm4, %v9487_v61 }
0x2080   :  { %v9489_v11 = vpop.f32.mrf.mxu1 }
0x2082   :  { %v10942_v63 = vpop.f32.mrf.mxu1 }
0x2083   :  { %9498 = vsyncpa [#allocation3], 1 }
0x2084   :  { %9499 = vsyncpa [#allocation5], 1 }
0x2085   :  { %9500 = vsyncpa [#allocation8], 1 }
0x2086   :  { %9501 = vsyncpa [#allocation11], 1 }
0x2087   :  { %9502 = vsyncpa [#allocation14], 1 }
0x2088   :  { %9503 = vsyncpa [#allocation17], 1 }

</bundles_post_ra>
